<compile_context>
chip_gen: v7x
topology: tpu7x:2x2x1
jax: 0.10.0
libtpu: 0.0.40
codegen_flags: <defaults>
</compile_context>

<pallas_src>
import functools

import jax
import jax.numpy as jnp
from jax.experimental import pallas as pl
from jax.experimental.pallas import tpu as pltpu


def _round_up(n, m):
    return ((n + m - 1) // m) * m


def autoencoder_kernel(x_ref,
                       w1_ref, b1_ref,
                       w23_ref, b23_ref,
                       w4_ref, b4_ref,
                       out_ref):
    """Fused encoder+decoder MLP for one batch tile (3 MXU matmuls)."""
    cdt = w1_ref.dtype                       # compute dtype (f32 or bf16)

    x = x_ref[...]                                                  # (tb, Dp)

    # encoder layer 1: Linear + ReLU          (f32 accumulation, f32 bias)
    h1 = jnp.dot(x, w1_ref[...], preferred_element_type=jnp.float32) + b1_ref[...]
    h1 = jnp.maximum(h1, 0.0).astype(cdt)                           # (tb, H)

    # encoder layer 2 + decoder layer 1 folded: relu(h1 @ (W2@W3) + (b2@W3+b3))
    h2 = jnp.dot(h1, w23_ref[...], preferred_element_type=jnp.float32) + b23_ref[...]
    h2 = jnp.maximum(h2, 0.0).astype(cdt)                           # (tb, H)

    # decoder layer 2: Linear
    rec = jnp.dot(h2, w4_ref[...], preferred_element_type=jnp.float32) + b4_ref[...]

    out_ref[...] = rec.astype(out_ref.dtype)                        # (tb, Dp)


@functools.partial(jax.jit, static_argnames=("tile_b", "compute_dtype"))
def autoencoder_forward(x, params, *, tile_b=256, compute_dtype=jnp.float32):
    """x: (B, 784) float32 -> reconstruction (B, 784) float32."""
    (w1, b1, w2, b2, w3, b3, w4, b4) = params
    B, D_in = x.shape
    H = w1.shape[1]

    # ---- fold the two latent (K=N=32) matmuls into one 128x128 matmul ----
    w23 = jnp.dot(w2, w3, preferred_element_type=jnp.float32)       # (H, H)
    b23 = jnp.dot(b2, w3, preferred_element_type=jnp.float32) + b3  # (1, H)

    # ---- lane-pad features to a multiple of 128 (784 -> 896) ----
    D_pad = _round_up(D_in, 128)
    pad_f = D_pad - D_in
    x_p = jnp.pad(x, ((0, 0), (0, pad_f)))
    w1_p = jnp.pad(w1, ((0, pad_f), (0, 0)))     # extra rows hit zero x cols
    w4_p = jnp.pad(w4, ((0, 0), (0, pad_f)))     # extra out cols are zero
    b4_p = jnp.pad(b4, ((0, 0), (0, pad_f)))

    # ---- batch tiling: multiple of 8 sublanes, capped by the batch ----
    tb = _round_up(min(tile_b, B), 8)
    B_pad = _round_up(B, tb)
    if B_pad != B:
        x_p = jnp.pad(x_p, ((0, B_pad - B), (0, 0)))

    # Optional bf16 compute (v6e/v7x MXU-native); biases & accumulation stay f32.
    x_p = x_p.astype(compute_dtype)
    w1_p = w1_p.astype(compute_dtype)
    w23_c = w23.astype(compute_dtype)
    w4_c = w4_p.astype(compute_dtype)

    grid = (B_pad // tb,)
    rep2 = lambda i: (0, 0)   # same block every step -> weights stay resident

    out = pl.pallas_call(
        autoencoder_kernel,
        out_shape=jax.ShapeDtypeStruct((B_pad, D_pad), jnp.float32),
        grid=grid,
        in_specs=[
            pl.BlockSpec((tb, D_pad), lambda i: (i, 0)),   # x (batch-tiled)
            pl.BlockSpec((D_pad, H), rep2),                # W1
            pl.BlockSpec((1, H), rep2),                    # b1
            pl.BlockSpec((H, H), rep2),                    # W23 (fused)
            pl.BlockSpec((1, H), rep2),                    # b23 (fused)
            pl.BlockSpec((H, D_pad), rep2),                # W4
            pl.BlockSpec((1, D_pad), rep2),                # b4
        ],
        out_specs=pl.BlockSpec((tb, D_pad), lambda i: (i, 0)),
        compiler_params=pltpu.CompilerParams(
            dimension_semantics=("parallel",),
            vmem_limit_bytes=48 * 1024 * 1024,
        ),
    )(x_p, w1_p, b1, w23_c, b23, w4_c, b4_p)

    return out[:B, :D_in]


def init_params(key, d_in=784, hidden=128, latent=32):
    """Deterministic init mimicking torch.nn.Linear default (U[-1/sqrt(fan_in), +])."""
    ks = jax.random.split(key, 8)

    def linear(kw, kb, fan_in, fan_out):
        bound = 1.0 / jnp.sqrt(float(fan_in))
        w = jax.random.uniform(kw, (fan_in, fan_out), jnp.float32, -bound, bound)
        b = jax.random.uniform(kb, (1, fan_out), jnp.float32, -bound, bound)
        return w, b

    w1, b1 = linear(ks[0], ks[1], d_in, hidden)     # encoder layer 1
    w2, b2 = linear(ks[2], ks[3], hidden, latent)   # encoder layer 2
    w3, b3 = linear(ks[4], ks[5], latent, hidden)   # decoder layer 1
    w4, b4 = linear(ks[6], ks[7], hidden, d_in)     # decoder layer 2
    return (w1, b1, w2, b2, w3, b3, w4, b4)


def reference_forward(x, params):
    """Unfused pure-JAX reference (exact original 4-layer forward)."""
    (w1, b1, w2, b2, w3, b3, w4, b4) = params
    h1 = jnp.maximum(x @ w1 + b1, 0.0)
    z = h1 @ w2 + b2
    h2 = jnp.maximum(z @ w3 + b3, 0.0)
    return h2 @ w4 + b4


# TODO(synk): only the forward pass is implemented; optimizer / training_step
# (Adam, backward) have no Pallas equivalent here.

if __name__ == "__main__":
    key = jax.random.PRNGKey(0)
    k_params, k_x = jax.random.split(key)

    B, D_in, HIDDEN, LATENT = 512, 784, 128, 32   # 784 = flattened 28x28 MNIST
    params = init_params(k_params, d_in=D_in, hidden=HIDDEN, latent=LATENT)

    # Simulate a flattened image batch (what training_step feeds into forward).
    x = jax.random.uniform(k_x, (B, D_in), jnp.float32)
    ref = reference_forward(x, params)

    # f32 path (grid of 2 steps at tile_b=256 -> megacore-shardable on v7x).
    out = jax.block_until_ready(autoencoder_forward(x, params))
    assert out.shape == (B, D_in)
    assert jnp.allclose(out, ref, atol=2e-3, rtol=2e-3), "f32 mismatch vs reference"

    # Ragged batch exercises the batch-padding path.
    out_small = jax.block_until_ready(autoencoder_forward(x[:10], params))
    assert out_small.shape == (10, D_in)
    assert jnp.allclose(out_small, ref[:10], atol=2e-3, rtol=2e-3), "ragged mismatch"

    # bf16 compute path (halves HBM traffic on v6e/v7x); looser tolerance.
    out_bf16 = jax.block_until_ready(
        autoencoder_forward(x, params, compute_dtype=jnp.bfloat16))
    assert jnp.allclose(out_bf16, ref, atol=5e-2, rtol=5e-2), "bf16 mismatch"

    print("KERNEL_OK")
</pallas_src>

<mosaic_0001>
module attributes {stable_mosaic.version = 11 : i64} {
  func.func @autoencoder_kernel(%arg0: i32, %arg1: memref<256x896xf32, #tpu.memory_space<vmem>>, %arg2: memref<896x128xf32, #tpu.memory_space<vmem>>, %arg3: memref<1x128xf32, #tpu.memory_space<vmem>>, %arg4: memref<128x128xf32, #tpu.memory_space<vmem>>, %arg5: memref<1x128xf32, #tpu.memory_space<vmem>>, %arg6: memref<128x896xf32, #tpu.memory_space<vmem>>, %arg7: memref<1x896xf32, #tpu.memory_space<vmem>>, %arg8: memref<256x896xf32, #tpu.memory_space<vmem>>) attributes {dimension_semantics = [#tpu.dimension_semantics<parallel>], iteration_bounds = array<i64: 2>, scalar_prefetch = 0 : i64, scratch_operands = 0 : i64, tpu.core_type = #tpu.core_type<tc>, window_params = [{transform_indices = @transform_0, window_bounds = array<i64: 256, 896>}, {pipeline_mode = #tpu.pipeline_mode<synchronous>, transform_indices = @transform_1, window_bounds = array<i64: 896, 128>}, {pipeline_mode = #tpu.pipeline_mode<synchronous>, transform_indices = @transform_2, window_bounds = array<i64: 1, 128>}, {pipeline_mode = #tpu.pipeline_mode<synchronous>, transform_indices = @transform_3, window_bounds = array<i64: 128, 128>}, {pipeline_mode = #tpu.pipeline_mode<synchronous>, transform_indices = @transform_4, window_bounds = array<i64: 1, 128>}, {pipeline_mode = #tpu.pipeline_mode<synchronous>, transform_indices = @transform_5, window_bounds = array<i64: 128, 896>}, {pipeline_mode = #tpu.pipeline_mode<synchronous>, transform_indices = @transform_6, window_bounds = array<i64: 1, 896>}, {transform_indices = @transform_7, window_bounds = array<i64: 256, 896>}]} {
    %c0 = arith.constant 0 : index
    %c0_0 = arith.constant 0 : index
    %0 = vector.load %arg1[%c0, %c0_0] : memref<256x896xf32, #tpu.memory_space<vmem>>, vector<256x896xf32>
    %c0_1 = arith.constant 0 : index
    %c0_2 = arith.constant 0 : index
    %1 = vector.load %arg2[%c0_1, %c0_2] : memref<896x128xf32, #tpu.memory_space<vmem>>, vector<896x128xf32>
    %cst = arith.constant dense<0.000000e+00> : vector<256x128xf32>
    %2 = tpu.matmul %0, %1, %cst {dimension_numbers = #tpu.dot_dimension_numbers<[1], [0], [0], [1], [0, 0, 1, 1], [], []>} : vector<256x896xf32>, vector<896x128xf32>, vector<256x128xf32> -> vector<256x128xf32>
    %c0_3 = arith.constant 0 : index
    %c0_4 = arith.constant 0 : index
    %3 = vector.load %arg3[%c0_3, %c0_4] : memref<1x128xf32, #tpu.memory_space<vmem>>, vector<1x128xf32>
    %4 = vector.broadcast %3 : vector<1x128xf32> to vector<256x128xf32>
    %5 = arith.addf %2, %4 : vector<256x128xf32>
    %cst_5 = arith.constant 0.000000e+00 : f32
    %6 = vector.broadcast %cst_5 : f32 to vector<256x128xf32>
    %7 = arith.maximumf %5, %6 : vector<256x128xf32>
    %c0_6 = arith.constant 0 : index
    %c0_7 = arith.constant 0 : index
    %8 = vector.load %arg4[%c0_6, %c0_7] : memref<128x128xf32, #tpu.memory_space<vmem>>, vector<128x128xf32>
    %cst_8 = arith.constant dense<0.000000e+00> : vector<256x128xf32>
    %9 = tpu.matmul %7, %8, %cst_8 {dimension_numbers = #tpu.dot_dimension_numbers<[1], [0], [0], [1], [0, 0, 1, 1], [], []>} : vector<256x128xf32>, vector<128x128xf32>, vector<256x128xf32> -> vector<256x128xf32>
    %c0_9 = arith.constant 0 : index
    %c0_10 = arith.constant 0 : index
    %10 = vector.load %arg5[%c0_9, %c0_10] : memref<1x128xf32, #tpu.memory_space<vmem>>, vector<1x128xf32>
    %11 = vector.broadcast %10 : vector<1x128xf32> to vector<256x128xf32>
    %12 = arith.addf %9, %11 : vector<256x128xf32>
    %cst_11 = arith.constant 0.000000e+00 : f32
    %13 = vector.broadcast %cst_11 : f32 to vector<256x128xf32>
    %14 = arith.maximumf %12, %13 : vector<256x128xf32>
    %c0_12 = arith.constant 0 : index
    %c0_13 = arith.constant 0 : index
    %15 = vector.load %arg6[%c0_12, %c0_13] : memref<128x896xf32, #tpu.memory_space<vmem>>, vector<128x896xf32>
    %cst_14 = arith.constant dense<0.000000e+00> : vector<256x896xf32>
    %16 = tpu.matmul %14, %15, %cst_14 {dimension_numbers = #tpu.dot_dimension_numbers<[1], [0], [0], [1], [0, 0, 1, 1], [], []>} : vector<256x128xf32>, vector<128x896xf32>, vector<256x896xf32> -> vector<256x896xf32>
    %c0_15 = arith.constant 0 : index
    %c0_16 = arith.constant 0 : index
    %17 = vector.load %arg7[%c0_15, %c0_16] : memref<1x896xf32, #tpu.memory_space<vmem>>, vector<1x896xf32>
    %18 = vector.broadcast %17 : vector<1x896xf32> to vector<256x896xf32>
    %19 = arith.addf %16, %18 : vector<256x896xf32>
    %c0_17 = arith.constant 0 : index
    %c0_18 = arith.constant 0 : index
    %20 = vector.load %arg8[%c0_17, %c0_18] : memref<256x896xf32, #tpu.memory_space<vmem>>, vector<256x896xf32>
    tpu.vector_store %arg8[%c0_17, %c0_18], %19 {strides = array<i32>} : memref<256x896xf32, #tpu.memory_space<vmem>>, vector<256x896xf32>,
    return
  }
  func.func @transform_0(%arg0: i32) -> (i32, i32) {
    %c0_i32 = arith.constant 0 : i32
    %c0_i32_0 = arith.constant 0 : i32
    return %arg0, %c0_i32 : i32, i32
  }
  func.func @transform_1(%arg0: i32) -> (i32, i32) {
    %c0_i32 = arith.constant 0 : i32
    %c0_i32_0 = arith.constant 0 : i32
    %c0_i32_1 = arith.constant 0 : i32
    return %c0_i32, %c0_i32_0 : i32, i32
  }
  func.func @transform_2(%arg0: i32) -> (i32, i32) {
    %c0_i32 = arith.constant 0 : i32
    %c0_i32_0 = arith.constant 0 : i32
    %c0_i32_1 = arith.constant 0 : i32
    return %c0_i32, %c0_i32_0 : i32, i32
  }
  func.func @transform_3(%arg0: i32) -> (i32, i32) {
    %c0_i32 = arith.constant 0 : i32
    %c0_i32_0 = arith.constant 0 : i32
    %c0_i32_1 = arith.constant 0 : i32
    return %c0_i32, %c0_i32_0 : i32, i32
  }
  func.func @transform_4(%arg0: i32) -> (i32, i32) {
    %c0_i32 = arith.constant 0 : i32
    %c0_i32_0 = arith.constant 0 : i32
    %c0_i32_1 = arith.constant 0 : i32
    return %c0_i32, %c0_i32_0 : i32, i32
  }
  func.func @transform_5(%arg0: i32) -> (i32, i32) {
    %c0_i32 = arith.constant 0 : i32
    %c0_i32_0 = arith.constant 0 : i32
    %c0_i32_1 = arith.constant 0 : i32
    return %c0_i32, %c0_i32_0 : i32, i32
  }
  func.func @transform_6(%arg0: i32) -> (i32, i32) {
    %c0_i32 = arith.constant 0 : i32
    %c0_i32_0 = arith.constant 0 : i32
    %c0_i32_1 = arith.constant 0 : i32
    return %c0_i32, %c0_i32_0 : i32, i32
  }
  func.func @transform_7(%arg0: i32) -> (i32, i32) {
    %c0_i32 = arith.constant 0 : i32
    %c0_i32_0 = arith.constant 0 : i32
    return %arg0, %c0_i32 : i32, i32
  }
}

</mosaic_0001>

<bundles_post_ra>
// kernel: autoencoder_forward.1
= control target key start
LH: loop header
LB: loop body
LE: loop exit
PB: predicated region body
PF: predicated region fallthrough
CT: control target
= control target key end

     0   :  { %s4224_s24 = smov 0   ;;  %s6186_s0 = inlined_call_operand.vmem [shape: f32[512,896], index: 0, kind: input, shape index: {}]   ;;  %s6187_s1 = inlined_call_operand.vmem [shape: f32[896,128], index: 1, kind: input, shape index: {}]   ;;  %s6188_s2 = inlined_call_operand.vmem [shape: f32[1,128], index: 2, kind: input, shape index: {}]   ;;  %s6189_s3 = inlined_call_operand.vmem [shape: f32[128,128], index: 3, kind: input, shape index: {}]   ;;  %s6190_s4 = inlined_call_operand.vmem [shape: f32[1,128], index: 4, kind: input, shape index: {}]   ;;  %s6191_s5 = inlined_call_operand.vmem [shape: f32[128,896], index: 5, kind: input, shape index: {}]   ;;  %s6192_s6 = inlined_call_operand.vmem [shape: f32[1,896], index: 6, kind: input, shape index: {}]   ;;  %s6193_s7 = inlined_call_operand.vmem [shape: f32[512,896], index: 7, kind: output, shape index: {}]  }
   0x1 LB: > { %s3269_s25 = sadd.s32 4294967295, %s4180_s24   ;;  %p3273_p0 = scmp.ge.s32.totalorder %s4180_s24, 1  ;;  %s4180_s24 = sphi %s4224_s24, %s17_s24  }
   0x2   : > { %p239_p1 = scmp.lt.s32.totalorder %s4180_s24, 3 }
   0x4   : > { %p240_p2 = pnand %p3273_p0, %p239_p1 }
   0x5   : > { %v511_v0 = vld [vmem:[%s6187_s1] sm:$0xff] (!%p240_p2)  ;;  %v512_v1 = vld [vmem:[%s6187_s1 + $0x8] sm:$0xff] (!%p240_p2)  ;;  %v513_v2 = vld [vmem:[%s6187_s1 + $0x10] sm:$0xff] (!%p240_p2)  ;;  %s3274_s9 = sshll.u32 (!%p240_p2), %s3269_s25, 5  ;;  %v4182_v3 = vmov (!%p240_p2), 0.0|0.0  }
   0x6   : > { %243 = sbr.rel (%p240_p2) target bundleno = 1362 (0x552), region = 48  ;;  %3666 = vmatprep.subr.bf16.mxu0 (!%p240_p2), %v4182_v3  ;;  %v3667_v4 = vpack.c.bf16 (!%p240_p2), %v512_v1, %v511_v0  ;;  %v514_v5 = vld [vmem:[%s6187_s1 + $0x18] sm:$0xff] (!%p240_p2)  ;;  %p274_p3 = scmp.lt.s32.totalorder (!%p240_p2), %s3274_s9, 63  ;;  %v515_v7 = vld [vmem:[%s6187_s1 + $0x20] sm:$0xff] (!%p240_p2)  ;;  %v516_v8 = vld [vmem:[%s6187_s1 + $0x28] sm:$0xff] (!%p240_p2) }
   0x7   : > { %v3670_v6 = vpack.c.bf16 (!%p240_p2), %v514_v5, %v513_v2  ;;  %v3673_v9 = vpack.c.bf16 (!%p240_p2), %v516_v8, %v515_v7  ;;  %v517_v10 = vld [vmem:[%s6187_s1 + $0x30] sm:$0xff] (!%p240_p2)  ;;  %v518_v11 = vld [vmem:[%s6187_s1 + $0x38] sm:$0xff] (!%p240_p2)  ;;  %v519_v14 = vld [vmem:[%s6187_s1 + $0x40] sm:$0xff] (!%p240_p2) }
   0x8   : > { %3668 = vmatpush1.bf16.msra.mxu0 (!%p240_p2), %v3667_v4  ;;  %v3676_v13 = vpack.c.bf16 (!%p240_p2), %v518_v11, %v517_v10  ;;  %v520_v15 = vld [vmem:[%s6187_s1 + $0x48] sm:$0xff] (!%p240_p2)  ;;  %v521_v17 = vld [vmem:[%s6187_s1 + $0x50] sm:$0xff] (!%p240_p2)  ;;  %v522_v18 = vld [vmem:[%s6187_s1 + $0x58] sm:$0xff] (!%p240_p2) }
   0x9   : > { %3669 = vmatprep.subr.bf16.mxu0 (!%p240_p2), %v4182_v3  ;;  %v3679_v16 = vpack.c.bf16 (!%p240_p2), %v520_v15, %v519_v14  ;;  %v3682_v19 = vpack.c.bf16 (!%p240_p2), %v522_v18, %v521_v17  ;;  %v523_v20 = vld [vmem:[%s6187_s1 + $0x60] sm:$0xff] (!%p240_p2)  ;;  %v524_v21 = vld [vmem:[%s6187_s1 + $0x68] sm:$0xff] (!%p240_p2)  ;;  %v525_v23 = vld [vmem:[%s6187_s1 + $0x70] sm:$0xff] (!%p240_p2) }
   0xa   : > { %v3685_v22 = vpack.c.bf16 (!%p240_p2), %v524_v21, %v523_v20  ;;  %v526_v24 = vld [vmem:[%s6187_s1 + $0x78] sm:$0xff] (!%p240_p2)  ;;  %v527_v26 = vld [vmem:[%s6187_s1 + $0x80] sm:$0xff] (!%p240_p2)  ;;  %v528_v27 = vld [vmem:[%s6187_s1 + $0x88] sm:$0xff] (!%p240_p2) }
   0xb   : > { %v3688_v25 = vpack.c.bf16 (!%p240_p2), %v526_v24, %v525_v23  ;;  %v3691_v28 = vpack.c.bf16 (!%p240_p2), %v528_v27, %v527_v26  ;;  %v529_v29 = vld [vmem:[%s6187_s1 + $0x90] sm:$0xff] (!%p240_p2)  ;;  %v530_v30 = vld [vmem:[%s6187_s1 + $0x98] sm:$0xff] (!%p240_p2)  ;;  %v531_v32 = vld [vmem:[%s6187_s1 + $0xa0] sm:$0xff] (!%p240_p2) }
   0xc   : > { %3671 = vmatpush1.bf16.msra.mxu0 (!%p240_p2), %v3670_v6  ;;  %v3694_v31 = vpack.c.bf16 (!%p240_p2), %v530_v30, %v529_v29  ;;  %v532_v33 = vld [vmem:[%s6187_s1 + $0xa8] sm:$0xff] (!%p240_p2)  ;;  %v533_v35 = vld [vmem:[%s6187_s1 + $0xb0] sm:$0xff] (!%p240_p2)  ;;  %v534_v36 = vld [vmem:[%s6187_s1 + $0xb8] sm:$0xff] (!%p240_p2) }
   0xd   : > { %s6195_s9 = smov (!%p274_p3, %s3274_s9), 63  ;;  %3672 = vmatprep.subr.bf16.mxu0 %v4182_v3  ;;  %v3697_v34 = vpack.c.bf16 %v532_v33, %v531_v32  ;;  %v3700_v37 = vpack.c.bf16 %v534_v36, %v533_v35  ;;  %v535_v38 = vld [vmem:[%s6187_s1 + $0xc0] sm:$0xff]  ;;  %v536_v39 = vld [vmem:[%s6187_s1 + $0xc8] sm:$0xff]  ;;  %v537_v41 = vld [vmem:[%s6187_s1 + $0xd0] sm:$0xff] }
   0xe   : > { %s4162_s16 = smul.u32 56, %s6195_s9  ;;  %v3703_v40 = vpack.c.bf16 %v536_v39, %v535_v38  ;;  %v538_v42 = vld [vmem:[%s6187_s1 + $0xd8] sm:$0xff]  ;;  %v539_v44 = vld [vmem:[%s6187_s1 + $0xe0] sm:$0xff]  ;;  %v540_v45 = vld [vmem:[%s6187_s1 + $0xe8] sm:$0xff] }
   0xf   : > { %v3706_v43 = vpack.c.bf16 %v538_v42, %v537_v41  ;;  %v3709_v46 = vpack.c.bf16 %v540_v45, %v539_v44  ;;  %v541_v47 = vld [vmem:[%s6187_s1 + $0xf0] sm:$0xff]  ;;  %v542_v48 = vld [vmem:[%s6187_s1 + $0xf8] sm:$0xff]  ;;  %v543_v50 = vld [vmem:[%s6187_s1 + $0x100] sm:$0xff] }
  0x10   : > { %s4260_s19 = scalar_lea.vmem %s6186_s0, %s4162_s16  ;;  %3674 = vmatpush1.bf16.msra.mxu0 %v3673_v9  ;;  %v3712_v49 = vpack.c.bf16 %v542_v48, %v541_v47  ;;  %v544_v51 = vld [vmem:[%s6187_s1 + $0x108] sm:$0xff]  ;;  %v545_v55 = vld [vmem:[%s6187_s1 + $0x110] sm:$0xff]  ;;  %v546_v56 = vld [vmem:[%s6187_s1 + $0x118] sm:$0xff]  ;;  %s5631_s29 = scalar_lea.vmem %s6193_s7, %s4162_s16 }
  0x11   : > { %v288_v12 = vld [vmem:[%s4260_s19 + $0x8] sm:$0xff]  ;;  %3675 = vmatprep.subr.bf16.mxu0 %v4182_v3  ;;  %v287_v52 = vld [vmem:[%s4260_s19] sm:$0xff]  ;;  %v3715_v53 = vpack.c.bf16 %v544_v51, %v543_v50  ;;  %v294_v57 = vld [vmem:[%s4260_s19 + $0x38] sm:$0xff]  ;;  %v3718_v58 = vpack.c.bf16 %v546_v56, %v545_v55 }
  0x12   : > { %694 = vmatprep.mubr.f32.mxu0 %v288_v12  ;;  %v295_v54 = vld [vmem:[%s4260_s19 + $0x40] sm:$0xff]  ;;  %v302_v59 = vld [vmem:[%s4260_s19 + $0x78] sm:$0xff]  ;;  %v548_v61 = vld [vmem:[%s6187_s1 + $0x128] sm:$0xff] }
  0x13   : > { %v547_v60 = vld [vmem:[%s6187_s1 + $0x120] sm:$0xff]  ;;  %v301_v62 = vld [vmem:[%s4260_s19 + $0x70] sm:$0xff]  ;;  %v550_v2 = vld [vmem:[%s6187_s1 + $0x138] sm:$0xff] }
  0x14   : > { %3677 = vmatpush1.bf16.msra.mxu0 %v3676_v13  ;;  %v3721_v63 = vpack.c.bf16 %v548_v61, %v547_v60  ;;  %v309_v0 = vld [vmem:[%s4260_s19 + $0xb0] sm:$0xff]  ;;  %v308_v4 = vld [vmem:[%s4260_s19 + $0xa8] sm:$0xff]  ;;  %v551_v7 = vld [vmem:[%s6187_s1 + $0x140] sm:$0xff] }
  0x15   : > { %3678 = vmatprep.subr.bf16.mxu0 %v4182_v3  ;;  %v549_v1 = vld [vmem:[%s6187_s1 + $0x130] sm:$0xff]  ;;  %v316_v6 = vld [vmem:[%s4260_s19 + $0xe8] sm:$0xff]  ;;  %v315_v9 = vld [vmem:[%s4260_s19 + $0xe0] sm:$0xff] }
  0x16   : > { %v3724_v5 = vpack.c.bf16 %v550_v2, %v549_v1  ;;  %v552_v8 = vld [vmem:[%s6187_s1 + $0x148] sm:$0xff]  ;;  %v323_v11 = vld [vmem:[%s4260_s19 + $0x120] sm:$0xff]  ;;  %v553_v12 = vld [vmem:[%s6187_s1 + $0x150] sm:$0xff] }
  0x17   : > { %v3727_v10 = vpack.c.bf16 %v552_v8, %v551_v7  ;;  %v554_v13 = vld [vmem:[%s6187_s1 + $0x158] sm:$0xff]  ;;  %v555_v17 = vld [vmem:[%s6187_s1 + $0x160] sm:$0xff]  ;;  %v556_v18 = vld [vmem:[%s6187_s1 + $0x168] sm:$0xff] }
  0x18   : > { %3680 = vmatpush1.bf16.msra.mxu0 %v3679_v16  ;;  %v322_v14 = vld [vmem:[%s4260_s19 + $0x118] sm:$0xff]  ;;  %v3730_v15 = vpack.c.bf16 %v554_v13, %v553_v12  ;;  %v3733_v20 = vpack.c.bf16 %v556_v18, %v555_v17  ;;  %v337_v21 = vld [vmem:[%s4260_s19 + $0x190] sm:$0xff]  ;;  %v336_v24 = vld [vmem:[%s4260_s19 + $0x188] sm:$0xff] }
  0x19   : > { %3681 = vmatprep.subr.bf16.mxu0 %v4182_v3  ;;  %v330_v16 = vld [vmem:[%s4260_s19 + $0x158] sm:$0xff]  ;;  %v344_v26 = vld [vmem:[%s4260_s19 + $0x1c8] sm:$0xff]  ;;  %v559_v27 = vld [vmem:[%s6187_s1 + $0x180] sm:$0xff] }
  0x1a   : > { %v558_v23 = vld [vmem:[%s6187_s1 + $0x178] sm:$0xff]  ;;  %v343_v29 = vld [vmem:[%s4260_s19 + $0x1c0] sm:$0xff]  ;;  %v561_v32 = vld [vmem:[%s6187_s1 + $0x190] sm:$0xff] }
  0x1b   : > { %v562_v33 = vld [vmem:[%s6187_s1 + $0x198] sm:$0xff]  ;;  %v564_v38 = vld [vmem:[%s6187_s1 + $0x1a8] sm:$0xff]  ;;  %v357_v39 = vld [vmem:[%s4260_s19 + $0x230] sm:$0xff] }
  0x1c   : > { %3683 = vmatpush1.bf16.msra.mxu0 %v3682_v19  ;;  %v329_v19 = vld [vmem:[%s4260_s19 + $0x150] sm:$0xff]  ;;  %v3742_v35 = vpack.c.bf16 %v562_v33, %v561_v32  ;;  %v358_v36 = vld [vmem:[%s4260_s19 + $0x238] sm:$0xff]  ;;  %v364_v44 = vld [vmem:[%s4260_s19 + $0x268] sm:$0xff] }
  0x1d   : > { %3684 = vmatprep.subr.bf16.mxu0 %v4182_v3  ;;  %v365_v41 = vld [vmem:[%s4260_s19 + $0x270] sm:$0xff]  ;;  %v567_v47 = vld [vmem:[%s6187_s1 + $0x1c0] sm:$0xff]  ;;  %v568_v48 = vld [vmem:[%s6187_s1 + $0x1c8] sm:$0xff] }
  0x1e   : > { %v565_v42 = vld [vmem:[%s6187_s1 + $0x1b0] sm:$0xff]  ;;  %v3751_v50 = vpack.c.bf16 %v568_v48, %v567_v47  ;;  %v379_v51 = vld [vmem:[%s4260_s19 + $0x2e0] sm:$0xff]  ;;  %v386_v56 = vld [vmem:[%s4260_s19 + $0x318] sm:$0xff] }
  0x1f   : > { %v393_v61 = vld [vmem:[%s4260_s19 + $0x350] sm:$0xff]  ;;  %v400_v2 = vld [vmem:[%s4260_s19 + $0x388] sm:$0xff]  ;;  %v414_v7 = vld [vmem:[%s4260_s19 + $0x3f8] sm:$0xff] }
  0x20   : > { %3686 = vmatpush1.bf16.msra.mxu0 %v3685_v22  ;;  %v557_v22 = vld [vmem:[%s6187_s1 + $0x170] sm:$0xff]  ;;  %v427_v12 = vld [vmem:[%s4260_s19 + $0x460] sm:$0xff]  ;;  %v448_v18 = vld [vmem:[%s4260_s19 + $0x508] sm:$0xff] }
  0x21   : > { %3687 = vmatprep.subr.bf16.mxu0 %v4182_v3  ;;  %v413_v8 = vld [vmem:[%s4260_s19 + $0x3f0] sm:$0xff]  ;;  %v435_v13 = vld [vmem:[%s4260_s19 + $0x4a0] sm:$0xff]  ;;  %v612_v33 = vld [vmem:[%s6187_s1 + $0x328] sm:$0xff] }
  0x22   : > { %v449_v17 = vld [vmem:[%s4260_s19 + $0x510] sm:$0xff]  ;;  %v611_v32 = vld [vmem:[%s6187_s1 + $0x320] sm:$0xff]  ;;  %v618_v48 = vld [vmem:[%s6187_s1 + $0x358] sm:$0xff] }
  0x23   : > { %v617_v47 = vld [vmem:[%s6187_s1 + $0x350] sm:$0xff] }
  0x24   : > { %3689 = vmatpush1.bf16.msra.mxu0 %v3688_v25  ;;  %v3736_v25 = vpack.c.bf16 %v558_v23, %v557_v22  ;;  %v607_v22 = vld [vmem:[%s6187_s1 + $0x300] sm:$0xff]  ;;  %v608_v23 = vld [vmem:[%s6187_s1 + $0x308] sm:$0xff] }
  0x25   : > { %3690 = vmatprep.subr.bf16.mxu0 %v4182_v3 }
  0x28   : > { %3692 = vmatpush1.bf16.msra.mxu0 %v3691_v28  ;;  %v560_v28 = vld [vmem:[%s6187_s1 + $0x188] sm:$0xff] }
  0x29   : > { %3693 = vmatprep.subr.bf16.mxu0 %v4182_v3  ;;  %v3739_v30 = vpack.c.bf16 %v560_v28, %v559_v27  ;;  %v609_v27 = vld [vmem:[%s6187_s1 + $0x310] sm:$0xff]  ;;  %v610_v28 = vld [vmem:[%s6187_s1 + $0x318] sm:$0xff] }
  0x2c   : > { %3695 = vmatpush1.bf16.msra.mxu0 %v3694_v31  ;;  %v351_v31 = vld [vmem:[%s4260_s19 + $0x200] sm:$0xff] }
  0x2d   : > { %3696 = vmatprep.subr.bf16.mxu0 %v4182_v3 }
  0x30   : > { %3698 = vmatpush1.bf16.msra.mxu0 %v3697_v34  ;;  %v350_v34 = vld [vmem:[%s4260_s19 + $0x1f8] sm:$0xff] }
  0x31   : > { %3699 = vmatprep.subr.bf16.mxu0 %v4182_v3 }
  0x34   : > { %3701 = vmatpush1.bf16.msra.mxu0 %v3700_v37  ;;  %v563_v37 = vld [vmem:[%s6187_s1 + $0x1a0] sm:$0xff] }
  0x35   : > { %3702 = vmatprep.subr.bf16.mxu0 %v4182_v3 }
  0x38   : > { %3704 = vmatpush1.bf16.msra.mxu0 %v3703_v40  ;;  %v3745_v40 = vpack.c.bf16 %v564_v38, %v563_v37  ;;  %v613_v37 = vld [vmem:[%s6187_s1 + $0x330] sm:$0xff]  ;;  %v614_v38 = vld [vmem:[%s6187_s1 + $0x338] sm:$0xff] }
  0x39   : > { %3705 = vmatprep.subr.bf16.mxu0 %v4182_v3 }
  0x3c   : > { %3707 = vmatpush1.bf16.msra.mxu0 %v3706_v43  ;;  %v566_v43 = vld [vmem:[%s6187_s1 + $0x1b8] sm:$0xff] }
  0x3d   : > { %3708 = vmatprep.subr.bf16.mxu0 %v4182_v3  ;;  %v3748_v45 = vpack.c.bf16 %v566_v43, %v565_v42  ;;  %v615_v42 = vld [vmem:[%s6187_s1 + $0x340] sm:$0xff]  ;;  %v616_v43 = vld [vmem:[%s6187_s1 + $0x348] sm:$0xff] }
  0x40   : > { %3710 = vmatpush1.bf16.msra.mxu0 %v3709_v46  ;;  %v372_v46 = vld [vmem:[%s4260_s19 + $0x2a8] sm:$0xff] }
  0x41   : > { %3711 = vmatprep.subr.bf16.mxu0 %v4182_v3 }
  0x44   : > { %3713 = vmatpush1.bf16.msra.mxu0 %v3712_v49  ;;  %v371_v49 = vld [vmem:[%s4260_s19 + $0x2a0] sm:$0xff] }
  0x45   : > { %3714 = vmatprep.subr.bf16.mxu0 %v4182_v3 }
  0x47   : > { %695 = vmatmul.mubr.f32.vlgmr.msra.gmra.mrb[0].mxu0 %v287_v52  ;;  %v569_v52 = vld [vmem:[%s6187_s1 + $0x1d0] sm:$0xff] }
  0x48   : > { %3716 = vmatpush1.bf16.msra.mxu0 %v3715_v53  ;;  %699 = vmatprep.mubr.f32.mxu0 %v295_v54  ;;  %v570_v53 = vld [vmem:[%s6187_s1 + $0x1d8] sm:$0xff] }
  0x49   : > { %3717 = vmatprep.subr.bf16.mxu0 %v4182_v3  ;;  %v378_v54 = vld [vmem:[%s4260_s19 + $0x2d8] sm:$0xff]  ;;  %v3754_v55 = vpack.c.bf16 %v570_v53, %v569_v52  ;;  %v619_v52 = vld [vmem:[%s6187_s1 + $0x360] sm:$0xff]  ;;  %v620_v53 = vld [vmem:[%s6187_s1 + $0x368] sm:$0xff] }
  0x4b   : > { %700 = vmatmul.mubr.f32.gmra.mrb[2].mxu0 %v294_v57  ;;  %v571_v57 = vld [vmem:[%s6187_s1 + $0x1e0] sm:$0xff] }
  0x4c   : > { %704 = vmatprep.mubr.f32.mxu0 %v302_v59  ;;  %3719 = vmatpush1.bf16.msra.mxu0 %v3718_v58  ;;  %v572_v58 = vld [vmem:[%s6187_s1 + $0x1e8] sm:$0xff]  ;;  %v385_v59 = vld [vmem:[%s4260_s19 + $0x310] sm:$0xff] }
  0x4d   : > { %3720 = vmatprep.subr.bf16.mxu0 %v4182_v3  ;;  %v3757_v60 = vpack.c.bf16 %v572_v58, %v571_v57  ;;  %v575_v57 = vld [vmem:[%s6187_s1 + $0x200] sm:$0xff]  ;;  %v576_v58 = vld [vmem:[%s6187_s1 + $0x208] sm:$0xff] }
  0x4f   : > { %705 = vmatmul.mubr.f32.gmra.mrb[4].mxu0 %v301_v62  ;;  %v573_v62 = vld [vmem:[%s6187_s1 + $0x1f0] sm:$0xff] }
  0x50   : > { %709 = vmatprep.mubr.f32.mxu0 %v309_v0  ;;  %3722 = vmatpush1.bf16.msra.mxu0 %v3721_v63  ;;  %v574_v63 = vld [vmem:[%s6187_s1 + $0x1f8] sm:$0xff]  ;;  %v392_v0 = vld [vmem:[%s4260_s19 + $0x348] sm:$0xff] }
  0x51   : > { %3723 = vmatprep.subr.bf16.mxu0 %v4182_v3  ;;  %v3760_v1 = vpack.c.bf16 %v574_v63, %v573_v62  ;;  %v289_v62 = vld [vmem:[%s4260_s19 + $0x10] sm:$0xff]  ;;  %v3763_v63 = vpack.c.bf16 %v576_v58, %v575_v57  ;;  %v595_v57 = vld [vmem:[%s6187_s1 + $0x2a0] sm:$0xff]  ;;  %v596_v58 = vld [vmem:[%s6187_s1 + $0x2a8] sm:$0xff] }
  0x53   : > { %710 = vmatmul.mubr.f32.gmra.mrb[6].mxu0 %v308_v4  ;;  %v399_v4 = vld [vmem:[%s4260_s19 + $0x380] sm:$0xff] }
  0x54   : > { %714 = vmatprep.mubr.f32.mxu0 %v316_v6  ;;  %3725 = vmatpush1.bf16.msra.mxu0 %v3724_v5  ;;  %v407_v5 = vld [vmem:[%s4260_s19 + $0x3c0] sm:$0xff]  ;;  %v406_v6 = vld [vmem:[%s4260_s19 + $0x3b8] sm:$0xff] }
  0x55   : > { %3726 = vmatprep.subr.bf16.mxu0 %v4182_v3 }
  0x57   : > { %715 = vmatmul.mubr.f32.gmra.mrb[8].mxu0 %v315_v9  ;;  %v421_v9 = vld [vmem:[%s4260_s19 + $0x430] sm:$0xff] }
  0x58   : > { %719 = vmatprep.mubr.f32.mxu0 %v323_v11  ;;  %3728 = vmatpush1.bf16.msra.mxu0 %v3727_v10  ;;  %v420_v10 = vld [vmem:[%s4260_s19 + $0x428] sm:$0xff] }
  0x59   : > { %3729 = vmatprep.subr.bf16.mxu0 %v4182_v3  ;;  %v428_v11 = vld [vmem:[%s4260_s19 + $0x468] sm:$0xff] }
  0x5b   : > { %720 = vmatmul.mubr.f32.gmra.mrb[10].mxu0 %v322_v14  ;;  %v434_v14 = vld [vmem:[%s4260_s19 + $0x498] sm:$0xff] }
  0x5c   : > { %724 = vmatprep.mubr.f32.mxu0 %v330_v16  ;;  %3731 = vmatpush1.bf16.msra.mxu0 %v3730_v15  ;;  %v442_v15 = vld [vmem:[%s4260_s19 + $0x4d8] sm:$0xff]  ;;  %v441_v16 = vld [vmem:[%s4260_s19 + $0x4d0] sm:$0xff] }
  0x5d   : > { %3732 = vmatprep.subr.bf16.mxu0 %v4182_v3 }
  0x5f   : > { %725 = vmatmul.mubr.f32.gmra.mrb[12].mxu0 %v329_v19  ;;  %v456_v19 = vld [vmem:[%s4260_s19 + $0x548] sm:$0xff] }
  0x60   : > { %729 = vmatprep.mubr.f32.mxu0 %v337_v21  ;;  %3734 = vmatpush1.bf16.msra.mxu0 %v3733_v20  ;;  %v455_v20 = vld [vmem:[%s4260_s19 + $0x540] sm:$0xff] }
  0x61   : > { %3735 = vmatprep.subr.bf16.mxu0 %v4182_v3  ;;  %v463_v21 = vld [vmem:[%s4260_s19 + $0x580] sm:$0xff] }
  0x63   : > { %730 = vmatmul.mubr.f32.gmra.mrb[14].mxu0 %v336_v24  ;;  %v3810_v24 = vpack.c.bf16 %v608_v23, %v607_v22  ;;  %v584_v22 = vld [vmem:[%s6187_s1 + $0x248] sm:$0xff]  ;;  %v317_v23 = vld [vmem:[%s4260_s19 + $0xf0] sm:$0xff] }
  0x64   : > { %734 = vmatprep.mubr.f32.mxu0 %v344_v26  ;;  %3737 = vmatpush1.bf16.msra.mxu0 %v3736_v25  ;;  %v462_v25 = vld [vmem:[%s4260_s19 + $0x578] sm:$0xff] }
  0x65   : > { %3738 = vmatprep.subr.bf16.mxu0 %v4182_v3  ;;  %3811 = vmatprep.subr.bf16.mxu1 %v3810_v24  ;;  %v470_v26 = vld [vmem:[%s4260_s19 + $0x5b8] sm:$0xff] }
  0x66   : > { %3813 = vmatpush3.bf16.msra.mxu1 %v3810_v24 }
  0x67   : > { %735 = vmatmul.mubr.f32.gmra.mrb[16].mxu0 %v343_v29  ;;  %v3814_v29 = vpack.c.bf16 %v610_v28, %v609_v27  ;;  %v586_v27 = vld [vmem:[%s6187_s1 + $0x258] sm:$0xff]  ;;  %v321_v28 = vld [vmem:[%s4260_s19 + $0x110] sm:$0xff] }
  0x68   : > { %739 = vmatprep.mubr.f32.mxu0 %v351_v31  ;;  %3740 = vmatpush1.bf16.msra.mxu0 %v3739_v30  ;;  %v469_v30 = vld [vmem:[%s4260_s19 + $0x5b0] sm:$0xff] }
  0x69   : > { %3741 = vmatprep.subr.bf16.mxu0 %v4182_v3  ;;  %3815 = vmatprep.subr.bf16.mxu1 %v3814_v29  ;;  %v477_v31 = vld [vmem:[%s4260_s19 + $0x5f0] sm:$0xff] }
  0x6a   : > { %3817 = vmatpush3.bf16.msra.mxu1 %v3814_v29  ;;  %v328_v29 = vld [vmem:[%s4260_s19 + $0x148] sm:$0xff] }
  0x6b   : > { %740 = vmatmul.mubr.f32.gmra.mrb[18].mxu0 %v350_v34  ;;  %v3818_v34 = vpack.c.bf16 %v612_v33, %v611_v32  ;;  %v332_v32 = vld [vmem:[%s4260_s19 + $0x168] sm:$0xff]  ;;  %v587_v33 = vld [vmem:[%s6187_s1 + $0x260] sm:$0xff] }
  0x6c   : > { %744 = vmatprep.mubr.f32.mxu0 %v358_v36  ;;  %3743 = vmatpush1.bf16.msra.mxu0 %v3742_v35  ;;  %v476_v35 = vld [vmem:[%s4260_s19 + $0x5e8] sm:$0xff] }
  0x6d   : > { %3744 = vmatprep.subr.bf16.mxu0 %v4182_v3  ;;  %3819 = vmatprep.subr.bf16.mxu1 %v3818_v34  ;;  %v484_v36 = vld [vmem:[%s4260_s19 + $0x628] sm:$0xff] }
  0x6e   : > { %3821 = vmatpush3.bf16.msra.mxu1 %v3818_v34  ;;  %v588_v34 = vld [vmem:[%s6187_s1 + $0x268] sm:$0xff] }
  0x6f   : > { %745 = vmatmul.mubr.f32.gmra.mrb[20].mxu0 %v357_v39  ;;  %v3822_v39 = vpack.c.bf16 %v614_v38, %v613_v37  ;;  %v339_v37 = vld [vmem:[%s4260_s19 + $0x1a0] sm:$0xff]  ;;  %v589_v38 = vld [vmem:[%s6187_s1 + $0x270] sm:$0xff] }
  0x70   : > { %749 = vmatprep.mubr.f32.mxu0 %v365_v41  ;;  %3746 = vmatpush1.bf16.msra.mxu0 %v3745_v40  ;;  %v483_v40 = vld [vmem:[%s4260_s19 + $0x620] sm:$0xff] }
  0x71   : > { %3747 = vmatprep.subr.bf16.mxu0 %v4182_v3  ;;  %3823 = vmatprep.subr.bf16.mxu1 %v3822_v39  ;;  %v491_v41 = vld [vmem:[%s4260_s19 + $0x660] sm:$0xff] }
  0x72   : > { %3825 = vmatpush3.bf16.msra.mxu1 %v3822_v39  ;;  %v590_v39 = vld [vmem:[%s6187_s1 + $0x278] sm:$0xff] }
  0x73   : > { %750 = vmatmul.mubr.f32.gmra.mrb[22].mxu0 %v364_v44  ;;  %v3826_v44 = vpack.c.bf16 %v616_v43, %v615_v42  ;;  %v338_v42 = vld [vmem:[%s4260_s19 + $0x198] sm:$0xff]  ;;  %v3784_v43 = vpack.c.bf16 %v590_v39, %v589_v38 }
  0x74   : > { %754 = vmatprep.mubr.f32.mxu0 %v372_v46  ;;  %3749 = vmatpush1.bf16.msra.mxu0 %v3748_v45  ;;  %v490_v45 = vld [vmem:[%s4260_s19 + $0x658] sm:$0xff] }
  0x75   : > { %3750 = vmatprep.subr.bf16.mxu0 %v4182_v3  ;;  %3827 = vmatprep.subr.bf16.mxu1 %v3826_v44  ;;  %v498_v46 = vld [vmem:[%s4260_s19 + $0x698] sm:$0xff] }
  0x76   : > { %3829 = vmatpush3.bf16.msra.mxu1 %v3826_v44  ;;  %v346_v44 = vld [vmem:[%s4260_s19 + $0x1d8] sm:$0xff] }
  0x77   : > { %755 = vmatmul.mubr.f32.gmra.mrb[24].mxu0 %v371_v49  ;;  %v3830_v49 = vpack.c.bf16 %v618_v48, %v617_v47  ;;  %v345_v47 = vld [vmem:[%s4260_s19 + $0x1d0] sm:$0xff]  ;;  %v426_v38 = vld [vmem:[%s4260_s19 + $0x458] sm:$0xff] }
  0x78   : > { %759 = vmatprep.mubr.f32.mxu0 %v379_v51  ;;  %3752 = vmatpush1.bf16.msra.mxu0 %v3751_v50  ;;  %v497_v50 = vld [vmem:[%s4260_s19 + $0x690] sm:$0xff]  ;;  %v422_v39 = vld [vmem:[%s4260_s19 + $0x438] sm:$0xff] }
  0x79   : > { %3753 = vmatprep.subr.bf16.mxu0 %v4182_v3  ;;  %3831 = vmatprep.subr.bf16.mxu1 %v3830_v49  ;;  %v505_v51 = vld [vmem:[%s4260_s19 + $0x6d0] sm:$0xff] }
  0x7a   : > { %3833 = vmatpush3.bf16.msra.mxu1 %v3830_v49  ;;  %v353_v49 = vld [vmem:[%s4260_s19 + $0x210] sm:$0xff] }
  0x7b   : > { %760 = vmatmul.mubr.f32.gmra.mrb[26].mxu0 %v378_v54  ;;  %v3834_v54 = vpack.c.bf16 %v620_v53, %v619_v52  ;;  %v349_v52 = vld [vmem:[%s4260_s19 + $0x1f0] sm:$0xff]  ;;  %v356_v53 = vld [vmem:[%s4260_s19 + $0x228] sm:$0xff] }
  0x7c   : > { %764 = vmatprep.mubr.f32.mxu0 %v386_v56  ;;  %3755 = vmatpush1.bf16.msra.mxu0 %v3754_v55  ;;  %v504_v55 = vld [vmem:[%s4260_s19 + $0x6c8] sm:$0xff]  ;;  %v290_v56 = vld [vmem:[%s4260_s19 + $0x18] sm:$0xff] }
  0x7d   : > { %3756 = vmatprep.subr.bf16.mxu0 %v4182_v3  ;;  %3835 = vmatprep.subr.bf16.mxu1 %v3834_v54 }
  0x7e   : > { %3837 = vmatpush3.bf16.msra.mxu1 %v3834_v54  ;;  %v352_v54 = vld [vmem:[%s4260_s19 + $0x208] sm:$0xff] }
  0x7f   : > { %765 = vmatmul.mubr.f32.gmra.mrb[28].mxu0 %v385_v59  ;;  %v621_v59 = vld [vmem:[%s6187_s1 + $0x370] sm:$0xff] }
  0x80   : > { %769 = vmatprep.mubr.f32.mxu0 %v393_v61  ;;  %3758 = vmatpush1.bf16.msra.mxu0 %v3757_v60  ;;  %v622_v60 = vld [vmem:[%s6187_s1 + $0x378] sm:$0xff] }
  0x81   : > { %3759 = vmatprep.subr.bf16.mxu0 %v4182_v3  ;;  %v3838_v61 = vpack.c.bf16 %v622_v60, %v621_v59  ;;  %v359_v59 = vld [vmem:[%s4260_s19 + $0x240] sm:$0xff]  ;;  %v3793_v60 = vpack.c.bf16 %v596_v58, %v595_v57  ;;  %v464_v57 = vld [vmem:[%s4260_s19 + $0x588] sm:$0xff] }
  0x82   : > { %v472_v58 = vld [vmem:[%s4260_s19 + $0x5c8] sm:$0xff] }
  0x83   : > { %770 = vmatmul.mubr.f32.gmra.mrb[30].mxu0 %v392_v0  ;;  %3839 = vmatprep.subr.bf16.mxu1 %v3838_v61  ;;  %v297_v0 = vld [vmem:[%s4260_s19 + $0x50] sm:$0xff] }
  0x84   : > { %774 = vmatprep.mubr.f32.mxu0 %v400_v2  ;;  %3761 = vmatpush1.bf16.msra.mxu0 %v3760_v1  ;;  %v577_v1 = vld [vmem:[%s6187_s1 + $0x210] sm:$0xff]  ;;  %v578_v2 = vld [vmem:[%s6187_s1 + $0x218] sm:$0xff] }
  0x85   : > { %3762 = vmatprep.subr.bf16.mxu0 %v4182_v3  ;;  %3841 = vmatpush3.bf16.msra.mxu1 %v3838_v61  ;;  %v367_v61 = vld [vmem:[%s4260_s19 + $0x280] sm:$0xff] }
  0x87   : > { %775 = vmatmul.mubr.f32.gmra.mrb[32].mxu0 %v399_v4  ;;  %v293_v4 = vld [vmem:[%s4260_s19 + $0x30] sm:$0xff] }
  0x88   : > { %779 = vmatprep.mubr.f32.mxu0 %v407_v5  ;;  %3458 = vmatprep.mubr.f32.mxu1 %v293_v4  ;;  %v300_v5 = vld [vmem:[%s4260_s19 + $0x68] sm:$0xff] }
  0x89   : > { %3459 = vmatmul.mubr.f32.vlgmr.msra.gmra.mrb[0].mxu1 %v300_v5  ;;  %v374_v5 = vld [vmem:[%s4260_s19 + $0x2b8] sm:$0xff] }
  0x8b   : > { %780 = vmatmul.mubr.f32.gmra.mrb[34].mxu0 %v406_v6  ;;  %v296_v6 = vld [vmem:[%s4260_s19 + $0x48] sm:$0xff] }
  0x8c   : > { %784 = vmatprep.mubr.f32.mxu0 %v414_v7  ;;  %v3766_v7 = vpack.c.bf16 %v578_v2, %v577_v1  ;;  %v370_v1 = vld [vmem:[%s4260_s19 + $0x298] sm:$0xff] }
  0x8d   : > { %v366_v2 = vld [vmem:[%s4260_s19 + $0x278] sm:$0xff] }
  0x8f   : > { %785 = vmatmul.mubr.f32.gmra.mrb[36].mxu0 %v413_v8  ;;  %v304_v8 = vld [vmem:[%s4260_s19 + $0x88] sm:$0xff] }
  0x90   : > { %789 = vmatprep.mubr.f32.mxu0 %v421_v9  ;;  %v579_v9 = vld [vmem:[%s6187_s1 + $0x220] sm:$0xff] }
  0x93   : > { %790 = vmatmul.mubr.f32.gmra.mrb[38].mxu0 %v420_v10  ;;  %v580_v10 = vld [vmem:[%s6187_s1 + $0x228] sm:$0xff] }
  0x94   : > { %794 = vmatprep.mubr.f32.mxu0 %v428_v11  ;;  %v303_v11 = vld [vmem:[%s4260_s19 + $0x80] sm:$0xff] }
  0x97   : > { %795 = vmatmul.mubr.f32.gmra.mrb[40].mxu0 %v427_v12  ;;  %v3769_v12 = vpack.c.bf16 %v580_v10, %v579_v9  ;;  %v381_v10 = vld [vmem:[%s4260_s19 + $0x2f0] sm:$0xff] }
  0x98   : > { %799 = vmatprep.mubr.f32.mxu0 %v435_v13  ;;  %v311_v13 = vld [vmem:[%s4260_s19 + $0xc0] sm:$0xff] }
  0x9b   : > { %800 = vmatmul.mubr.f32.gmra.mrb[42].mxu0 %v434_v14  ;;  %v581_v14 = vld [vmem:[%s6187_s1 + $0x230] sm:$0xff] }
  0x9c   : > { %804 = vmatprep.mubr.f32.mxu0 %v442_v15  ;;  %v582_v15 = vld [vmem:[%s6187_s1 + $0x238] sm:$0xff] }
  0x9f   : > { %805 = vmatmul.mubr.f32.gmra.mrb[44].mxu0 %v441_v16  ;;  %v307_v16 = vld [vmem:[%s4260_s19 + $0xa0] sm:$0xff] }
  0xa0   : > { %809 = vmatprep.mubr.f32.mxu0 %v449_v17  ;;  %3461 = vmatprep.mubr.f32.mxu1 %v307_v16  ;;  %v314_v17 = vld [vmem:[%s4260_s19 + $0xd8] sm:$0xff] }
  0xa1   : > { %3462 = vmatmul.mubr.f32.gmra.mrb[2].mxu1 %v314_v17  ;;  %v388_v17 = vld [vmem:[%s4260_s19 + $0x328] sm:$0xff] }
  0xa2   : > { %3464 = vmatprep.mubr.f32.mxu1 %v321_v28 }
  0xa3   : > { %810 = vmatmul.mubr.f32.gmra.mrb[46].mxu0 %v448_v18  ;;  %v310_v18 = vld [vmem:[%s4260_s19 + $0xb8] sm:$0xff] }
  0xa4   : > { %814 = vmatprep.mubr.f32.mxu0 %v456_v19  ;;  %v3772_v19 = vpack.c.bf16 %v582_v15, %v581_v14  ;;  %v384_v14 = vld [vmem:[%s4260_s19 + $0x308] sm:$0xff] }
  0xa5   : > { %3465 = vmatmul.mubr.f32.gmra.mrb[4].mxu1 %v328_v29  ;;  %v380_v15 = vld [vmem:[%s4260_s19 + $0x2e8] sm:$0xff]  ;;  %v402_v29 = vld [vmem:[%s4260_s19 + $0x398] sm:$0xff] }
  0xa7   : > { %815 = vmatmul.mubr.f32.gmra.mrb[48].mxu0 %v455_v20  ;;  %v318_v20 = vld [vmem:[%s4260_s19 + $0xf8] sm:$0xff] }
  0xa8   : > { %819 = vmatprep.mubr.f32.mxu0 %v463_v21  ;;  %v583_v21 = vld [vmem:[%s6187_s1 + $0x240] sm:$0xff] }
  0xa9   : > { %v3775_v24 = vpack.c.bf16 %v584_v22, %v583_v21  ;;  %v395_v22 = vld [vmem:[%s4260_s19 + $0x360] sm:$0xff] }
  0xab   : > { %820 = vmatmul.mubr.f32.gmra.mrb[50].mxu0 %v462_v25  ;;  %v325_v25 = vld [vmem:[%s4260_s19 + $0x130] sm:$0xff] }
  0xac   : > { %824 = vmatprep.mubr.f32.mxu0 %v470_v26  ;;  %v585_v26 = vld [vmem:[%s6187_s1 + $0x250] sm:$0xff] }
  0xaf   : > { %825 = vmatmul.mubr.f32.gmra.mrb[52].mxu0 %v469_v30  ;;  %v324_v30 = vld [vmem:[%s4260_s19 + $0x128] sm:$0xff] }
  0xb0   : > { %829 = vmatprep.mubr.f32.mxu0 %v477_v31  ;;  %v3778_v31 = vpack.c.bf16 %v586_v27, %v585_v26  ;;  %v398_v26 = vld [vmem:[%s4260_s19 + $0x378] sm:$0xff] }
  0xb1   : > { %v394_v27 = vld [vmem:[%s4260_s19 + $0x358] sm:$0xff] }
  0xb3   : > { %830 = vmatmul.mubr.f32.gmra.mrb[54].mxu0 %v476_v35  ;;  %v331_v35 = vld [vmem:[%s4260_s19 + $0x160] sm:$0xff] }
  0xb4   : > { %834 = vmatprep.mubr.f32.mxu0 %v484_v36  ;;  %v3781_v36 = vpack.c.bf16 %v588_v34, %v587_v33  ;;  %v412_v33 = vld [vmem:[%s4260_s19 + $0x3e8] sm:$0xff] }
  0xb5   : > { %v408_v34 = vld [vmem:[%s4260_s19 + $0x3c8] sm:$0xff] }
  0xb7   : > { %835 = vmatmul.mubr.f32.gmra.mrb[56].mxu0 %v483_v40  ;;  %v335_v40 = vld [vmem:[%s4260_s19 + $0x180] sm:$0xff] }
  0xb8   : > { %839 = vmatprep.mubr.f32.mxu0 %v491_v41  ;;  %3467 = vmatprep.mubr.f32.mxu1 %v335_v40  ;;  %v342_v41 = vld [vmem:[%s4260_s19 + $0x1b8] sm:$0xff] }
  0xb9   : > { %3468 = vmatmul.mubr.f32.gmra.mrb[6].mxu1 %v342_v41  ;;  %v430_v40 = vld [vmem:[%s4260_s19 + $0x478] sm:$0xff]  ;;  %v429_v41 = vld [vmem:[%s4260_s19 + $0x470] sm:$0xff] }
  0xba   : > { %3470 = vmatprep.mubr.f32.mxu1 %v349_v52  ;;  %v458_v52 = vld [vmem:[%s4260_s19 + $0x558] sm:$0xff] }
  0xbb   : > { %840 = vmatmul.mubr.f32.gmra.mrb[58].mxu0 %v490_v45  ;;  %v591_v45 = vld [vmem:[%s6187_s1 + $0x280] sm:$0xff] }
  0xbc   : > { %844 = vmatprep.mubr.f32.mxu0 %v498_v46  ;;  %v592_v46 = vld [vmem:[%s6187_s1 + $0x288] sm:$0xff] }
  0xbd   : > { %v3787_v48 = vpack.c.bf16 %v592_v46, %v591_v45  ;;  %3471 = vmatmul.mubr.f32.gmra.mrb[8].mxu1 %v356_v53  ;;  %v436_v45 = vld [vmem:[%s4260_s19 + $0x4a8] sm:$0xff]  ;;  %v457_v53 = vld [vmem:[%s4260_s19 + $0x550] sm:$0xff] }
  0xbe   : > { %v444_v46 = vld [vmem:[%s4260_s19 + $0x4e8] sm:$0xff] }
  0xbf   : > { %845 = vmatmul.mubr.f32.gmra.mrb[60].mxu0 %v497_v50  ;;  %v593_v50 = vld [vmem:[%s6187_s1 + $0x290] sm:$0xff] }
  0xc0   : > { %849 = vmatprep.mubr.f32.mxu0 %v505_v51  ;;  %v594_v51 = vld [vmem:[%s6187_s1 + $0x298] sm:$0xff] }
  0xc3   : > { %850 = vmatmul.mubr.f32.gmra.mrb[62].mxu0 %v504_v55  ;;  %v3790_v55 = vpack.c.bf16 %v594_v51, %v593_v50  ;;  %v454_v50 = vld [vmem:[%s4260_s19 + $0x538] sm:$0xff] }
  0xc4   : > { %919 = vmatprep.mubr.f32.mxu0 %v290_v56  ;;  %v360_v56 = vld [vmem:[%s4260_s19 + $0x248] sm:$0xff]  ;;  %v450_v51 = vld [vmem:[%s4260_s19 + $0x518] sm:$0xff] }
  0xc7   : > { %920 = vmatmul.mubr.f32.vlgmr.msra.gmra.mrb[0].mxu0 %v289_v62  ;;  %v597_v62 = vld [vmem:[%s6187_s1 + $0x2b0] sm:$0xff] }
  0xc8   : > { %3764 = vmatpush1.bf16.msra.mxu0 %v3763_v63  ;;  %924 = vmatprep.mubr.f32.mxu0 %v297_v0  ;;  %v598_v63 = vld [vmem:[%s6187_s1 + $0x2b8] sm:$0xff]  ;;  %v363_v0 = vld [vmem:[%s4260_s19 + $0x260] sm:$0xff] }
  0xc9   : > { %3765 = vmatprep.subr.bf16.mxu0 %v4182_v3  ;;  %3473 = vmatprep.mubr.f32.mxu1 %v363_v0  ;;  %v3796_v4 = vpack.c.bf16 %v598_v63, %v597_v62  ;;  %v482_v62 = vld [vmem:[%s4260_s19 + $0x618] sm:$0xff] }
  0xca   : > { %3474 = vmatmul.mubr.f32.gmra.mrb[10].mxu1 %v370_v1  ;;  %v478_v63 = vld [vmem:[%s4260_s19 + $0x5f8] sm:$0xff]  ;;  %v485_v1 = vld [vmem:[%s4260_s19 + $0x630] sm:$0xff] }
  0xcb   : > { %925 = vmatmul.mubr.f32.gmra.mrb[2].mxu0 %v296_v6  ;;  %v599_v6 = vld [vmem:[%s6187_s1 + $0x2c0] sm:$0xff]  ;;  %v486_v0 = vld [vmem:[%s4260_s19 + $0x638] sm:$0xff] }
  0xcc   : > { %929 = vmatprep.mubr.f32.mxu0 %v304_v8  ;;  %3767 = vmatpush1.bf16.msra.mxu0 %v3766_v7  ;;  %v600_v7 = vld [vmem:[%s6187_s1 + $0x2c8] sm:$0xff]  ;;  %v373_v8 = vld [vmem:[%s4260_s19 + $0x2b0] sm:$0xff] }
  0xcd   : > { %3768 = vmatprep.subr.bf16.mxu0 %v4182_v3  ;;  %v3799_v9 = vpack.c.bf16 %v600_v7, %v599_v6  ;;  %v492_v6 = vld [vmem:[%s4260_s19 + $0x668] sm:$0xff] }
  0xce   : > { %v500_v7 = vld [vmem:[%s4260_s19 + $0x6a8] sm:$0xff] }
  0xcf   : > { %930 = vmatmul.mubr.f32.gmra.mrb[4].mxu0 %v303_v11  ;;  %v601_v11 = vld [vmem:[%s6187_s1 + $0x2d0] sm:$0xff] }
  0xd0   : > { %934 = vmatprep.mubr.f32.mxu0 %v311_v13  ;;  %3770 = vmatpush1.bf16.msra.mxu0 %v3769_v12  ;;  %v602_v12 = vld [vmem:[%s6187_s1 + $0x2d8] sm:$0xff]  ;;  %v377_v13 = vld [vmem:[%s4260_s19 + $0x2d0] sm:$0xff] }
  0xd1   : > { %3771 = vmatprep.subr.bf16.mxu0 %v4182_v3  ;;  %3476 = vmatprep.mubr.f32.mxu1 %v377_v13  ;;  %v3802_v16 = vpack.c.bf16 %v602_v12, %v601_v11  ;;  %v510_v11 = vld [vmem:[%s4260_s19 + $0x6f8] sm:$0xff]  ;;  %v292_v13 = vld [vmem:[%s4260_s19 + $0x28] sm:$0xff] }
  0xd2   : > { %3477 = vmatmul.mubr.f32.gmra.mrb[12].mxu1 %v384_v14  ;;  %v506_v12 = vld [vmem:[%s4260_s19 + $0x6d8] sm:$0xff]  ;;  %v1562_v14 = vld [vmem:[%s6189_s3] sm:$0xff] }
  0xd3   : > { %935 = vmatmul.mubr.f32.gmra.mrb[6].mxu0 %v310_v18  ;;  %v603_v18 = vld [vmem:[%s6187_s1 + $0x2e0] sm:$0xff] }
  0xd4   : > { %939 = vmatprep.mubr.f32.mxu0 %v318_v20  ;;  %3773 = vmatpush1.bf16.msra.mxu0 %v3772_v19  ;;  %v604_v19 = vld [vmem:[%s6187_s1 + $0x2e8] sm:$0xff]  ;;  %v387_v20 = vld [vmem:[%s4260_s19 + $0x320] sm:$0xff] }
  0xd5   : > { %3774 = vmatprep.subr.bf16.mxu0 %v4182_v3  ;;  %v3805_v21 = vpack.c.bf16 %v604_v19, %v603_v18  ;;  %v1565_v19 = vld [vmem:[%s6189_s3 + $0x18] sm:$0xff] }
  0xd7   : > { %940 = vmatmul.mubr.f32.gmra.mrb[8].mxu0 %v317_v23  ;;  %v605_v23 = vld [vmem:[%s6187_s1 + $0x2f0] sm:$0xff] }
  0xd8   : > { %944 = vmatprep.mubr.f32.mxu0 %v325_v25  ;;  %3776 = vmatpush1.bf16.msra.mxu0 %v3775_v24  ;;  %v606_v24 = vld [vmem:[%s6187_s1 + $0x2f8] sm:$0xff]  ;;  %v391_v25 = vld [vmem:[%s4260_s19 + $0x340] sm:$0xff] }
  0xd9   : > { %3777 = vmatprep.subr.bf16.mxu0 %v4182_v3  ;;  %3479 = vmatprep.mubr.f32.mxu1 %v391_v25  ;;  %v3808_v28 = vpack.c.bf16 %v606_v24, %v605_v23  ;;  %v1567_v23 = vld [vmem:[%s6189_s3 + $0x28] sm:$0xff]  ;;  %v298_v24 = vld [vmem:[%s4260_s19 + $0x58] sm:$0xff] }
  0xda   : > { %3480 = vmatmul.mubr.f32.gmra.mrb[14].mxu1 %v398_v26  ;;  %v306_v26 = vld [vmem:[%s4260_s19 + $0x98] sm:$0xff] }
  0xdb   : > { %945 = vmatmul.mubr.f32.gmra.mrb[10].mxu0 %v324_v30  ;;  %v401_v30 = vld [vmem:[%s4260_s19 + $0x390] sm:$0xff] }
  0xdc   : > { %949 = vmatprep.mubr.f32.mxu0 %v332_v32  ;;  %3779 = vmatpush1.bf16.msra.mxu0 %v3778_v31  ;;  %v409_v31 = vld [vmem:[%s4260_s19 + $0x3d0] sm:$0xff] }
  0xdd   : > { %3780 = vmatprep.subr.bf16.mxu0 %v4182_v3  ;;  %v405_v32 = vld [vmem:[%s4260_s19 + $0x3b0] sm:$0xff] }
  0xde   : > { %3482 = vmatprep.mubr.f32.mxu1 %v405_v32  ;;  %v1570_v32 = vld [vmem:[%s6189_s3 + $0x40] sm:$0xff] }
  0xdf   : > { %950 = vmatmul.mubr.f32.gmra.mrb[12].mxu0 %v331_v35  ;;  %3483 = vmatmul.mubr.f32.gmra.mrb[16].mxu1 %v412_v33  ;;  %v415_v35 = vld [vmem:[%s4260_s19 + $0x400] sm:$0xff]  ;;  %v1571_v33 = vld [vmem:[%s6189_s3 + $0x48] sm:$0xff] }
  0xe0   : > { %954 = vmatprep.mubr.f32.mxu0 %v339_v37  ;;  %3782 = vmatpush1.bf16.msra.mxu0 %v3781_v36  ;;  %v423_v36 = vld [vmem:[%s4260_s19 + $0x440] sm:$0xff] }
  0xe1   : > { %3783 = vmatprep.subr.bf16.mxu0 %v4182_v3  ;;  %v419_v37 = vld [vmem:[%s4260_s19 + $0x420] sm:$0xff] }
  0xe2   : > { %3485 = vmatprep.mubr.f32.mxu1 %v419_v37  ;;  %v1573_v37 = vld [vmem:[%s6189_s3 + $0x58] sm:$0xff] }
  0xe3   : > { %955 = vmatmul.mubr.f32.gmra.mrb[14].mxu0 %v338_v42  ;;  %3486 = vmatmul.mubr.f32.gmra.mrb[18].mxu1 %v426_v38  ;;  %v437_v42 = vld [vmem:[%s4260_s19 + $0x4b0] sm:$0xff]  ;;  %v319_v38 = vld [vmem:[%s4260_s19 + $0x100] sm:$0xff] }
  0xe4   : > { %959 = vmatprep.mubr.f32.mxu0 %v346_v44  ;;  %3785 = vmatpush1.bf16.msra.mxu0 %v3784_v43  ;;  %v433_v43 = vld [vmem:[%s4260_s19 + $0x490] sm:$0xff]  ;;  %v440_v44 = vld [vmem:[%s4260_s19 + $0x4c8] sm:$0xff] }
  0xe5   : > { %3786 = vmatprep.subr.bf16.mxu0 %v4182_v3  ;;  %3488 = vmatprep.mubr.f32.mxu1 %v433_v43  ;;  %v326_v43 = vld [vmem:[%s4260_s19 + $0x138] sm:$0xff] }
  0xe7   : > { %960 = vmatmul.mubr.f32.gmra.mrb[16].mxu0 %v345_v47  ;;  %3489 = vmatmul.mubr.f32.gmra.mrb[20].mxu1 %v440_v44  ;;  %v443_v47 = vld [vmem:[%s4260_s19 + $0x4e0] sm:$0xff] }
  0xe8   : > { %964 = vmatprep.mubr.f32.mxu0 %v353_v49  ;;  %3788 = vmatpush1.bf16.msra.mxu0 %v3787_v48  ;;  %v451_v48 = vld [vmem:[%s4260_s19 + $0x520] sm:$0xff] }
  0xe9   : > { %3789 = vmatprep.subr.bf16.mxu0 %v4182_v3  ;;  %v447_v49 = vld [vmem:[%s4260_s19 + $0x500] sm:$0xff] }
  0xea   : > { %3491 = vmatprep.mubr.f32.mxu1 %v447_v49  ;;  %v348_v49 = vld [vmem:[%s4260_s19 + $0x1e8] sm:$0xff] }
  0xeb   : > { %965 = vmatmul.mubr.f32.gmra.mrb[18].mxu0 %v352_v54  ;;  %3492 = vmatmul.mubr.f32.gmra.mrb[22].mxu1 %v454_v50  ;;  %v465_v54 = vld [vmem:[%s4260_s19 + $0x590] sm:$0xff]  ;;  %v347_v50 = vld [vmem:[%s4260_s19 + $0x1e0] sm:$0xff] }
  0xec   : > { %969 = vmatprep.mubr.f32.mxu0 %v360_v56  ;;  %3791 = vmatpush1.bf16.msra.mxu0 %v3790_v55  ;;  %v461_v55 = vld [vmem:[%s4260_s19 + $0x570] sm:$0xff]  ;;  %v468_v56 = vld [vmem:[%s4260_s19 + $0x5a8] sm:$0xff] }
  0xed   : > { %3792 = vmatprep.subr.bf16.mxu0 %v4182_v3  ;;  %3494 = vmatprep.mubr.f32.mxu1 %v461_v55  ;;  %v369_v55 = vld [vmem:[%s4260_s19 + $0x290] sm:$0xff] }
  0xef   : > { %970 = vmatmul.mubr.f32.gmra.mrb[20].mxu0 %v359_v59  ;;  %3495 = vmatmul.mubr.f32.gmra.mrb[24].mxu1 %v468_v56  ;;  %v471_v59 = vld [vmem:[%s4260_s19 + $0x5c0] sm:$0xff]  ;;  %v368_v56 = vld [vmem:[%s4260_s19 + $0x288] sm:$0xff] }
  0xf0   : > { %974 = vmatprep.mubr.f32.mxu0 %v367_v61  ;;  %3794 = vmatpush1.bf16.msra.mxu0 %v3793_v60  ;;  %v479_v60 = vld [vmem:[%s4260_s19 + $0x600] sm:$0xff] }
  0xf1   : > { %3795 = vmatprep.subr.bf16.mxu0 %v4182_v3  ;;  %v475_v61 = vld [vmem:[%s4260_s19 + $0x5e0] sm:$0xff] }
  0xf2   : > { %3497 = vmatprep.mubr.f32.mxu1 %v475_v61  ;;  %v390_v61 = vld [vmem:[%s4260_s19 + $0x338] sm:$0xff] }
  0xf3   : > { %975 = vmatmul.mubr.f32.gmra.mrb[22].mxu0 %v366_v2  ;;  %3498 = vmatmul.mubr.f32.gmra.mrb[26].mxu1 %v482_v62  ;;  %v493_v2 = vld [vmem:[%s4260_s19 + $0x670] sm:$0xff] }
  0xf4   : > { %979 = vmatprep.mubr.f32.mxu0 %v374_v5  ;;  %3797 = vmatpush1.bf16.msra.mxu0 %v3796_v4  ;;  %v489_v4 = vld [vmem:[%s4260_s19 + $0x650] sm:$0xff]  ;;  %v496_v5 = vld [vmem:[%s4260_s19 + $0x688] sm:$0xff] }
  0xf5   : > { %3798 = vmatprep.subr.bf16.mxu0 %v4182_v3  ;;  %3500 = vmatprep.mubr.f32.mxu1 %v489_v4  ;;  %v389_v62 = vld [vmem:[%s4260_s19 + $0x330] sm:$0xff]  ;;  %v411_v4 = vld [vmem:[%s4260_s19 + $0x3e0] sm:$0xff] }
  0xf7   : > { %980 = vmatmul.mubr.f32.gmra.mrb[24].mxu0 %v373_v8  ;;  %3501 = vmatmul.mubr.f32.gmra.mrb[28].mxu1 %v496_v5  ;;  %v499_v8 = vld [vmem:[%s4260_s19 + $0x6a0] sm:$0xff]  ;;  %v410_v5 = vld [vmem:[%s4260_s19 + $0x3d8] sm:$0xff] }
  0xf8   : > { %984 = vmatprep.mubr.f32.mxu0 %v381_v10  ;;  %3800 = vmatpush1.bf16.msra.mxu0 %v3799_v9  ;;  %v507_v9 = vld [vmem:[%s4260_s19 + $0x6e0] sm:$0xff] }
  0xf9   : > { %3801 = vmatprep.subr.bf16.mxu0 %v4182_v3  ;;  %v503_v10 = vld [vmem:[%s4260_s19 + $0x6c0] sm:$0xff] }
  0xfa   : > { %3503 = vmatprep.mubr.f32.mxu1 %v503_v10  ;;  %v432_v10 = vld [vmem:[%s4260_s19 + $0x488] sm:$0xff] }
  0xfb   : > { %985 = vmatmul.mubr.f32.gmra.mrb[26].mxu0 %v380_v15  ;;  %3504 = vmatmul.mubr.f32.gmra.mrb[30].mxu1 %v510_v11  ;;  %v1563_v15 = vld [vmem:[%s6189_s3 + $0x8] sm:$0xff]  ;;  %v431_v11 = vld [vmem:[%s4260_s19 + $0x480] sm:$0xff] }
  0xfc   : > { %989 = vmatprep.mubr.f32.mxu0 %v388_v17  ;;  %3803 = vmatpush1.bf16.msra.mxu0 %v3802_v16  ;;  %v1564_v16 = vld [vmem:[%s6189_s3 + $0x10] sm:$0xff]  ;;  %v291_v17 = vld [vmem:[%s4260_s19 + $0x20] sm:$0xff]  ;;  %v3842_v18 = vpack.c.bf16 %v1563_v15, %v1562_v14  ;;  %v446_v14 = vld [vmem:[%s4260_s19 + $0x4f8] sm:$0xff] }
  0xfd   : > { %3804 = vmatprep.subr.bf16.mxu0 %v4182_v3  ;;  %v445_v15 = vld [vmem:[%s4260_s19 + $0x4f0] sm:$0xff] }
  0xfe   : > { %3843 = vmatprep.subr.bf16.mxu1 %v3842_v18 }
  0xff   : > { %990 = vmatmul.mubr.f32.gmra.mrb[28].mxu0 %v387_v20  ;;  %v299_v20 = vld [vmem:[%s4260_s19 + $0x60] sm:$0xff]  ;;  %3845 = vmatpush3.bf16.msra.mxu1 %v3842_v18 }
 0x100   : > { %994 = vmatprep.mubr.f32.mxu0 %v395_v22  ;;  %3806 = vmatpush1.bf16.msra.mxu0 %v3805_v21  ;;  %v3846_v21 = vpack.c.bf16 %v1565_v19, %v1564_v16  ;;  %v1566_v22 = vld [vmem:[%s6189_s3 + $0x20] sm:$0xff]  ;;  %v1576_v19 = vld [vmem:[%s6189_s3 + $0x70] sm:$0xff] }
 0x101   : > { %3807 = vmatprep.subr.bf16.mxu0 %v4182_v3  ;;  %v416_v3 = vld [vmem:[%s4260_s19 + $0x408] sm:$0xff]  ;;  %v3850_v25 = vpack.c.bf16 %v1567_v23, %v1566_v22 }
 0x102   : > { %3847 = vmatprep.subr.bf16.mxu1 %v3846_v21  ;;  %v452_v22 = vld [vmem:[%s4260_s19 + $0x528] sm:$0xff] }
 0x103   : > { %995 = vmatmul.mubr.f32.gmra.mrb[30].mxu0 %v394_v27  ;;  %v1568_v27 = vld [vmem:[%s6189_s3 + $0x30] sm:$0xff]  ;;  %3849 = vmatpush3.bf16.msra.mxu1 %v3846_v21  ;;  %v460_v23 = vld [vmem:[%s4260_s19 + $0x568] sm:$0xff] }
 0x104   : > { %999 = vmatprep.mubr.f32.mxu0 %v402_v29  ;;  %3809 = vmatpush1.bf16.msra.mxu0 %v3808_v28  ;;  %v1569_v28 = vld [vmem:[%s6189_s3 + $0x38] sm:$0xff]  ;;  %v305_v29 = vld [vmem:[%s4260_s19 + $0x90] sm:$0xff] }
 0x105   : > { %3851 = vmatprep.subr.bf16.mxu1 %v3850_v25 }
 0x107   : > { %1000 = vmatmul.mubr.f32.gmra.mrb[32].mxu0 %v401_v30  ;;  %v3854_v30 = vpack.c.bf16 %v1569_v28, %v1568_v27  ;;  %3853 = vmatpush3.bf16.msra.mxu1 %v3850_v25  ;;  %v466_v28 = vld [vmem:[%s4260_s19 + $0x598] sm:$0xff] }
 0x108   : > { %1004 = vmatprep.mubr.f32.mxu0 %v409_v31  ;;  %v313_v31 = vld [vmem:[%s4260_s19 + $0xd0] sm:$0xff] }
 0x109   : > { %3855 = vmatprep.subr.bf16.mxu1 %v3854_v30 }
 0x10b   : > { %1005 = vmatmul.mubr.f32.gmra.mrb[34].mxu0 %v408_v34  ;;  %v312_v34 = vld [vmem:[%s4260_s19 + $0xc8] sm:$0xff]  ;;  %3857 = vmatpush3.bf16.msra.mxu1 %v3854_v30  ;;  %v473_v30 = vld [vmem:[%s4260_s19 + $0x5d0] sm:$0xff] }
 0x10c   : > { %1009 = vmatprep.mubr.f32.mxu0 %v416_v3  ;;  %v3858_v3 = vpack.c.bf16 %v1571_v33, %v1570_v32  ;;  %v481_v32 = vld [vmem:[%s4260_s19 + $0x610] sm:$0xff] }
 0x10e   : > { %3859 = vmatprep.subr.bf16.mxu1 %v3858_v3 }
 0x10f   : > { %1010 = vmatmul.mubr.f32.gmra.mrb[36].mxu0 %v415_v35  ;;  %v320_v35 = vld [vmem:[%s4260_s19 + $0x108] sm:$0xff]  ;;  %3861 = vmatpush3.bf16.msra.mxu1 %v3858_v3 }
 0x110   : > { %1014 = vmatprep.mubr.f32.mxu0 %v423_v36  ;;  %v1572_v36 = vld [vmem:[%s6189_s3 + $0x50] sm:$0xff]  ;;  %v488_v3 = vld [vmem:[%s4260_s19 + $0x648] sm:$0xff] }
 0x113   : > { %1015 = vmatmul.mubr.f32.gmra.mrb[38].mxu0 %v422_v39  ;;  %v3862_v39 = vpack.c.bf16 %v1573_v37, %v1572_v36  ;;  %v495_v37 = vld [vmem:[%s4260_s19 + $0x680] sm:$0xff] }
 0x114   : > { %1019 = vmatprep.mubr.f32.mxu0 %v430_v40  ;;  %v327_v40 = vld [vmem:[%s4260_s19 + $0x140] sm:$0xff] }
 0x115   : > { %3863 = vmatprep.subr.bf16.mxu1 %v3862_v39 }
 0x116   : > { %3865 = vmatpush3.bf16.msra.mxu1 %v3862_v39  ;;  %v494_v39 = vld [vmem:[%s4260_s19 + $0x678] sm:$0xff] }
 0x117   : > { %1020 = vmatmul.mubr.f32.gmra.mrb[40].mxu0 %v429_v41  ;;  %v1574_v41 = vld [vmem:[%s6189_s3 + $0x60] sm:$0xff] }
 0x118   : > { %1024 = vmatprep.mubr.f32.mxu0 %v437_v42  ;;  %v1575_v42 = vld [vmem:[%s6189_s3 + $0x68] sm:$0xff] }
 0x119   : > { %v3866_v44 = vpack.c.bf16 %v1575_v42, %v1574_v41  ;;  %v501_v41 = vld [vmem:[%s4260_s19 + $0x6b0] sm:$0xff] }
 0x11b   : > { %1025 = vmatmul.mubr.f32.gmra.mrb[42].mxu0 %v436_v45  ;;  %v334_v45 = vld [vmem:[%s4260_s19 + $0x178] sm:$0xff]  ;;  %3867 = vmatprep.subr.bf16.mxu1 %v3866_v44 }
 0x11c   : > { %1029 = vmatprep.mubr.f32.mxu0 %v444_v46  ;;  %v333_v46 = vld [vmem:[%s4260_s19 + $0x170] sm:$0xff]  ;;  %3869 = vmatpush3.bf16.msra.mxu1 %v3866_v44 }
 0x11f   : > { %1030 = vmatmul.mubr.f32.gmra.mrb[44].mxu0 %v443_v47  ;;  %v341_v47 = vld [vmem:[%s4260_s19 + $0x1b0] sm:$0xff] }
 0x120   : > { %1034 = vmatprep.mubr.f32.mxu0 %v451_v48  ;;  %v340_v48 = vld [vmem:[%s4260_s19 + $0x1a8] sm:$0xff] }
 0x123   : > { %1035 = vmatmul.mubr.f32.gmra.mrb[46].mxu0 %v450_v51  ;;  %v355_v51 = vld [vmem:[%s4260_s19 + $0x220] sm:$0xff] }
 0x124   : > { %1039 = vmatprep.mubr.f32.mxu0 %v458_v52  ;;  %v354_v52 = vld [vmem:[%s4260_s19 + $0x218] sm:$0xff] }
 0x127   : > { %1040 = vmatmul.mubr.f32.gmra.mrb[48].mxu0 %v457_v53  ;;  %v362_v53 = vld [vmem:[%s4260_s19 + $0x258] sm:$0xff] }
 0x128   : > { %1044 = vmatprep.mubr.f32.mxu0 %v465_v54  ;;  %v361_v54 = vld [vmem:[%s4260_s19 + $0x250] sm:$0xff] }
 0x12b   : > { %1045 = vmatmul.mubr.f32.gmra.mrb[50].mxu0 %v464_v57  ;;  %v376_v57 = vld [vmem:[%s4260_s19 + $0x2c8] sm:$0xff] }
 0x12c   : > { %1049 = vmatprep.mubr.f32.mxu0 %v472_v58  ;;  %v375_v58 = vld [vmem:[%s4260_s19 + $0x2c0] sm:$0xff] }
 0x12f   : > { %1050 = vmatmul.mubr.f32.gmra.mrb[52].mxu0 %v471_v59  ;;  %v383_v59 = vld [vmem:[%s4260_s19 + $0x300] sm:$0xff] }
 0x130   : > { %1054 = vmatprep.mubr.f32.mxu0 %v479_v60  ;;  %v382_v60 = vld [vmem:[%s4260_s19 + $0x2f8] sm:$0xff] }
 0x133   : > { %1055 = vmatmul.mubr.f32.gmra.mrb[54].mxu0 %v478_v63  ;;  %v397_v63 = vld [vmem:[%s4260_s19 + $0x370] sm:$0xff] }
 0x134   : > { %1059 = vmatprep.mubr.f32.mxu0 %v486_v0  ;;  %v396_v0 = vld [vmem:[%s4260_s19 + $0x368] sm:$0xff] }
 0x137   : > { %1060 = vmatmul.mubr.f32.gmra.mrb[56].mxu0 %v485_v1  ;;  %v404_v1 = vld [vmem:[%s4260_s19 + $0x3a8] sm:$0xff] }
 0x138   : > { %1064 = vmatprep.mubr.f32.mxu0 %v493_v2  ;;  %v403_v2 = vld [vmem:[%s4260_s19 + $0x3a0] sm:$0xff] }
 0x13b   : > { %1065 = vmatmul.mubr.f32.gmra.mrb[58].mxu0 %v492_v6  ;;  %v418_v6 = vld [vmem:[%s4260_s19 + $0x418] sm:$0xff] }
 0x13c   : > { %1069 = vmatprep.mubr.f32.mxu0 %v500_v7  ;;  %v417_v7 = vld [vmem:[%s4260_s19 + $0x410] sm:$0xff] }
 0x13f   : > { %1070 = vmatmul.mubr.f32.gmra.mrb[60].mxu0 %v499_v8  ;;  %v425_v8 = vld [vmem:[%s4260_s19 + $0x450] sm:$0xff] }
 0x140   : > { %1074 = vmatprep.mubr.f32.mxu0 %v507_v9  ;;  %v424_v9 = vld [vmem:[%s4260_s19 + $0x448] sm:$0xff] }
 0x143   : > { %1075 = vmatmul.mubr.f32.gmra.mrb[62].mxu0 %v506_v12  ;;  %v439_v12 = vld [vmem:[%s4260_s19 + $0x4c0] sm:$0xff] }
 0x144   : > { %1144 = vmatprep.mubr.f32.mxu0 %v292_v13  ;;  %v438_v13 = vld [vmem:[%s4260_s19 + $0x4b8] sm:$0xff] }
 0x147   : > { %1145 = vmatmul.mubr.f32.vlgmr.msra.gmra.mrb[0].mxu0 %v291_v17  ;;  %v453_v17 = vld [vmem:[%s4260_s19 + $0x530] sm:$0xff] }
 0x148   : > { %1149 = vmatprep.mubr.f32.mxu0 %v299_v20  ;;  %v1577_v20 = vld [vmem:[%s6189_s3 + $0x78] sm:$0xff] }
 0x149   : > { %v3870_v21 = vpack.c.bf16 %v1577_v20, %v1576_v19  ;;  %v1842_v19 = vld [vmem:[%s6191_s5] sm:$0xff]  ;;  %v1857_v20 = vld [vmem:[%s6191_s5 + $0x78] sm:$0xff] }
 0x14b   : > { %1150 = vmatmul.mubr.f32.gmra.mrb[2].mxu0 %v298_v24  ;;  %3871 = vmatprep.subr.bf16.mxu1 %v3870_v21  ;;  %v459_v24 = vld [vmem:[%s4260_s19 + $0x560] sm:$0xff] }
 0x14c   : > { %1154 = vmatprep.mubr.f32.mxu0 %v306_v26  ;;  %3873 = vmatpush3.bf16.msra.mxu1 %v3870_v21  ;;  %v467_v26 = vld [vmem:[%s4260_s19 + $0x5a0] sm:$0xff]  ;;  %v1864_v21 = vld [vmem:[%s6191_s5 + $0xb0] sm:$0xff] }
 0x14f   : > { %1155 = vmatmul.mubr.f32.gmra.mrb[4].mxu0 %v305_v29  ;;  %v474_v29 = vld [vmem:[%s4260_s19 + $0x5d8] sm:$0xff] }
 0x150   : > { %1159 = vmatprep.mubr.f32.mxu0 %v313_v31 }
 0x153   : > { %1160 = vmatmul.mubr.f32.gmra.mrb[6].mxu0 %v312_v34  ;;  %v480_v34 = vld [vmem:[%s4260_s19 + $0x608] sm:$0xff] }
 0x154   : > { %1164 = vmatprep.mubr.f32.mxu0 %v320_v35  ;;  %v487_v35 = vld [vmem:[%s4260_s19 + $0x640] sm:$0xff] }
 0x157   : > { %1165 = vmatmul.mubr.f32.gmra.mrb[8].mxu0 %v319_v38 }
 0x158   : > { %1169 = vmatprep.mubr.f32.mxu0 %v327_v40  ;;  %v502_v40 = vld [vmem:[%s4260_s19 + $0x6b8] sm:$0xff] }
 0x15b   : > { %1170 = vmatmul.mubr.f32.gmra.mrb[10].mxu0 %v326_v43  ;;  %v509_v43 = vld [vmem:[%s4260_s19 + $0x6f0] sm:$0xff] }
 0x15c   : > { %1174 = vmatprep.mubr.f32.mxu0 %v334_v45  ;;  %v4874_v16 = vpop.f32.mrb[0].mxu1  ;;  %v508_v45 = vld [vmem:[%s4260_s19 + $0x6e8] sm:$0xff] }
 0x15d   : > { %v4877_v18 = vpop.f32.mrb[1].mxu1 }
 0x15f   : > { %1175 = vmatmul.mubr.f32.gmra.mrb[12].mxu0 %v333_v46 }
 0x160   : > { %1179 = vmatprep.mubr.f32.mxu0 %v341_v47 }
 0x163   : > { %1180 = vmatmul.mubr.f32.gmra.mrb[14].mxu0 %v340_v48 }
 0x164   : > { %1184 = vmatprep.mubr.f32.mxu0 %v348_v49 }
 0x167   : > { %1185 = vmatmul.mubr.f32.gmra.mrb[16].mxu0 %v347_v50 }
 0x168   : > { %1189 = vmatprep.mubr.f32.mxu0 %v355_v51 }
 0x16b   : > { %1190 = vmatmul.mubr.f32.gmra.mrb[18].mxu0 %v354_v52 }
 0x16c   : > { %1194 = vmatprep.mubr.f32.mxu0 %v362_v53 }
 0x16f   : > { %1195 = vmatmul.mubr.f32.gmra.mrb[20].mxu0 %v361_v54 }
 0x170   : > { %1199 = vmatprep.mubr.f32.mxu0 %v369_v55 }
 0x173   : > { %1200 = vmatmul.mubr.f32.gmra.mrb[22].mxu0 %v368_v56 }
 0x174   : > { %1204 = vmatprep.mubr.f32.mxu0 %v376_v57  ;;  %v4888_v25 = vpop.f32.mrb[2].mxu1 }
 0x175   : > { %v4891_v27 = vpop.f32.mrb[3].mxu1 }
 0x177   : > { %1205 = vmatmul.mubr.f32.gmra.mrb[24].mxu0 %v375_v58 }
 0x178   : > { %1209 = vmatprep.mubr.f32.mxu0 %v383_v59  ;;  %v4896_v31 = vpop.f32.mrb[4].mxu1 }
 0x179   : > { %v4899_v33 = vpop.f32.mrb[5].mxu1 }
 0x17b   : > { %1210 = vmatmul.mubr.f32.gmra.mrb[26].mxu0 %v382_v60 }
 0x17c   : > { %1214 = vmatprep.mubr.f32.mxu0 %v390_v61 }
 0x17f   : > { %1215 = vmatmul.mubr.f32.gmra.mrb[28].mxu0 %v389_v62 }
 0x180   : > { %1219 = vmatprep.mubr.f32.mxu0 %v397_v63 }
 0x183   : > { %1220 = vmatmul.mubr.f32.gmra.mrb[30].mxu0 %v396_v0 }
 0x184   : > { %1224 = vmatprep.mubr.f32.mxu0 %v404_v1 }
 0x187   : > { %1225 = vmatmul.mubr.f32.gmra.mrb[32].mxu0 %v403_v2 }
 0x188   : > { %1229 = vmatprep.mubr.f32.mxu0 %v411_v4 }
 0x18b   : > { %1230 = vmatmul.mubr.f32.gmra.mrb[34].mxu0 %v410_v5  ;;  %v4965_v5 = vld [vmem:[%s6188_s2] ss:$0 sm:$0xff] }
 0x18c   : > { %1234 = vmatprep.mubr.f32.mxu0 %v418_v6  ;;  %v4904_v36 = vpop.f32.mrb[6].mxu1 }
 0x18d   : > { %v4907_v38 = vpop.f32.mrb[7].mxu1 }
 0x18f   : > { %1235 = vmatmul.mubr.f32.gmra.mrb[36].mxu0 %v417_v7 }
 0x190   : > { %1239 = vmatprep.mubr.f32.mxu0 %v425_v8  ;;  %v4912_v42 = vpop.f32.mrb[8].mxu1 }
 0x191   : > { %v4915_v44 = vpop.f32.mrb[9].mxu1 }
 0x193   : > { %1240 = vmatmul.mubr.f32.gmra.mrb[38].mxu0 %v424_v9 }
 0x194   : > { %1244 = vmatprep.mubr.f32.mxu0 %v432_v10  ;;  %v1843_v10 = vld [vmem:[%s6191_s5 + $0x8] sm:$0xff] }
 0x197   : > { %1245 = vmatmul.mubr.f32.gmra.mrb[40].mxu0 %v431_v11  ;;  %v1850_v11 = vld [vmem:[%s6191_s5 + $0x40] sm:$0xff] }
 0x198   : > { %1249 = vmatprep.mubr.f32.mxu0 %v439_v12 }
 0x19b   : > { %1250 = vmatmul.mubr.f32.gmra.mrb[42].mxu0 %v438_v13  ;;  %v3874_v13 = vpack.c.bf16 %v1850_v11, %v1843_v10 }
 0x19c   : > { %1254 = vmatprep.mubr.f32.mxu0 %v446_v14 }
 0x19d   : > { %v4918_v46 = vpop.f32.mrb[10].mxu1  ;;  %3875 = vmatprep.subr.bf16.mxu1 %v3874_v13  ;;  %v1870_v13 = vld [vmem:[%s6191_s5 + $0xe0] sm:$0xff] }
 0x19e   : > { %v4920_v47 = vpop.f32.mrb[11].mxu1 }
 0x19f   : > { %1255 = vmatmul.mubr.f32.gmra.mrb[44].mxu0 %v445_v15 }
 0x1a0   : > { %1259 = vmatprep.mubr.f32.mxu0 %v453_v17 }
 0x1a3   : > { %1260 = vmatmul.mubr.f32.gmra.mrb[46].mxu0 %v452_v22 }
 0x1a4   : > { %1264 = vmatprep.mubr.f32.mxu0 %v460_v23 }
 0x1a5   : > { %v4922_v48 = vpop.f32.mrb[12].mxu1 }
 0x1a6   : > { %v4924_v49 = vpop.f32.mrb[13].mxu1 }
 0x1a7   : > { %1265 = vmatmul.mubr.f32.gmra.mrb[48].mxu0 %v459_v24 }
 0x1a8   : > { %1269 = vmatprep.mubr.f32.mxu0 %v467_v26  ;;  %v1856_v26 = vld [vmem:[%s6191_s5 + $0x70] sm:$0xff] }
 0x1ab   : > { %1270 = vmatmul.mubr.f32.gmra.mrb[50].mxu0 %v466_v28  ;;  %v1863_v28 = vld [vmem:[%s6191_s5 + $0xa8] sm:$0xff] }
 0x1ac   : > { %1274 = vmatprep.mubr.f32.mxu0 %v474_v29 }
 0x1ad   : > { %v4926_v50 = vpop.f32.mrb[14].mxu1 }
 0x1ae   : > { %v4928_v51 = vpop.f32.mrb[15].mxu1 }
 0x1af   : > { %1275 = vmatmul.mubr.f32.gmra.mrb[52].mxu0 %v473_v30 }
 0x1b0   : > { %1279 = vmatprep.mubr.f32.mxu0 %v481_v32 }
 0x1b2   : > { %v4930_v52 = vpop.f32.mrb[16].mxu1 }
 0x1b3   : > { %1280 = vmatmul.mubr.f32.gmra.mrb[54].mxu0 %v480_v34  ;;  %v4932_v53 = vpop.f32.mrb[17].mxu1  ;;  %v3878_v34 = vpack.c.bf16 %v1864_v21, %v1857_v20 }
 0x1b4   : > { %1284 = vmatprep.mubr.f32.mxu0 %v488_v3  ;;  %v1878_v3 = vld [vmem:[%s6191_s5 + $0x120] sm:$0xff] }
 0x1b6   : > { %v4934_v54 = vpop.f32.mrb[18].mxu1 }
 0x1b7   : > { %1285 = vmatmul.mubr.f32.gmra.mrb[56].mxu0 %v487_v35  ;;  %v4936_v55 = vpop.f32.mrb[19].mxu1  ;;  %v1848_v35 = vld [vmem:[%s6191_s5 + $0x30] sm:$0xff] }
 0x1b8   : > { %1289 = vmatprep.mubr.f32.mxu0 %v495_v37  ;;  %v1855_v37 = vld [vmem:[%s6191_s5 + $0x68] sm:$0xff] }
 0x1ba   : > { %v4938_v56 = vpop.f32.mrb[20].mxu1 }
 0x1bb   : > { %1290 = vmatmul.mubr.f32.gmra.mrb[58].mxu0 %v494_v39  ;;  %v4940_v57 = vpop.f32.mrb[21].mxu1  ;;  %v1862_v39 = vld [vmem:[%s6191_s5 + $0xa0] sm:$0xff] }
 0x1bc   : > { %1294 = vmatprep.mubr.f32.mxu0 %v502_v40  ;;  %v1869_v40 = vld [vmem:[%s6191_s5 + $0xd8] sm:$0xff] }
 0x1be   : > { %v4942_v58 = vpop.f32.mrb[22].mxu1 }
 0x1bf   : > { %1295 = vmatmul.mubr.f32.gmra.mrb[60].mxu0 %v501_v41  ;;  %v4944_v59 = vpop.f32.mrb[23].mxu1 }
 0x1c0   : > { %1299 = vmatprep.mubr.f32.mxu0 %v509_v43  ;;  %v3970_v43 = vpack.c.bf16 %v1855_v37, %v1848_v35 }
 0x1c2   : > { %v4946_v60 = vpop.f32.mrb[24].mxu1  ;;  %3971 = vmatprep.subr.bf16.mxu0 %v3970_v43 }
 0x1c3   : > { %1300 = vmatmul.mubr.f32.gmra.mrb[62].mxu0 %v508_v45  ;;  %v4948_v61 = vpop.f32.mrb[25].mxu1  ;;  %v3974_v45 = vpack.c.bf16 %v1869_v40, %v1862_v39  ;;  %v1904_v39 = vld [vmem:[%s6191_s5 + $0x1f0] sm:$0xff]  ;;  %v1911_v40 = vld [vmem:[%s6191_s5 + $0x228] sm:$0xff] }
 0x1c4   : > { %3973 = vmatpush3.bf16.msra.mxu0 %v3970_v43 }
 0x1c5   : > { %3975 = vmatprep.subr.bf16.mxu0 %v3974_v45 }
 0x1c6   : > { %v4950_v62 = vpop.f32.mrb[26].mxu1 }
 0x1c7   : > { %v4952_v63 = vpop.f32.mrb[27].mxu1 }
 0x1c8   : > { %3977 = vmatpush3.bf16.msra.mxu0 %v3974_v45 }
 0x1ca   : > { %v4954_v0 = vpop.f32.mrb[28].mxu1 }
 0x1cb   : > { %v4956_v1 = vpop.f32.mrb[29].mxu1 }
 0x1ce   : > { %v4958_v2 = vpop.f32.mrb[30].mxu1 }
 0x1cf   : > { %v4960_v4 = vpop.f32.mrb[31].mxu1 }
 0x21a   : > { %v1146_v6 = vpop.f32.mrb[0].mxu0 }
 0x21b   : > { %v4002_v7 = vadd.f32 %v4965_v5, %v1146_v6  ;;  %v1148_v8 = vpop.f32.mrb[1].mxu0 }
 0x21c   : > { %v1876_v8 = vld [vmem:[%s6191_s5 + $0x110] sm:$0xff] }
 0x21d   : > { %v1372_v9 = vadd.f32 %v4002_v7, %v4877_v18  ;;  %v1849_v18 = vld [vmem:[%s6191_s5 + $0x38] sm:$0xff]  ;;  %v3880_v7 = vpack.c.bf16 %v1863_v28, %v1856_v26 }
 0x21e   : > { %v1151_v12 = vpop.f32.mrb[2].mxu0  ;;  %v3876_v24 = vpack.c.bf16 %v1849_v18, %v1842_v19 }
 0x21f   : > { %v1530_v14 = vmax.f32 %v1372_v9, 0.0  ;;  %v4003_v15 = vadd.f32 %v4965_v5, %v1151_v12  ;;  %v1153_v17 = vpop.f32.mrb[3].mxu0  ;;  %v1883_v9 = vld [vmem:[%s6191_s5 + $0x148] sm:$0xff] }
 0x220   : > { %v1892_v17 = vld [vmem:[%s6191_s5 + $0x190] sm:$0xff]  ;;  %v3978_v18 = vpack.c.bf16 %v1883_v9, %v1876_v8  ;;  %v1913_v8 = vld [vmem:[%s6191_s5 + $0x238] sm:$0xff] }
 0x221   : > { %v1377_v22 = vadd.f32 %v4003_v15, %v4874_v16  ;;  %3538 = vmatprep.mubr.f32.mxu1 %v1530_v14  ;;  %v1871_v16 = vld [vmem:[%s6191_s5 + $0xe8] sm:$0xff]  ;;  %v1877_v14 = vld [vmem:[%s6191_s5 + $0x118] sm:$0xff]  ;;  %v1920_v9 = vld [vmem:[%s6191_s5 + $0x270] sm:$0xff] }
 0x222   : > { %v1156_v23 = vpop.f32.mrb[4].mxu0  ;;  %v1885_v15 = vld [vmem:[%s6191_s5 + $0x158] sm:$0xff]  ;;  %v3884_v21 = vpack.c.bf16 %v1877_v14, %v1870_v13  ;;  %3979 = vmatprep.subr.bf16.mxu0 %v3978_v18  ;;  %v1918_v13 = vld [vmem:[%s6191_s5 + $0x260] sm:$0xff] }
 0x223   : > { %v1531_v29 = vmax.f32 %v1377_v22, 0.0  ;;  %v4004_v30 = vadd.f32 %v4965_v5, %v1156_v23  ;;  %v1158_v32 = vpop.f32.mrb[5].mxu0  ;;  %v1890_v22 = vld [vmem:[%s6191_s5 + $0x180] sm:$0xff]  ;;  %v1897_v23 = vld [vmem:[%s6191_s5 + $0x1b8] sm:$0xff]  ;;  %3981 = vmatpush3.bf16.msra.mxu0 %v3978_v18  ;;  %v1912_v18 = vld [vmem:[%s6191_s5 + $0x230] sm:$0xff] }
 0x224   : > { %v1899_v32 = vld [vmem:[%s6191_s5 + $0x1c8] sm:$0xff]  ;;  %v1925_v14 = vld [vmem:[%s6191_s5 + $0x298] sm:$0xff] }
 0x225   : > { %v1382_v41 = vadd.f32 %v4004_v30, %v4891_v27  ;;  %3539 = vmatmul.mubr.f32.vlgmr.msra.gmra.mrb[32].mxu1 %v1531_v29  ;;  %v3882_v27 = vpack.c.bf16 %v1878_v3, %v1871_v16  ;;  %v1884_v29 = vld [vmem:[%s6191_s5 + $0x150] sm:$0xff]  ;;  %v1891_v30 = vld [vmem:[%s6191_s5 + $0x188] sm:$0xff]  ;;  %v3982_v3 = vpack.c.bf16 %v1897_v23, %v1890_v22  ;;  %v1934_v22 = vld [vmem:[%s6191_s5 + $0x2e0] sm:$0xff] }
 0x226   : > { %v1161_v6 = vpop.f32.mrb[6].mxu0  ;;  %3877 = vmatpush1.bf16.msra.mxu1 %v3876_v24  ;;  %v3888_v37 = vpack.c.bf16 %v1891_v30, %v1884_v29  ;;  %v1939_v29 = vld [vmem:[%s6191_s5 + $0x308] sm:$0xff] }
 0x227   : > { %v1532_v10 = vmax.f32 %v1382_v41, 0.0  ;;  %v4005_v11 = vadd.f32 %v4965_v5, %v1161_v6  ;;  %v1163_v12 = vpop.f32.mrb[7].mxu0  ;;  %3879 = vmatprep.subr.bf16.mxu1 %v3878_v34  ;;  %v1906_v34 = vld [vmem:[%s6191_s5 + $0x200] sm:$0xff]  ;;  %3983 = vmatprep.subr.bf16.mxu0 %v3982_v3 }
 0x228   : > { %v1898_v6 = vld [vmem:[%s6191_s5 + $0x1c0] sm:$0xff]  ;;  %3985 = vmatpush3.bf16.msra.mxu0 %v3982_v3  ;;  %v1933_v3 = vld [vmem:[%s6191_s5 + $0x2d8] sm:$0xff] }
 0x229   : > { %v1387_v19 = vadd.f32 %v4005_v11, %v4888_v25  ;;  %3541 = vmatprep.mubr.f32.mxu1 %v1532_v10  ;;  %v3886_v25 = vpack.c.bf16 %v1892_v17, %v1885_v15  ;;  %v3986_v11 = vpack.c.bf16 %v1911_v40, %v1904_v39 }
 0x22a   : > { %v1166_v20 = vpop.f32.mrb[8].mxu0  ;;  %3881 = vmatpush1.bf16.msra.mxu1 %v3880_v7  ;;  %v1905_v7 = vld [vmem:[%s6191_s5 + $0x1f8] sm:$0xff] }
 0x22b   : > { %v1533_v24 = vmax.f32 %v1387_v19, 0.0  ;;  %v4006_v26 = vadd.f32 %v4965_v5, %v1166_v20  ;;  %v1168_v28 = vpop.f32.mrb[9].mxu0  ;;  %3883 = vmatprep.subr.bf16.mxu1 %v3882_v27  ;;  %v3892_v27 = vpack.c.bf16 %v1905_v7, %v1898_v6  ;;  %v1919_v20 = vld [vmem:[%s6191_s5 + $0x268] sm:$0xff]  ;;  %3987 = vmatprep.subr.bf16.mxu0 %v3986_v11 }
 0x22c   : > { %v3896_v28 = vpack.c.bf16 %v1919_v20, %v1912_v18  ;;  %3989 = vmatpush3.bf16.msra.mxu0 %v3986_v11 }
 0x22d   : > { %v1392_v16 = vadd.f32 %v4006_v26, %v4899_v33  ;;  %3542 = vmatmul.mubr.f32.gmra.mrb[34].mxu1 %v1533_v24  ;;  %v3890_v33 = vpack.c.bf16 %v1906_v34, %v1899_v32  ;;  %v3990_v24 = vpack.c.bf16 %v1925_v14, %v1918_v13 }
 0x22e   : > { %v1171_v35 = vpop.f32.mrb[10].mxu0  ;;  %3885 = vmatpush1.bf16.msra.mxu1 %v3884_v21  ;;  %v1927_v21 = vld [vmem:[%s6191_s5 + $0x2a8] sm:$0xff] }
 0x22f   : > { %v1534_v41 = vmax.f32 %v1392_v16, 0.0  ;;  %v4007_v43 = vadd.f32 %v4965_v5, %v1171_v35  ;;  %v1173_v45 = vpop.f32.mrb[11].mxu0  ;;  %3887 = vmatprep.subr.bf16.mxu1 %v3886_v25  ;;  %v1932_v25 = vld [vmem:[%s6191_s5 + $0x2d0] sm:$0xff]  ;;  %v1926_v16 = vld [vmem:[%s6191_s5 + $0x2a0] sm:$0xff]  ;;  %v1941_v35 = vld [vmem:[%s6191_s5 + $0x318] sm:$0xff]  ;;  %3991 = vmatprep.subr.bf16.mxu0 %v3990_v24 }
 0x230   : > { %v3994_v40 = vpack.c.bf16 %v1939_v29, %v1932_v25  ;;  %3993 = vmatpush3.bf16.msra.mxu0 %v3990_v24 }
 0x231   : > { %v1397_v10 = vadd.f32 %v4007_v43, %v4896_v31  ;;  %3544 = vmatprep.mubr.f32.mxu1 %v1534_v41  ;;  %v3894_v31 = vpack.c.bf16 %v1920_v9, %v1913_v8  ;;  %v3900_v43 = vpack.c.bf16 %v1933_v3, %v1926_v16  ;;  %v1940_v8 = vld [vmem:[%s6191_s5 + $0x310] sm:$0xff] }
 0x232   : > { %v1176_v12 = vpop.f32.mrb[12].mxu0  ;;  %3889 = vmatpush1.bf16.msra.mxu1 %v3888_v37  ;;  %v1948_v37 = vld [vmem:[%s6191_s5 + $0x350] sm:$0xff]  ;;  %3995 = vmatprep.subr.bf16.mxu0 %v3994_v40 }
 0x233   : > { %v1535_v15 = vmax.f32 %v1397_v10, 0.0  ;;  %v4008_v17 = vadd.f32 %v4965_v5, %v1176_v12  ;;  %v1178_v19 = vpop.f32.mrb[13].mxu0  ;;  %3891 = vmatprep.subr.bf16.mxu1 %v3890_v33  ;;  %v3902_v7 = vpack.c.bf16 %v1948_v37, %v1941_v35 }
 0x234   : > { %3997 = vmatpush3.bf16.msra.mxu0 %v3994_v40 }
 0x235   : > { %v1402_v23 = vadd.f32 %v4008_v17, %v4907_v38  ;;  %3545 = vmatmul.mubr.f32.gmra.mrb[36].mxu1 %v1535_v15  ;;  %v3898_v38 = vpack.c.bf16 %v1934_v22, %v1927_v21 }
 0x236   : > { %v1181_v26 = vpop.f32.mrb[14].mxu0  ;;  %3893 = vmatpush1.bf16.msra.mxu1 %v3892_v27 }
 0x237   : > { %v1536_v30 = vmax.f32 %v1402_v23, 0.0  ;;  %v4009_v32 = vadd.f32 %v4965_v5, %v1181_v26  ;;  %v1183_v34 = vpop.f32.mrb[15].mxu0  ;;  %3895 = vmatprep.subr.bf16.mxu1 %v3894_v31 }
 0x239   : > { %v1407_v39 = vadd.f32 %v4009_v32, %v4904_v36  ;;  %3547 = vmatprep.mubr.f32.mxu1 %v1536_v30  ;;  %v1947_v36 = vld [vmem:[%s6191_s5 + $0x348] sm:$0xff] }
 0x23a   : > { %v1186_v41 = vpop.f32.mrb[16].mxu0  ;;  %3897 = vmatpush1.bf16.msra.mxu1 %v3896_v28  ;;  %v3904_v11 = vpack.c.bf16 %v1947_v36, %v1940_v8 }
 0x23b   : > { %v1537_v45 = vmax.f32 %v1407_v39, 0.0  ;;  %v4010_v33 = vadd.f32 %v4965_v5, %v1186_v41  ;;  %v1188_v6 = vpop.f32.mrb[17].mxu0  ;;  %3899 = vmatprep.subr.bf16.mxu1 %v3898_v38 }
 0x23d   : > { %v1412_v9 = vadd.f32 %v4010_v33, %v4915_v44  ;;  %3548 = vmatmul.mubr.f32.gmra.mrb[38].mxu1 %v1537_v45 }
 0x23e   : > { %v1191_v10 = vpop.f32.mrb[18].mxu0  ;;  %3901 = vmatpush1.bf16.msra.mxu1 %v3900_v43 }
 0x23f   : > { %v1538_v12 = vmax.f32 %v1412_v9, 0.0  ;;  %v4011_v27 = vadd.f32 %v4965_v5, %v1191_v10  ;;  %v1193_v13 = vpop.f32.mrb[19].mxu0  ;;  %3903 = vmatprep.subr.bf16.mxu1 %v3902_v7 }
 0x241   : > { %v1417_v14 = vadd.f32 %v4011_v27, %v4912_v42  ;;  %3550 = vmatprep.mubr.f32.mxu1 %v1538_v12 }
 0x242   : > { %v1196_v15 = vpop.f32.mrb[20].mxu0  ;;  %3905 = vmatpush1.bf16.msra.mxu1 %v3904_v11 }
 0x243   : > { %v1539_v17 = vmax.f32 %v1417_v14, 0.0  ;;  %v4012_v19 = vadd.f32 %v4965_v5, %v1196_v15  ;;  %v1198_v44 = vpop.f32.mrb[21].mxu0 }
 0x245   : > { %v1422_v31 = vadd.f32 %v4012_v19, %v4920_v47  ;;  %3551 = vmatmul.mubr.f32.gmra.mrb[40].mxu1 %v1539_v17 }
 0x246   : > { %v1201_v18 = vpop.f32.mrb[22].mxu0 }
 0x247   : > { %v1540_v20 = vmax.f32 %v1422_v31, 0.0  ;;  %v4013_v21 = vadd.f32 %v4965_v5, %v1201_v18  ;;  %v1203_v22 = vpop.f32.mrb[23].mxu0 }
 0x249   : > { %v1427_v23 = vadd.f32 %v4013_v21, %v4918_v46  ;;  %3553 = vmatprep.mubr.f32.mxu1 %v1540_v20 }
 0x24a   : > { %v1206_v24 = vpop.f32.mrb[24].mxu0 }
 0x24b   : > { %v1541_v42 = vmax.f32 %v1427_v23, 0.0  ;;  %v4014_v26 = vadd.f32 %v4965_v5, %v1206_v24  ;;  %v1208_v28 = vpop.f32.mrb[25].mxu0 }
 0x24d   : > { %v1432_v25 = vadd.f32 %v4014_v26, %v4924_v49  ;;  %3554 = vmatmul.mubr.f32.gmra.mrb[42].mxu1 %v1541_v42 }
 0x24e   : > { %v1211_v29 = vpop.f32.mrb[26].mxu0 }
 0x24f   : > { %v1542_v30 = vmax.f32 %v1432_v25, 0.0  ;;  %v4015_v47 = vadd.f32 %v4965_v5, %v1211_v29  ;;  %v1213_v32 = vpop.f32.mrb[27].mxu0 }
 0x251   : > { %v1437_v34 = vadd.f32 %v4015_v47, %v4922_v48  ;;  %3556 = vmatprep.mubr.f32.mxu1 %v1542_v30  ;;  %v1946_v47 = vld [vmem:[%s6191_s5 + $0x340] sm:$0xff] }
 0x252   : > { %v1216_v38 = vpop.f32.mrb[28].mxu0 }
 0x253   : > { %v1543_v16 = vmax.f32 %v1437_v34, 0.0  ;;  %v4016_v46 = vadd.f32 %v4965_v5, %v1216_v38  ;;  %v1218_v3 = vpop.f32.mrb[29].mxu0 }
 0x255   : > { %v1442_v35 = vadd.f32 %v4016_v46, %v4928_v51  ;;  %3557 = vmatmul.mubr.f32.gmra.mrb[44].mxu1 %v1543_v16 }
 0x256   : > { %v1221_v37 = vpop.f32.mrb[30].mxu0 }
 0x257   : > { %v1544_v39 = vmax.f32 %v1442_v35, 0.0  ;;  %v4017_v49 = vadd.f32 %v4965_v5, %v1221_v37  ;;  %v1223_v40 = vpop.f32.mrb[31].mxu0  ;;  %v1845_v37 = vld [vmem:[%s6191_s5 + $0x18] sm:$0xff] }
 0x259   : > { %v1447_v41 = vadd.f32 %v4017_v49, %v4926_v50  ;;  %3559 = vmatprep.mubr.f32.mxu1 %v1544_v39 }
 0x25a   : > { %v1226_v43 = vpop.f32.mrb[32].mxu0 }
 0x25b   : > { %v1545_v45 = vmax.f32 %v1447_v41, 0.0  ;;  %v4018_v48 = vadd.f32 %v4965_v5, %v1226_v43  ;;  %v1228_v33 = vpop.f32.mrb[33].mxu0 }
 0x25d   : > { %v1452_v6 = vadd.f32 %v4018_v48, %v4932_v53  ;;  %3560 = vmatmul.mubr.f32.gmra.mrb[46].mxu1 %v1545_v45 }
 0x25e   : > { %v1231_v7 = vpop.f32.mrb[34].mxu0 }
 0x25f   : > { %v1546_v8 = vmax.f32 %v1452_v6, 0.0  ;;  %v4019_v51 = vadd.f32 %v4965_v5, %v1231_v7  ;;  %v1233_v36 = vpop.f32.mrb[35].mxu0 }
 0x261   : > { %v1457_v9 = vadd.f32 %v4019_v51, %v4930_v52  ;;  %3562 = vmatprep.mubr.f32.mxu1 %v1546_v8 }
 0x262   : > { %v1236_v10 = vpop.f32.mrb[36].mxu0 }
 0x263   : > { %v1547_v11 = vmax.f32 %v1457_v9, 0.0  ;;  %v4020_v50 = vadd.f32 %v4965_v5, %v1236_v10  ;;  %v1238_v12 = vpop.f32.mrb[37].mxu0 }
 0x265   : > { %v1462_v27 = vadd.f32 %v4020_v50, %v4936_v55  ;;  %3563 = vmatmul.mubr.f32.gmra.mrb[48].mxu1 %v1547_v11 }
 0x266   : > { %v1241_v13 = vpop.f32.mrb[38].mxu0 }
 0x267   : > { %v1548_v14 = vmax.f32 %v1462_v27, 0.0  ;;  %v4021_v53 = vadd.f32 %v4965_v5, %v1241_v13  ;;  %v1243_v15 = vpop.f32.mrb[39].mxu0 }
 0x269   : > { %v1467_v17 = vadd.f32 %v4021_v53, %v4934_v54  ;;  %3565 = vmatprep.mubr.f32.mxu1 %v1548_v14 }
 0x26a   : > { %v1246_v19 = vpop.f32.mrb[40].mxu0 }
 0x26b   : > { %v1549_v44 = vmax.f32 %v1467_v17, 0.0  ;;  %v4022_v52 = vadd.f32 %v4965_v5, %v1246_v19  ;;  %v1248_v31 = vpop.f32.mrb[41].mxu0 }
 0x26d   : > { %v1472_v18 = vadd.f32 %v4022_v52, %v4940_v57  ;;  %3566 = vmatmul.mubr.f32.gmra.mrb[50].mxu1 %v1549_v44 }
 0x26e   : > { %v1251_v20 = vpop.f32.mrb[42].mxu0 }
 0x26f   : > { %v1550_v21 = vmax.f32 %v1472_v18, 0.0  ;;  %v4023_v55 = vadd.f32 %v4965_v5, %v1251_v20  ;;  %v1253_v22 = vpop.f32.mrb[43].mxu0 }
 0x270   : > { %v1844_v22 = vld [vmem:[%s6191_s5 + $0x10] sm:$0xff] }
 0x271   : > { %v1477_v23 = vadd.f32 %v4023_v55, %v4938_v56  ;;  %3568 = vmatprep.mubr.f32.mxu1 %v1550_v21  ;;  %v1953_v56 = vld [vmem:[%s6191_s5 + $0x378] sm:$0xff]  ;;  %v5185_v55 = vld [vmem:[%s6190_s4] ss:$0 sm:$0xff] }
 0x272   : > { %v1256_v24 = vpop.f32.mrb[44].mxu0  ;;  %v3998_v34 = vpack.c.bf16 %v1953_v56, %v1946_v47  ;;  %v1873_v47 = vld [vmem:[%s6191_s5 + $0xf8] sm:$0xff]  ;;  %v1880_v56 = vld [vmem:[%s6191_s5 + $0x130] sm:$0xff] }
 0x273   : > { %v1551_v42 = vmax.f32 %v1477_v23, 0.0  ;;  %v4024_v54 = vadd.f32 %v4965_v5, %v1256_v24  ;;  %v1258_v26 = vpop.f32.mrb[45].mxu0  ;;  %v1859_v24 = vld [vmem:[%s6191_s5 + $0x88] sm:$0xff] }
 0x274   : > { %3999 = vmatprep.subr.bf16.mxu0 %v3998_v34 }
 0x275   : > { %v1482_v28 = vadd.f32 %v4024_v54, %v4944_v59  ;;  %3569 = vmatmul.mubr.f32.gmra.mrb[52].mxu1 %v1551_v42  ;;  %4001 = vmatpush3.bf16.msra.mxu0 %v3998_v34  ;;  %v1866_v42 = vld [vmem:[%s6191_s5 + $0xc0] sm:$0xff] }
 0x276   : > { %v1261_v25 = vpop.f32.mrb[46].mxu0 }
 0x277   : > { %v1552_v29 = vmax.f32 %v1482_v28, 0.0  ;;  %v4025_v57 = vadd.f32 %v4965_v5, %v1261_v25  ;;  %v1263_v30 = vpop.f32.mrb[47].mxu0  ;;  %v3910_v25 = vpack.c.bf16 %v1866_v42, %v1859_v24  ;;  %v1949_v24 = vld [vmem:[%s6191_s5 + $0x358] sm:$0xff]  ;;  %v1847_v42 = vld [vmem:[%s6191_s5 + $0x28] sm:$0xff] }
 0x279   : > { %v1487_v32 = vadd.f32 %v4025_v57, %v4942_v58  ;;  %3571 = vmatprep.mubr.f32.mxu1 %v1552_v29  ;;  %v1852_v58 = vld [vmem:[%s6191_s5 + $0x50] sm:$0xff]  ;;  %v1858_v29 = vld [vmem:[%s6191_s5 + $0x80] sm:$0xff]  ;;  %v1865_v57 = vld [vmem:[%s6191_s5 + $0xb8] sm:$0xff] }
 0x27a   : > { %v1266_v38 = vpop.f32.mrb[48].mxu0  ;;  %v3906_v41 = vpack.c.bf16 %v1852_v58, %v1845_v37  ;;  %v1887_v37 = vld [vmem:[%s6191_s5 + $0x168] sm:$0xff]  ;;  %v1894_v58 = vld [vmem:[%s6191_s5 + $0x1a0] sm:$0xff] }
 0x27b   : > { %v1553_v59 = vmax.f32 %v1487_v32, 0.0  ;;  %v4026_v16 = vadd.f32 %v4965_v5, %v1266_v38  ;;  %v1268_v46 = vpop.f32.mrb[49].mxu0  ;;  %v3912_v32 = vpack.c.bf16 %v1865_v57, %v1858_v29  ;;  %v3914_v38 = vpack.c.bf16 %v1880_v56, %v1873_v47 }
 0x27c   : > { %3907 = vmatprep.subr.bf16.mxu1 %v3906_v41  ;;  %v1872_v46 = vld [vmem:[%s6191_s5 + $0xf0] sm:$0xff]  ;;  %v3918_v41 = vpack.c.bf16 %v1894_v58, %v1887_v37 }
 0x27d   : > { %v1492_v3 = vadd.f32 %v4026_v16, %v4948_v61  ;;  %3572 = vmatmul.mubr.f32.gmra.mrb[54].mxu1 %v1553_v59 }
 0x27e   : > { %v1271_v35 = vpop.f32.mrb[50].mxu0 }
 0x27f   : > { %v1554_v39 = vmax.f32 %v1492_v3, 0.0  ;;  %v4027_v49 = vadd.f32 %v4965_v5, %v1271_v35  ;;  %v1273_v40 = vpop.f32.mrb[51].mxu0  ;;  %v1879_v3 = vld [vmem:[%s6191_s5 + $0x128] sm:$0xff] }
 0x281   : > { %v1497_v43 = vadd.f32 %v4027_v49, %v4946_v60  ;;  %3574 = vmatprep.mubr.f32.mxu1 %v1554_v39  ;;  %v3916_v49 = vpack.c.bf16 %v1879_v3, %v1872_v46 }
 0x282   : > { %v1276_v61 = vpop.f32.mrb[52].mxu0 }
 0x283   : > { %v1555_v45 = vmax.f32 %v1497_v43, 0.0  ;;  %v4028_v48 = vadd.f32 %v4965_v5, %v1276_v61  ;;  %v1278_v33 = vpop.f32.mrb[53].mxu0  ;;  %v1886_v43 = vld [vmem:[%s6191_s5 + $0x160] sm:$0xff]  ;;  %v1893_v61 = vld [vmem:[%s6191_s5 + $0x198] sm:$0xff] }
 0x285   : > { %v1502_v6 = vadd.f32 %v4028_v48, %v4952_v63  ;;  %3575 = vmatmul.mubr.f32.gmra.mrb[56].mxu1 %v1555_v45  ;;  %v1901_v45 = vld [vmem:[%s6191_s5 + $0x1d8] sm:$0xff]  ;;  %v1908_v48 = vld [vmem:[%s6191_s5 + $0x210] sm:$0xff] }
 0x286   : > { %v1281_v7 = vpop.f32.mrb[54].mxu0 }
 0x287   : > { %v1556_v8 = vmax.f32 %v1502_v6, 0.0  ;;  %v4029_v51 = vadd.f32 %v4965_v5, %v1281_v7  ;;  %v1283_v36 = vpop.f32.mrb[55].mxu0  ;;  %v3920_v6 = vpack.c.bf16 %v1893_v61, %v1886_v43 }
 0x288   : > { %v1900_v36 = vld [vmem:[%s6191_s5 + $0x1d0] sm:$0xff] }
 0x289   : > { %v1507_v9 = vadd.f32 %v4029_v51, %v4950_v62  ;;  %3577 = vmatprep.mubr.f32.mxu1 %v1556_v8  ;;  %v3922_v51 = vpack.c.bf16 %v1908_v48, %v1901_v45 }
 0x28a   : > { %v1286_v10 = vpop.f32.mrb[56].mxu0 }
 0x28b   : > { %v1557_v60 = vmax.f32 %v1507_v9, 0.0  ;;  %v4030_v11 = vadd.f32 %v4965_v5, %v1286_v10  ;;  %v1288_v50 = vpop.f32.mrb[57].mxu0  ;;  %v1907_v9 = vld [vmem:[%s6191_s5 + $0x208] sm:$0xff] }
 0x28d   : > { %v1512_v12 = vadd.f32 %v4030_v11, %v4956_v1  ;;  %3578 = vmatmul.mubr.f32.gmra.mrb[58].mxu1 %v1557_v60  ;;  %v1915_v60 = vld [vmem:[%s6191_s5 + $0x248] sm:$0xff]  ;;  %v1922_v11 = vld [vmem:[%s6191_s5 + $0x280] sm:$0xff] }
 0x28e   : > { %v1291_v27 = vpop.f32.mrb[58].mxu0 }
 0x28f   : > { %v1558_v13 = vmax.f32 %v1512_v12, 0.0  ;;  %v4031_v63 = vadd.f32 %v4965_v5, %v1291_v27  ;;  %v1293_v14 = vpop.f32.mrb[59].mxu0  ;;  %v3924_v12 = vpack.c.bf16 %v1907_v9, %v1900_v36 }
 0x290   : > { %v1921_v14 = vld [vmem:[%s6191_s5 + $0x278] sm:$0xff] }
 0x291   : > { %v1517_v53 = vadd.f32 %v4031_v63, %v4954_v0  ;;  %3580 = vmatprep.mubr.f32.mxu1 %v1558_v13  ;;  %v4183_v0 = vmov 0.0   ;;  %v3926_v13 = vpack.c.bf16 %v1922_v11, %v1915_v60  ;;  %v1914_v63 = vld [vmem:[%s6191_s5 + $0x240] sm:$0xff] }
 0x292   : > { %v1296_v15 = vpop.f32.mrb[60].mxu0 }
 0x293   : > { %v1559_v17 = vmax.f32 %v1517_v53, 0.0  ;;  %v4032_v62 = vadd.f32 %v4965_v5, %v1296_v15  ;;  %v1298_v19 = vpop.f32.mrb[61].mxu0  ;;  %v1929_v53 = vld [vmem:[%s6191_s5 + $0x2b8] sm:$0xff]  ;;  %v1936_v15 = vld [vmem:[%s6191_s5 + $0x2f0] sm:$0xff] }
 0x295   : > { %v1522_v44 = vadd.f32 %v4032_v62, %v4960_v4  ;;  %3581 = vmatmul.mubr.f32.gmra.mrb[60].mxu1 %v1559_v17  ;;  %v3928_v62 = vpack.c.bf16 %v1921_v14, %v1914_v63 }
 0x296   : > { %v1301_v52 = vpop.f32.mrb[62].mxu0 }
 0x297   : > { %v1560_v31 = vmax.f32 %v1522_v44, 0.0  ;;  %v4033_v1 = vadd.f32 %v4965_v5, %v1301_v52  ;;  %v1303_v18 = vpop.f32.mrb[63].mxu0  ;;  %v3930_v52 = vpack.c.bf16 %v1936_v15, %v1929_v53 }
 0x299   : > { %v1527_v20 = vadd.f32 %v4033_v1, %v4958_v2  ;;  %3583 = vmatprep.mubr.f32.mxu1 %v1560_v31  ;;  %v1851_v2 = vld [vmem:[%s6191_s5 + $0x48] sm:$0xff]  ;;  %v1928_v31 = vld [vmem:[%s6191_s5 + $0x2b0] sm:$0xff] }
 0x29a   : > { %v3908_v26 = vpack.c.bf16 %v1851_v2, %v1844_v22  ;;  %v1935_v1 = vld [vmem:[%s6191_s5 + $0x2e8] sm:$0xff] }
 0x29b   : > { %v1561_v21 = vmax.f32 %v1527_v20, 0.0  ;;  %v1943_v20 = vld [vmem:[%s6191_s5 + $0x328] sm:$0xff]  ;;  %v3932_v22 = vpack.c.bf16 %v1935_v1, %v1928_v31 }
 0x29d   : > { %3584 = vmatmul.mubr.f32.gmra.mrb[62].mxu1 %v1561_v21  ;;  %v1950_v21 = vld [vmem:[%s6191_s5 + $0x360] sm:$0xff] }
 0x29e   : > { %2055 = vmatprep.mubr.f32.mxu1 %v4183_v0 }
 0x2f8   : > { %v3540_v4 = vpop.f32.mrb[32].mxu1 }
 0x2f9   : > { %v1657_v5 = vadd.f32 %v3540_v4, %v5185_v55  ;;  %v1651_v23 = vpop.f32.mrb[33].mxu1 }
 0x2fa   : > { %v1652_v54 = vadd.f32 %v5185_v55, %v1651_v23  ;;  %v1942_v23 = vld [vmem:[%s6191_s5 + $0x320] sm:$0xff] }
 0x2fb   : > { %v5209_v30 = vmax.f32 %v1657_v5, 0.0  ;;  %v3934_v5 = vpack.c.bf16 %v1950_v21, %v1943_v20 }
 0x2fc   : > { %v5201_v28 = vmax.f32 %v1652_v54, 0.0  ;;  %v1854_v54 = vld [vmem:[%s6191_s5 + $0x60] sm:$0xff] }
 0x2fd   : > { %v3938_v47 = vpack.c.bf16 %v1854_v54, %v1847_v42 }
 0x2fe   : > { %2056 = vmatmul.mubr.f32.vlgmr.msra.gmra.mrb[64].mxu1 %v5201_v28  ;;  %3618 = vmatprep.mubr.f32.mxu0 %v5201_v28 }
 0x2ff   : > { %3909 = vmatpush1.bf16.msra.mxu1 %v3908_v26  ;;  %3619 = vmatmul.mubr.f32.vlgmr.msra.gmra.mrb[64].mxu0 %v5209_v30 }
 0x300   : > { %v3543_v34 = vpop.f32.mrb[34].mxu1  ;;  %2061 = vmatprep.mubr.f32.mxu1 %v4183_v0  ;;  %3911 = vmatprep.subr.bf16.mxu1 %v3910_v25  ;;  %v3936_v25 = vpack.c.bf16 %v1949_v24, %v1942_v23 }
 0x301   : > { %v1667_v59 = vadd.f32 %v3543_v34, %v5185_v55  ;;  %v1661_v16 = vpop.f32.mrb[35].mxu1 }
 0x302   : > { %v1662_v35 = vadd.f32 %v5185_v55, %v1661_v16  ;;  %2062 = vmatmul.mubr.f32.gmra.mrb[66].mxu1 %v5209_v30 }
 0x303   : > { %2067 = vmatprep.mubr.f32.mxu1 %v4183_v0  ;;  %3913 = vmatpush1.bf16.msra.mxu1 %v3912_v32  ;;  %v5239_v40 = vmax.f32 %v1667_v59, 0.0 }
 0x304   : > { %v5237_v39 = vmax.f32 %v1662_v35, 0.0  ;;  %3915 = vmatprep.subr.bf16.mxu1 %v3914_v38 }
 0x306   : > { %2068 = vmatmul.mubr.f32.gmra.mrb[68].mxu1 %v5237_v39  ;;  %3621 = vmatprep.mubr.f32.mxu0 %v5237_v39 }
 0x307   : > { %3622 = vmatmul.mubr.f32.gmra.mrb[66].mxu0 %v5239_v40  ;;  %2073 = vmatprep.mubr.f32.mxu1 %v4183_v0 }
 0x308   : > { %v3546_v33 = vpop.f32.mrb[36].mxu1  ;;  %3917 = vmatpush1.bf16.msra.mxu1 %v3916_v49 }
 0x309   : > { %v1677_v7 = vadd.f32 %v3546_v33, %v5185_v55  ;;  %v1671_v8 = vpop.f32.mrb[37].mxu1  ;;  %3919 = vmatprep.subr.bf16.mxu1 %v3918_v41 }
 0x30a   : > { %v1672_v10 = vadd.f32 %v5185_v55, %v1671_v8  ;;  %2074 = vmatmul.mubr.f32.gmra.mrb[70].mxu1 %v5239_v40 }
 0x30b   : > { %2079 = vmatprep.mubr.f32.mxu1 %v4183_v0  ;;  %v5275_v27 = vmax.f32 %v1677_v7, 0.0 }
 0x30c   : > { %v5273_v50 = vmax.f32 %v1672_v10, 0.0  ;;  %3921 = vmatpush1.bf16.msra.mxu1 %v3920_v6 }
 0x30d   : > { %3923 = vmatprep.subr.bf16.mxu1 %v3922_v51 }
 0x30e   : > { %2080 = vmatmul.mubr.f32.gmra.mrb[72].mxu1 %v5273_v50  ;;  %3624 = vmatprep.mubr.f32.mxu0 %v5273_v50 }
 0x30f   : > { %3625 = vmatmul.mubr.f32.gmra.mrb[68].mxu0 %v5275_v27  ;;  %2085 = vmatprep.mubr.f32.mxu1 %v4183_v0 }
 0x310   : > { %v3549_v17 = vpop.f32.mrb[38].mxu1  ;;  %3925 = vmatpush1.bf16.msra.mxu1 %v3924_v12 }
 0x311   : > { %v1687_v19 = vadd.f32 %v3549_v17, %v5185_v55  ;;  %v1681_v44 = vpop.f32.mrb[39].mxu1  ;;  %3927 = vmatprep.subr.bf16.mxu1 %v3926_v13 }
 0x312   : > { %v1682_v18 = vadd.f32 %v5185_v55, %v1681_v44  ;;  %2086 = vmatmul.mubr.f32.gmra.mrb[74].mxu1 %v5275_v27 }
 0x313   : > { %2091 = vmatprep.mubr.f32.mxu1 %v4183_v0  ;;  %v5311_v2 = vmax.f32 %v1687_v19, 0.0 }
 0x314   : > { %v5309_v4 = vmax.f32 %v1682_v18, 0.0  ;;  %3929 = vmatpush1.bf16.msra.mxu1 %v3928_v62 }
 0x315   : > { %3931 = vmatprep.subr.bf16.mxu1 %v3930_v52 }
 0x316   : > { %2092 = vmatmul.mubr.f32.gmra.mrb[76].mxu1 %v5309_v4  ;;  %3627 = vmatprep.mubr.f32.mxu0 %v5309_v4 }
 0x317   : > { %3628 = vmatmul.mubr.f32.gmra.mrb[70].mxu0 %v5311_v2  ;;  %2097 = vmatprep.mubr.f32.mxu1 %v4183_v0 }
 0x318   : > { %v3552_v26 = vpop.f32.mrb[40].mxu1  ;;  %3933 = vmatpush1.bf16.msra.mxu1 %v3932_v22 }
 0x319   : > { %v1697_v29 = vadd.f32 %v3552_v26, %v5185_v55  ;;  %v1691_v57 = vpop.f32.mrb[41].mxu1  ;;  %3935 = vmatprep.subr.bf16.mxu1 %v3934_v5 }
 0x31a   : > { %v1692_v56 = vadd.f32 %v5185_v55, %v1691_v57  ;;  %2098 = vmatmul.mubr.f32.gmra.mrb[78].mxu1 %v5311_v2 }
 0x31b   : > { %2103 = vmatprep.mubr.f32.mxu1 %v4183_v0  ;;  %v5335_v34 = vmax.f32 %v1697_v29, 0.0 }
 0x31c   : > { %v5333_v32 = vmax.f32 %v1692_v56, 0.0  ;;  %3937 = vmatpush1.bf16.msra.mxu1 %v3936_v25 }
 0x31d   : > { %3939 = vmatprep.subr.bf16.mxu1 %v3938_v47 }
 0x31e   : > { %2104 = vmatmul.mubr.f32.gmra.mrb[80].mxu1 %v5333_v32  ;;  %3630 = vmatprep.mubr.f32.mxu0 %v5333_v32 }
 0x31f   : > { %3631 = vmatmul.mubr.f32.gmra.mrb[72].mxu0 %v5335_v34  ;;  %2109 = vmatprep.mubr.f32.mxu1 %v4183_v0 }
 0x320   : > { %v3555_v38 = vpop.f32.mrb[42].mxu1 }
 0x321   : > { %v1707_v59 = vadd.f32 %v3555_v38, %v5185_v55  ;;  %v1701_v16 = vpop.f32.mrb[43].mxu1 }
 0x322   : > { %v1702_v46 = vadd.f32 %v5185_v55, %v1701_v16  ;;  %2110 = vmatmul.mubr.f32.gmra.mrb[82].mxu1 %v5335_v34 }
 0x323   : > { %2115 = vmatprep.mubr.f32.mxu1 %v4183_v0  ;;  %v5347_v35 = vmax.f32 %v1707_v59, 0.0 }
 0x324   : > { %v5345_v3 = vmax.f32 %v1702_v46, 0.0 }
 0x326   : > { %2116 = vmatmul.mubr.f32.gmra.mrb[84].mxu1 %v5345_v3  ;;  %3633 = vmatprep.mubr.f32.mxu0 %v5345_v3 }
 0x327   : > { %3634 = vmatmul.mubr.f32.gmra.mrb[74].mxu0 %v5347_v35  ;;  %2121 = vmatprep.mubr.f32.mxu1 %v4183_v0 }
 0x328   : > { %v3558_v37 = vpop.f32.mrb[44].mxu1 }
 0x329   : > { %v1717_v58 = vadd.f32 %v3558_v37, %v5185_v55  ;;  %v1711_v49 = vpop.f32.mrb[45].mxu1 }
 0x32a   : > { %v1712_v41 = vadd.f32 %v5185_v55, %v1711_v49  ;;  %2122 = vmatmul.mubr.f32.gmra.mrb[86].mxu1 %v5347_v35 }
 0x32b   : > { %2127 = vmatprep.mubr.f32.mxu1 %v4183_v0  ;;  %v5359_v61 = vmax.f32 %v1717_v58, 0.0 }
 0x32c   : > { %v5357_v43 = vmax.f32 %v1712_v41, 0.0 }
 0x32e   : > { %2128 = vmatmul.mubr.f32.gmra.mrb[88].mxu1 %v5357_v43  ;;  %3636 = vmatprep.mubr.f32.mxu0 %v5357_v43 }
 0x32f   : > { %3637 = vmatmul.mubr.f32.gmra.mrb[76].mxu0 %v5359_v61  ;;  %2133 = vmatprep.mubr.f32.mxu1 %v4183_v0 }
 0x330   : > { %v3561_v45 = vpop.f32.mrb[46].mxu1 }
 0x331   : > { %v1727_v48 = vadd.f32 %v3561_v45, %v5185_v55  ;;  %v1721_v33 = vpop.f32.mrb[47].mxu1 }
 0x332   : > { %v1722_v6 = vadd.f32 %v5185_v55, %v1721_v33  ;;  %2134 = vmatmul.mubr.f32.gmra.mrb[90].mxu1 %v5359_v61 }
 0x333   : > { %2139 = vmatprep.mubr.f32.mxu1 %v4183_v0  ;;  %v5371_v8 = vmax.f32 %v1727_v48, 0.0 }
 0x334   : > { %v5369_v7 = vmax.f32 %v1722_v6, 0.0 }
 0x336   : > { %2140 = vmatmul.mubr.f32.gmra.mrb[92].mxu1 %v5369_v7  ;;  %3639 = vmatprep.mubr.f32.mxu0 %v5369_v7 }
 0x337   : > { %3640 = vmatmul.mubr.f32.gmra.mrb[78].mxu0 %v5371_v8  ;;  %2145 = vmatprep.mubr.f32.mxu1 %v4183_v0 }
 0x338   : > { %v3564_v51 = vpop.f32.mrb[48].mxu1 }
 0x339   : > { %v1737_v36 = vadd.f32 %v3564_v51, %v5185_v55  ;;  %v1731_v9 = vpop.f32.mrb[49].mxu1 }
 0x33a   : > { %v1732_v10 = vadd.f32 %v5185_v55, %v1731_v9  ;;  %2146 = vmatmul.mubr.f32.gmra.mrb[94].mxu1 %v5371_v8  ;;  %v1853_v9 = vld [vmem:[%s6191_s5 + $0x58] sm:$0xff] }
 0x33b   : > { %2151 = vmatprep.mubr.f32.mxu1 %v4183_v0  ;;  %v5383_v11 = vmax.f32 %v1737_v36, 0.0 }
 0x33c   : > { %v5381_v60 = vmax.f32 %v1732_v10, 0.0  ;;  %v1861_v10 = vld [vmem:[%s6191_s5 + $0x98] sm:$0xff] }
 0x33e   : > { %2152 = vmatmul.mubr.f32.gmra.mrb[96].mxu1 %v5381_v60  ;;  %3642 = vmatprep.mubr.f32.mxu0 %v5381_v60 }
 0x33f   : > { %3643 = vmatmul.mubr.f32.gmra.mrb[80].mxu0 %v5383_v11  ;;  %2157 = vmatprep.mubr.f32.mxu1 %v4183_v0 }
 0x340   : > { %v3567_v12 = vpop.f32.mrb[50].mxu1 }
 0x341   : > { %v1747_v13 = vadd.f32 %v3567_v12, %v5185_v55  ;;  %v1741_v63 = vpop.f32.mrb[51].mxu1  ;;  %v1868_v12 = vld [vmem:[%s6191_s5 + $0xd0] sm:$0xff] }
 0x342   : > { %v1742_v14 = vadd.f32 %v5185_v55, %v1741_v63  ;;  %2158 = vmatmul.mubr.f32.gmra.mrb[98].mxu1 %v5383_v11  ;;  %v3942_v63 = vpack.c.bf16 %v1868_v12, %v1861_v10  ;;  %v1938_v10 = vld [vmem:[%s6191_s5 + $0x300] sm:$0xff] }
 0x343   : > { %2163 = vmatprep.mubr.f32.mxu1 %v4183_v0  ;;  %v5395_v15 = vmax.f32 %v1747_v13, 0.0 }
 0x344   : > { %v5393_v53 = vmax.f32 %v1742_v14, 0.0  ;;  %v1860_v14 = vld [vmem:[%s6191_s5 + $0x90] sm:$0xff] }
 0x346   : > { %2164 = vmatmul.mubr.f32.gmra.mrb[100].mxu1 %v5393_v53  ;;  %3645 = vmatprep.mubr.f32.mxu0 %v5393_v53 }
 0x347   : > { %3646 = vmatmul.mubr.f32.gmra.mrb[82].mxu0 %v5395_v15  ;;  %2169 = vmatprep.mubr.f32.mxu1 %v4183_v0 }
 0x348   : > { %v3570_v17 = vpop.f32.mrb[52].mxu1 }
 0x349   : > { %v1757_v62 = vadd.f32 %v3570_v17, %v5185_v55  ;;  %v1751_v19 = vpop.f32.mrb[53].mxu1  ;;  %v1867_v17 = vld [vmem:[%s6191_s5 + $0xc8] sm:$0xff] }
 0x34a   : > { %v1752_v44 = vadd.f32 %v5185_v55, %v1751_v19  ;;  %2170 = vmatmul.mubr.f32.gmra.mrb[102].mxu1 %v5395_v15  ;;  %v1882_v19 = vld [vmem:[%s6191_s5 + $0x140] sm:$0xff] }
 0x34b   : > { %2175 = vmatprep.mubr.f32.mxu1 %v4183_v0  ;;  %v5407_v31 = vmax.f32 %v1757_v62, 0.0  ;;  %v1875_v62 = vld [vmem:[%s6191_s5 + $0x108] sm:$0xff] }
 0x34c   : > { %v5405_v52 = vmax.f32 %v1752_v44, 0.0  ;;  %v3944_v44 = vpack.c.bf16 %v1867_v17, %v1860_v14  ;;  %v1937_v14 = vld [vmem:[%s6191_s5 + $0x2f8] sm:$0xff] }
 0x34d   : > { %v1945_v17 = vld [vmem:[%s6191_s5 + $0x338] sm:$0xff] }
 0x34e   : > { %2176 = vmatmul.mubr.f32.gmra.mrb[104].mxu1 %v5405_v52  ;;  %3648 = vmatprep.mubr.f32.mxu0 %v5405_v52 }
 0x34f   : > { %3649 = vmatmul.mubr.f32.gmra.mrb[84].mxu0 %v5407_v31  ;;  %2181 = vmatprep.mubr.f32.mxu1 %v4183_v0 }
 0x350   : > { %v3573_v1 = vpop.f32.mrb[54].mxu1 }
 0x351   : > { %v1767_v18 = vadd.f32 %v3573_v1, %v5185_v55  ;;  %v1761_v20 = vpop.f32.mrb[55].mxu1  ;;  %v3946_v1 = vpack.c.bf16 %v1882_v19, %v1875_v62  ;;  %v1952_v62 = vld [vmem:[%s6191_s5 + $0x370] sm:$0xff] }
 0x352   : > { %v1762_v21 = vadd.f32 %v5185_v55, %v1761_v20  ;;  %2182 = vmatmul.mubr.f32.gmra.mrb[106].mxu1 %v5407_v31  ;;  %v1881_v20 = vld [vmem:[%s6191_s5 + $0x138] sm:$0xff] }
 0x353   : > { %2187 = vmatprep.mubr.f32.mxu1 %v4183_v0  ;;  %v5419_v5 = vmax.f32 %v1767_v18, 0.0  ;;  %v1874_v18 = vld [vmem:[%s6191_s5 + $0x100] sm:$0xff] }
 0x354   : > { %v5417_v22 = vmax.f32 %v1762_v21, 0.0  ;;  %v1889_v21 = vld [vmem:[%s6191_s5 + $0x178] sm:$0xff] }
 0x356   : > { %2188 = vmatmul.mubr.f32.gmra.mrb[108].mxu1 %v5417_v22  ;;  %3651 = vmatprep.mubr.f32.mxu0 %v5417_v22 }
 0x357   : > { %3652 = vmatmul.mubr.f32.gmra.mrb[86].mxu0 %v5419_v5  ;;  %2193 = vmatprep.mubr.f32.mxu1 %v4183_v0 }
 0x358   : > { %v3576_v23 = vpop.f32.mrb[56].mxu1 }
 0x359   : > { %v1777_v24 = vadd.f32 %v3576_v23, %v5185_v55  ;;  %v1771_v42 = vpop.f32.mrb[57].mxu1  ;;  %v1896_v23 = vld [vmem:[%s6191_s5 + $0x1b0] sm:$0xff] }
 0x35a   : > { %v1772_v54 = vadd.f32 %v5185_v55, %v1771_v42  ;;  %2194 = vmatmul.mubr.f32.gmra.mrb[110].mxu1 %v5419_v5  ;;  %v3950_v42 = vpack.c.bf16 %v1896_v23, %v1889_v21  ;;  %v1956_v21 = vlaneseq }
 0x35b   : > { %2199 = vmatprep.mubr.f32.mxu1 %v4183_v0  ;;  %v5431_v25 = vmax.f32 %v1777_v24, 0.0  ;;  %v3948_v24 = vpack.c.bf16 %v1881_v20, %v1874_v18  ;;  %v1951_v18 = vld [vmem:[%s6191_s5 + $0x368] sm:$0xff] }
 0x35c   : > { %v5429_v26 = vmax.f32 %v1772_v54, 0.0  ;;  %v1888_v54 = vld [vmem:[%s6191_s5 + $0x170] sm:$0xff]  ;;  %v5602_v23 = vshrl.u32 %v1956_v21, 7 }
 0x35e   : > { %2200 = vmatmul.mubr.f32.gmra.mrb[112].mxu1 %v5429_v26  ;;  %3654 = vmatprep.mubr.f32.mxu0 %v5429_v26 }
 0x35f   : > { %3655 = vmatmul.mubr.f32.gmra.mrb[88].mxu0 %v5431_v25  ;;  %2205 = vmatprep.mubr.f32.mxu1 %v4183_v0 }
 0x360   : > { %v3579_v29 = vpop.f32.mrb[58].mxu1 }
 0x361   : > { %v1787_v57 = vadd.f32 %v3579_v29, %v5185_v55  ;;  %v1781_v47 = vpop.f32.mrb[59].mxu1  ;;  %v1895_v29 = vld [vmem:[%s6191_s5 + $0x1a8] sm:$0xff] }
 0x362   : > { %v1782_v56 = vadd.f32 %v5185_v55, %v1781_v47  ;;  %2206 = vmatmul.mubr.f32.gmra.mrb[114].mxu1 %v5431_v25  ;;  %v1910_v47 = vld [vmem:[%s6191_s5 + $0x220] sm:$0xff] }
 0x363   : > { %2211 = vmatprep.mubr.f32.mxu1 %v4183_v0  ;;  %v5443_v59 = vmax.f32 %v1787_v57, 0.0  ;;  %v1903_v57 = vld [vmem:[%s6191_s5 + $0x1e8] sm:$0xff] }
 0x364   : > { %v5441_v38 = vmax.f32 %v1782_v56, 0.0  ;;  %v3952_v56 = vpack.c.bf16 %v1895_v29, %v1888_v54  ;;  %v1962_v54 = vsub.s32 1, %v5602_v23  ;;  %v1982_v29 = vsub.s32 6, %v5602_v23 }
 0x366   : > { %2212 = vmatmul.mubr.f32.gmra.mrb[116].mxu1 %v5441_v38  ;;  %3657 = vmatprep.mubr.f32.mxu0 %v5441_v38 }
 0x367   : > { %3658 = vmatmul.mubr.f32.gmra.mrb[90].mxu0 %v5443_v59  ;;  %2217 = vmatprep.mubr.f32.mxu1 %v4183_v0 }
 0x368   : > { %v3582_v16 = vpop.f32.mrb[60].mxu1 }
 0x369   : > { %v1797_v46 = vadd.f32 %v3582_v16, %v5185_v55  ;;  %v1791_v37 = vpop.f32.mrb[61].mxu1  ;;  %v3954_v16 = vpack.c.bf16 %v1910_v47, %v1903_v57 }
 0x36a   : > { %v1792_v58 = vadd.f32 %v5185_v55, %v1791_v37  ;;  %2218 = vmatmul.mubr.f32.gmra.mrb[118].mxu1 %v5443_v59  ;;  %v1909_v37 = vld [vmem:[%s6191_s5 + $0x218] sm:$0xff] }
 0x36b   : > { %2223 = vmatprep.mubr.f32.mxu1 %v4183_v0  ;;  %v5455_v41 = vmax.f32 %v1797_v46, 0.0  ;;  %v1902_v46 = vld [vmem:[%s6191_s5 + $0x1e0] sm:$0xff] }
 0x36c   : > { %v5453_v49 = vmax.f32 %v1792_v58, 0.0  ;;  %v1917_v58 = vld [vmem:[%s6191_s5 + $0x258] sm:$0xff] }
 0x36e   : > { %2224 = vmatmul.mubr.f32.gmra.mrb[120].mxu1 %v5453_v49  ;;  %3660 = vmatprep.mubr.f32.mxu0 %v5453_v49 }
 0x36f   : > { %3661 = vmatmul.mubr.f32.gmra.mrb[92].mxu0 %v5455_v41  ;;  %2229 = vmatprep.mubr.f32.mxu1 %v4183_v0 }
 0x370   : > { %v3585_v45 = vpop.f32.mrb[62].mxu1 }
 0x371   : > { %v1807_v48 = vadd.f32 %v3585_v45, %v5185_v55  ;;  %v1801_v33 = vpop.f32.mrb[63].mxu1  ;;  %v1924_v45 = vld [vmem:[%s6191_s5 + $0x290] sm:$0xff] }
 0x372   : > { %v1802_v6 = vadd.f32 %v5185_v55, %v1801_v33  ;;  %2230 = vmatmul.mubr.f32.gmra.mrb[122].mxu1 %v5455_v41  ;;  %v1846_v55 = vld [vmem:[%s6191_s5 + $0x20] sm:$0xff]  ;;  %v3958_v33 = vpack.c.bf16 %v1924_v45, %v1917_v58 }
 0x373   : > { %2235 = vmatprep.mubr.f32.mxu1 %v4183_v0  ;;  %v5467_v36 = vmax.f32 %v1807_v48, 0.0  ;;  %v3940_v13 = vpack.c.bf16 %v1853_v9, %v1846_v55  ;;  %v3956_v48 = vpack.c.bf16 %v1909_v37, %v1902_v46  ;;  %v1923_v55 = vld [vmem:[%s6191_s5 + $0x288] sm:$0xff] }
 0x374   : > { %v5465_v51 = vmax.f32 %v1802_v6, 0.0  ;;  %v1916_v6 = vld [vmem:[%s6191_s5 + $0x250] sm:$0xff]  ;;  %v1931_v9 = vld [vmem:[%s6191_s5 + $0x2c8] sm:$0xff] }
 0x375   : > { %v3960_v12 = vpack.c.bf16 %v1923_v55, %v1916_v6 }
 0x376   : > { %2236 = vmatmul.mubr.f32.gmra.mrb[124].mxu1 %v5465_v51  ;;  %3663 = vmatprep.mubr.f32.mxu0 %v5465_v51 }
 0x377   : > { %3664 = vmatmul.mubr.f32.gmra.mrb[94].mxu0 %v5467_v36  ;;  %2241 = vmatprep.mubr.f32.mxu1 %v4183_v0 }
 0x37a   : > { %2242 = vmatmul.mubr.f32.gmra.mrb[126].mxu1 %v5467_v36 }
 0x37b   : > { %2312 = vmatprep.mubr.f32.mxu1 %v4183_v0 }
 0x37e   : > { %2313 = vmatmul.mubr.f32.vlgmr.msra.gmra.mrb[128].mxu1 %v5201_v28 }
 0x37f   : > { %3941 = vmatpush1.bf16.msra.mxu1 %v3940_v13  ;;  %2318 = vmatprep.mubr.f32.mxu1 %v4183_v0  ;;  %v3962_v13 = vpack.c.bf16 %v1938_v10, %v1931_v9 }
 0x380   : > { %3943 = vmatprep.subr.bf16.mxu1 %v3942_v63  ;;  %v1930_v63 = vld [vmem:[%s6191_s5 + $0x2c0] sm:$0xff] }
 0x381   : > { %v3964_v19 = vpack.c.bf16 %v1937_v14, %v1930_v63 }
 0x382   : > { %2319 = vmatmul.mubr.f32.gmra.mrb[130].mxu1 %v5209_v30 }
 0x383   : > { %2324 = vmatprep.mubr.f32.mxu1 %v4183_v0  ;;  %3945 = vmatpush1.bf16.msra.mxu1 %v3944_v44  ;;  %v3966_v44 = vpack.c.bf16 %v1952_v62, %v1945_v17 }
 0x384   : > { %3947 = vmatprep.subr.bf16.mxu1 %v3946_v1  ;;  %v1944_v1 = vld [vmem:[%s6191_s5 + $0x330] sm:$0xff] }
 0x385   : > { %v3968_v20 = vpack.c.bf16 %v1951_v18, %v1944_v1 }
 0x386   : > { %2325 = vmatmul.mubr.f32.gmra.mrb[132].mxu1 %v5237_v39 }
 0x387   : > { %2330 = vmatprep.mubr.f32.mxu1 %v4183_v0  ;;  %3949 = vmatpush1.bf16.msra.mxu1 %v3948_v24  ;;  %v1958_v24 = vsub.s32 0, %v5602_v23 }
 0x388   : > { %3951 = vmatprep.subr.bf16.mxu1 %v3950_v42  ;;  %v5611_v42 = vld [vmem:[%s6192_s6] sm:$0xff] }
 0x389   : > { %v5617_v57 = vrot.slane %v5611_v42, %v1958_v24  ;;  %v5621_v47 = vrot.slane %v5611_v42, %v1962_v54 }
 0x38a   : > { %2331 = vmatmul.mubr.f32.gmra.mrb[134].mxu1 %v5239_v40 }
 0x38b   : > { %2336 = vmatprep.mubr.f32.mxu1 %v4183_v0  ;;  %3953 = vmatpush1.bf16.msra.mxu1 %v3952_v56  ;;  %v5624_v56 = vrot.slane %v5611_v42, %v1982_v29 }
 0x38c   : > { %3955 = vmatprep.subr.bf16.mxu1 %v3954_v16 }
 0x38e   : > { %2337 = vmatmul.mubr.f32.gmra.mrb[136].mxu1 %v5273_v50 }
 0x38f   : > { %2342 = vmatprep.mubr.f32.mxu1 %v4183_v0  ;;  %3957 = vmatpush1.bf16.msra.mxu1 %v3956_v48 }
 0x390   : > { %3959 = vmatprep.subr.bf16.mxu1 %v3958_v33 }
 0x392   : > { %2343 = vmatmul.mubr.f32.gmra.mrb[138].mxu1 %v5275_v27 }
 0x393   : > { %2348 = vmatprep.mubr.f32.mxu1 %v4183_v0  ;;  %3961 = vmatpush1.bf16.msra.mxu1 %v3960_v12 }
 0x394   : > { %3963 = vmatprep.subr.bf16.mxu1 %v3962_v13 }
 0x396   : > { %2349 = vmatmul.mubr.f32.gmra.mrb[140].mxu1 %v5309_v4 }
 0x397   : > { %2354 = vmatprep.mubr.f32.mxu1 %v4183_v0  ;;  %3965 = vmatpush1.bf16.msra.mxu1 %v3964_v19 }
 0x398   : > { %3967 = vmatprep.subr.bf16.mxu1 %v3966_v44 }
 0x39a   : > { %2355 = vmatmul.mubr.f32.gmra.mrb[142].mxu1 %v5311_v2 }
 0x39b   : > { %2360 = vmatprep.mubr.f32.mxu1 %v4183_v0  ;;  %3969 = vmatpush1.bf16.msra.mxu1 %v3968_v20 }
 0x39e   : > { %2361 = vmatmul.mubr.f32.gmra.mrb[144].mxu1 %v5333_v32 }
 0x39f   : > { %2366 = vmatprep.mubr.f32.mxu1 %v4183_v0 }
 0x3a2   : > { %2367 = vmatmul.mubr.f32.gmra.mrb[146].mxu1 %v5335_v34 }
 0x3a3   : > { %2372 = vmatprep.mubr.f32.mxu1 %v4183_v0 }
 0x3a6   : > { %2373 = vmatmul.mubr.f32.gmra.mrb[148].mxu1 %v5345_v3 }
 0x3a7   : > { %2378 = vmatprep.mubr.f32.mxu1 %v4183_v0 }
 0x3aa   : > { %2379 = vmatmul.mubr.f32.gmra.mrb[150].mxu1 %v5347_v35 }
 0x3ab   : > { %2384 = vmatprep.mubr.f32.mxu1 %v4183_v0 }
 0x3ae   : > { %2385 = vmatmul.mubr.f32.gmra.mrb[152].mxu1 %v5357_v43 }
 0x3af   : > { %2390 = vmatprep.mubr.f32.mxu1 %v4183_v0 }
 0x3b2   : > { %2391 = vmatmul.mubr.f32.gmra.mrb[154].mxu1 %v5359_v61 }
 0x3b3   : > { %2396 = vmatprep.mubr.f32.mxu1 %v4183_v0 }
 0x3b6   : > { %2397 = vmatmul.mubr.f32.gmra.mrb[156].mxu1 %v5369_v7 }
 0x3b7   : > { %2402 = vmatprep.mubr.f32.mxu1 %v4183_v0 }
 0x3ba   : > { %2403 = vmatmul.mubr.f32.gmra.mrb[158].mxu1 %v5371_v8 }
 0x3bb   : > { %2408 = vmatprep.mubr.f32.mxu1 %v4183_v0 }
 0x3be   : > { %2409 = vmatmul.mubr.f32.gmra.mrb[160].mxu1 %v5381_v60 }
 0x3bf   : > { %2414 = vmatprep.mubr.f32.mxu1 %v4183_v0 }
 0x3c2   : > { %2415 = vmatmul.mubr.f32.gmra.mrb[162].mxu1 %v5383_v11 }
 0x3c3   : > { %2420 = vmatprep.mubr.f32.mxu1 %v4183_v0 }
 0x3c6   : > { %2421 = vmatmul.mubr.f32.gmra.mrb[164].mxu1 %v5393_v53 }
 0x3c7   : > { %2426 = vmatprep.mubr.f32.mxu1 %v4183_v0 }
 0x3ca   : > { %2427 = vmatmul.mubr.f32.gmra.mrb[166].mxu1 %v5395_v15 }
 0x3cb   : > { %2432 = vmatprep.mubr.f32.mxu1 %v4183_v0 }
 0x3ce   : > { %2433 = vmatmul.mubr.f32.gmra.mrb[168].mxu1 %v5405_v52 }
 0x3cf   : > { %2438 = vmatprep.mubr.f32.mxu1 %v4183_v0 }
 0x3d1   : > { %v2057_v16 = vpop.f32.mrb[64].mxu1 }
 0x3d2   : > { %v2058_v46 = vadd.f32 %v2057_v16, %v5617_v57  ;;  %v2059_v37 = vpop.f32.mrb[65].mxu1  ;;  %2439 = vmatmul.mubr.f32.gmra.mrb[170].mxu1 %v5407_v31  ;;  %v3620_v58 = vpop.f32.mrb[64].mxu0 }
 0x3d3   : > { %v2060_v45 = vadd.f32 %v2059_v37, %v5621_v47  ;;  %v2834_v48 = vadd.f32 %v3620_v58, %v5624_v56  ;;  %v2828_v33 = vpop.f32.mrb[65].mxu0  ;;  %2444 = vmatprep.mubr.f32.mxu1 %v4183_v0 }
 0x3d4   : > { %2987 = vst [vmem:[%s5631_s29] sm:$0xff] %v2058_v46  ;;  %v2829_v6 = vadd.f32 %v2828_v33, %v5624_v56 }
 0x3d5   : > { %2988 = vst [vmem:[%s5631_s29 + $0x8] sm:$0xff] %v2060_v45  ;;  %3000 = vst [vmem:[%s5631_s29 + $0x68] sm:$0xff] %v2834_v48  ;;  %v2063_v55 = vpop.f32.mrb[66].mxu1 }
 0x3d6   : > { %2993 = vst [vmem:[%s5631_s29 + $0x30] sm:$0xff] %v2829_v6  ;;  %v2064_v9 = vadd.f32 %v2063_v55, %v5617_v57  ;;  %v2065_v10 = vpop.f32.mrb[67].mxu1  ;;  %2445 = vmatmul.mubr.f32.gmra.mrb[172].mxu1 %v5417_v22 }
 0x3d7   : > { %v2066_v12 = vadd.f32 %v2065_v10, %v5621_v47  ;;  %2450 = vmatprep.mubr.f32.mxu1 %v4183_v0 }
 0x3d8   : > { %2994 = vst [vmem:[%s5631_s29 + $0x38] sm:$0xff] %v2064_v9 }
 0x3d9   : > { %2995 = vst [vmem:[%s5631_s29 + $0x40] sm:$0xff] %v2066_v12  ;;  %v2069_v13 = vpop.f32.mrb[68].mxu1 }
 0x3da   : > { %v2070_v63 = vadd.f32 %v2069_v13, %v5617_v57  ;;  %v2071_v14 = vpop.f32.mrb[69].mxu1  ;;  %2451 = vmatmul.mubr.f32.gmra.mrb[174].mxu1 %v5419_v5  ;;  %v3623_v17 = vpop.f32.mrb[66].mxu0 }
 0x3db   : > { %v2072_v62 = vadd.f32 %v2071_v14, %v5621_v47  ;;  %v2844_v19 = vadd.f32 %v3623_v17, %v5624_v56  ;;  %v2838_v44 = vpop.f32.mrb[67].mxu0  ;;  %2456 = vmatprep.mubr.f32.mxu1 %v4183_v0 }
 0x3dc   : > { %3001 = vst [vmem:[%s5631_s29 + $0x70] sm:$0xff] %v2070_v63  ;;  %v2839_v1 = vadd.f32 %v2838_v44, %v5624_v56 }
 0x3dd   : > { %3002 = vst [vmem:[%s5631_s29 + $0x78] sm:$0xff] %v2072_v62  ;;  %3014 = vst [vmem:[%s5631_s29 + $0xd8] sm:$0xff] %v2844_v19  ;;  %v2075_v18 = vpop.f32.mrb[70].mxu1 }
 0x3de   : > { %3007 = vst [vmem:[%s5631_s29 + $0xa0] sm:$0xff] %v2839_v1  ;;  %v2076_v20 = vadd.f32 %v2075_v18, %v5617_v57  ;;  %v2077_v21 = vpop.f32.mrb[71].mxu1  ;;  %2457 = vmatmul.mubr.f32.gmra.mrb[176].mxu1 %v5429_v26 }
 0x3df   : > { %v2078_v24 = vadd.f32 %v2077_v21, %v5621_v47  ;;  %2462 = vmatprep.mubr.f32.mxu1 %v4183_v0 }
 0x3e0   : > { %3008 = vst [vmem:[%s5631_s29 + $0xa8] sm:$0xff] %v2076_v20 }
 0x3e1   : > { %3009 = vst [vmem:[%s5631_s29 + $0xb0] sm:$0xff] %v2078_v24  ;;  %v2081_v54 = vpop.f32.mrb[72].mxu1 }
 0x3e2   : > { %v2082_v29 = vadd.f32 %v2081_v54, %v5617_v57  ;;  %v2083_v16 = vpop.f32.mrb[73].mxu1  ;;  %2463 = vmatmul.mubr.f32.gmra.mrb[178].mxu1 %v5431_v25  ;;  %v3626_v46 = vpop.f32.mrb[68].mxu0 }
 0x3e3   : > { %v2084_v37 = vadd.f32 %v2083_v16, %v5621_v47  ;;  %v2854_v58 = vadd.f32 %v3626_v46, %v5624_v56  ;;  %v2848_v45 = vpop.f32.mrb[69].mxu0  ;;  %2468 = vmatprep.mubr.f32.mxu1 %v4183_v0 }
 0x3e4   : > { %3015 = vst [vmem:[%s5631_s29 + $0xe0] sm:$0xff] %v2082_v29  ;;  %v2849_v48 = vadd.f32 %v2848_v45, %v5624_v56 }
 0x3e5   : > { %3016 = vst [vmem:[%s5631_s29 + $0xe8] sm:$0xff] %v2084_v37  ;;  %3028 = vst [vmem:[%s5631_s29 + $0x148] sm:$0xff] %v2854_v58  ;;  %v2087_v33 = vpop.f32.mrb[74].mxu1 }
 0x3e6   : > { %3021 = vst [vmem:[%s5631_s29 + $0x110] sm:$0xff] %v2849_v48  ;;  %v2088_v6 = vadd.f32 %v2087_v33, %v5617_v57  ;;  %v2089_v55 = vpop.f32.mrb[75].mxu1  ;;  %2469 = vmatmul.mubr.f32.gmra.mrb[180].mxu1 %v5441_v38 }
 0x3e7   : > { %v2090_v9 = vadd.f32 %v2089_v55, %v5621_v47  ;;  %2474 = vmatprep.mubr.f32.mxu1 %v4183_v0 }
 0x3e8   : > { %3022 = vst [vmem:[%s5631_s29 + $0x118] sm:$0xff] %v2088_v6 }
 0x3e9   : > { %3023 = vst [vmem:[%s5631_s29 + $0x120] sm:$0xff] %v2090_v9  ;;  %v2093_v10 = vpop.f32.mrb[76].mxu1 }
 0x3ea   : > { %v2094_v12 = vadd.f32 %v2093_v10, %v5617_v57  ;;  %v2095_v13 = vpop.f32.mrb[77].mxu1  ;;  %2475 = vmatmul.mubr.f32.gmra.mrb[182].mxu1 %v5443_v59  ;;  %v3629_v63 = vpop.f32.mrb[70].mxu0 }
 0x3eb   : > { %v2096_v14 = vadd.f32 %v2095_v13, %v5621_v47  ;;  %v2864_v17 = vadd.f32 %v3629_v63, %v5624_v56  ;;  %v2858_v62 = vpop.f32.mrb[71].mxu0  ;;  %2480 = vmatprep.mubr.f32.mxu1 %v4183_v0 }
 0x3ec   : > { %3029 = vst [vmem:[%s5631_s29 + $0x150] sm:$0xff] %v2094_v12  ;;  %v2859_v19 = vadd.f32 %v2858_v62, %v5624_v56 }
 0x3ed   : > { %3030 = vst [vmem:[%s5631_s29 + $0x158] sm:$0xff] %v2096_v14  ;;  %3042 = vst [vmem:[%s5631_s29 + $0x1b8] sm:$0xff] %v2864_v17  ;;  %v2099_v44 = vpop.f32.mrb[78].mxu1 }
 0x3ee   : > { %3035 = vst [vmem:[%s5631_s29 + $0x180] sm:$0xff] %v2859_v19  ;;  %v2100_v1 = vadd.f32 %v2099_v44, %v5617_v57  ;;  %v2101_v18 = vpop.f32.mrb[79].mxu1  ;;  %2481 = vmatmul.mubr.f32.gmra.mrb[184].mxu1 %v5453_v49 }
 0x3ef   : > { %v2102_v20 = vadd.f32 %v2101_v18, %v5621_v47  ;;  %2486 = vmatprep.mubr.f32.mxu1 %v4183_v0 }
 0x3f0   : > { %3036 = vst [vmem:[%s5631_s29 + $0x188] sm:$0xff] %v2100_v1 }
 0x3f1   : > { %3037 = vst [vmem:[%s5631_s29 + $0x190] sm:$0xff] %v2102_v20  ;;  %v2105_v21 = vpop.f32.mrb[80].mxu1 }
 0x3f2   : > { %v2106_v24 = vadd.f32 %v2105_v21, %v5617_v57  ;;  %v2107_v54 = vpop.f32.mrb[81].mxu1  ;;  %2487 = vmatmul.mubr.f32.gmra.mrb[186].mxu1 %v5455_v41  ;;  %v3632_v29 = vpop.f32.mrb[72].mxu0 }
 0x3f3   : > { %v2108_v16 = vadd.f32 %v2107_v54, %v5621_v47  ;;  %v2874_v46 = vadd.f32 %v3632_v29, %v5624_v56  ;;  %v2868_v37 = vpop.f32.mrb[73].mxu0  ;;  %2492 = vmatprep.mubr.f32.mxu1 %v4183_v0 }
 0x3f4   : > { %3043 = vst [vmem:[%s5631_s29 + $0x1c0] sm:$0xff] %v2106_v24  ;;  %v2869_v58 = vadd.f32 %v2868_v37, %v5624_v56 }
 0x3f5   : > { %3044 = vst [vmem:[%s5631_s29 + $0x1c8] sm:$0xff] %v2108_v16  ;;  %3056 = vst [vmem:[%s5631_s29 + $0x228] sm:$0xff] %v2874_v46  ;;  %v2111_v45 = vpop.f32.mrb[82].mxu1 }
 0x3f6   : > { %3049 = vst [vmem:[%s5631_s29 + $0x1f0] sm:$0xff] %v2869_v58  ;;  %v2112_v48 = vadd.f32 %v2111_v45, %v5617_v57  ;;  %v2113_v33 = vpop.f32.mrb[83].mxu1  ;;  %2493 = vmatmul.mubr.f32.gmra.mrb[188].mxu1 %v5465_v51 }
 0x3f7   : > { %v2114_v6 = vadd.f32 %v2113_v33, %v5621_v47  ;;  %2498 = vmatprep.mubr.f32.mxu1 %v4183_v0 }
 0x3f8   : > { %3050 = vst [vmem:[%s5631_s29 + $0x1f8] sm:$0xff] %v2112_v48 }
 0x3f9   : > { %3051 = vst [vmem:[%s5631_s29 + $0x200] sm:$0xff] %v2114_v6  ;;  %v2117_v55 = vpop.f32.mrb[84].mxu1 }
 0x3fa   : > { %v2118_v9 = vadd.f32 %v2117_v55, %v5617_v57  ;;  %v2119_v10 = vpop.f32.mrb[85].mxu1  ;;  %2499 = vmatmul.mubr.f32.gmra.mrb[190].mxu1 %v5467_v36  ;;  %v3635_v12 = vpop.f32.mrb[74].mxu0 }
 0x3fb   : > { %v2120_v13 = vadd.f32 %v2119_v10, %v5621_v47  ;;  %v2884_v63 = vadd.f32 %v3635_v12, %v5624_v56  ;;  %v2878_v14 = vpop.f32.mrb[75].mxu0  ;;  %2569 = vmatprep.mubr.f32.mxu1 %v4183_v0 }
 0x3fc   : > { %3057 = vst [vmem:[%s5631_s29 + $0x230] sm:$0xff] %v2118_v9  ;;  %v2879_v17 = vadd.f32 %v2878_v14, %v5624_v56 }
 0x3fd   : > { %3058 = vst [vmem:[%s5631_s29 + $0x238] sm:$0xff] %v2120_v13  ;;  %3070 = vst [vmem:[%s5631_s29 + $0x298] sm:$0xff] %v2884_v63  ;;  %v2123_v62 = vpop.f32.mrb[86].mxu1 }
 0x3fe   : > { %3063 = vst [vmem:[%s5631_s29 + $0x260] sm:$0xff] %v2879_v17  ;;  %v2124_v19 = vadd.f32 %v2123_v62, %v5617_v57  ;;  %v2125_v44 = vpop.f32.mrb[87].mxu1  ;;  %2570 = vmatmul.mubr.f32.vlgmr.msra.gmra.mrb[192].mxu1 %v5201_v28 }
 0x3ff   : > { %v2126_v1 = vadd.f32 %v2125_v44, %v5621_v47  ;;  %2575 = vmatprep.mubr.f32.mxu1 %v4183_v0 }
 0x400   : > { %3064 = vst [vmem:[%s5631_s29 + $0x268] sm:$0xff] %v2124_v19 }
 0x401   : > { %3065 = vst [vmem:[%s5631_s29 + $0x270] sm:$0xff] %v2126_v1  ;;  %v2129_v18 = vpop.f32.mrb[88].mxu1 }
 0x402   : > { %v2130_v20 = vadd.f32 %v2129_v18, %v5617_v57  ;;  %v2131_v21 = vpop.f32.mrb[89].mxu1  ;;  %2576 = vmatmul.mubr.f32.gmra.mrb[194].mxu1 %v5209_v30  ;;  %v3638_v24 = vpop.f32.mrb[76].mxu0 }
 0x403   : > { %v2132_v54 = vadd.f32 %v2131_v21, %v5621_v47  ;;  %v2894_v28 = vadd.f32 %v3638_v24, %v5624_v56  ;;  %v2888_v29 = vpop.f32.mrb[77].mxu0  ;;  %2581 = vmatprep.mubr.f32.mxu1 %v4183_v0 }
 0x404   : > { %3071 = vst [vmem:[%s5631_s29 + $0x2a0] sm:$0xff] %v2130_v20  ;;  %v2889_v16 = vadd.f32 %v2888_v29, %v5624_v56 }
 0x405   : > { %3072 = vst [vmem:[%s5631_s29 + $0x2a8] sm:$0xff] %v2132_v54  ;;  %3084 = vst [vmem:[%s5631_s29 + $0x308] sm:$0xff] %v2894_v28  ;;  %v2135_v46 = vpop.f32.mrb[90].mxu1 }
 0x406   : > { %3077 = vst [vmem:[%s5631_s29 + $0x2d0] sm:$0xff] %v2889_v16  ;;  %v2136_v37 = vadd.f32 %v2135_v46, %v5617_v57  ;;  %v2137_v30 = vpop.f32.mrb[91].mxu1  ;;  %2582 = vmatmul.mubr.f32.gmra.mrb[196].mxu1 %v5237_v39 }
 0x407   : > { %v2138_v58 = vadd.f32 %v2137_v30, %v5621_v47  ;;  %2587 = vmatprep.mubr.f32.mxu1 %v4183_v0 }
 0x408   : > { %3078 = vst [vmem:[%s5631_s29 + $0x2d8] sm:$0xff] %v2136_v37 }
 0x409   : > { %3079 = vst [vmem:[%s5631_s29 + $0x2e0] sm:$0xff] %v2138_v58  ;;  %v2141_v45 = vpop.f32.mrb[92].mxu1 }
 0x40a   : > { %v2142_v48 = vadd.f32 %v2141_v45, %v5617_v57  ;;  %v2143_v33 = vpop.f32.mrb[93].mxu1  ;;  %2588 = vmatmul.mubr.f32.gmra.mrb[198].mxu1 %v5239_v40  ;;  %v3641_v6 = vpop.f32.mrb[78].mxu0 }
 0x40b   : > { %v2144_v55 = vadd.f32 %v2143_v33, %v5621_v47  ;;  %v2904_v39 = vadd.f32 %v3641_v6, %v5624_v56  ;;  %v2898_v9 = vpop.f32.mrb[79].mxu0  ;;  %2593 = vmatprep.mubr.f32.mxu1 %v4183_v0 }
 0x40c   : > { %3085 = vst [vmem:[%s5631_s29 + $0x310] sm:$0xff] %v2142_v48  ;;  %v2899_v10 = vadd.f32 %v2898_v9, %v5624_v56 }
 0x40d   : > { %3086 = vst [vmem:[%s5631_s29 + $0x318] sm:$0xff] %v2144_v55  ;;  %3098 = vst [vmem:[%s5631_s29 + $0x378] sm:$0xff] %v2904_v39  ;;  %v2147_v12 = vpop.f32.mrb[94].mxu1 }
 0x40e   : > { %3091 = vst [vmem:[%s5631_s29 + $0x340] sm:$0xff] %v2899_v10  ;;  %v2148_v13 = vadd.f32 %v2147_v12, %v5617_v57  ;;  %v2149_v40 = vpop.f32.mrb[95].mxu1  ;;  %2594 = vmatmul.mubr.f32.gmra.mrb[200].mxu1 %v5273_v50 }
 0x40f   : > { %v2150_v63 = vadd.f32 %v2149_v40, %v5621_v47  ;;  %2599 = vmatprep.mubr.f32.mxu1 %v4183_v0 }
 0x410   : > { %3092 = vst [vmem:[%s5631_s29 + $0x348] sm:$0xff] %v2148_v13 }
 0x411   : > { %3093 = vst [vmem:[%s5631_s29 + $0x350] sm:$0xff] %v2150_v63  ;;  %v2153_v14 = vpop.f32.mrb[96].mxu1 }
 0x412   : > { %v2154_v17 = vadd.f32 %v2153_v14, %v5617_v57  ;;  %v2155_v62 = vpop.f32.mrb[97].mxu1  ;;  %2600 = vmatmul.mubr.f32.gmra.mrb[202].mxu1 %v5275_v27  ;;  %v3644_v19 = vpop.f32.mrb[80].mxu0 }
 0x413   : > { %v2156_v44 = vadd.f32 %v2155_v62, %v5621_v47  ;;  %v2914_v50 = vadd.f32 %v3644_v19, %v5624_v56  ;;  %v2908_v1 = vpop.f32.mrb[81].mxu0  ;;  %2605 = vmatprep.mubr.f32.mxu1 %v4183_v0 }
 0x414   : > { %3099 = vst [vmem:[%s5631_s29 + $0x380] sm:$0xff] %v2154_v17  ;;  %v2909_v18 = vadd.f32 %v2908_v1, %v5624_v56 }
 0x415   : > { %3100 = vst [vmem:[%s5631_s29 + $0x388] sm:$0xff] %v2156_v44  ;;  %3112 = vst [vmem:[%s5631_s29 + $0x3e8] sm:$0xff] %v2914_v50  ;;  %v2159_v20 = vpop.f32.mrb[98].mxu1 }
 0x416   : > { %3105 = vst [vmem:[%s5631_s29 + $0x3b0] sm:$0xff] %v2909_v18  ;;  %v2160_v21 = vadd.f32 %v2159_v20, %v5617_v57  ;;  %v2161_v27 = vpop.f32.mrb[99].mxu1  ;;  %2606 = vmatmul.mubr.f32.gmra.mrb[204].mxu1 %v5309_v4 }
 0x417   : > { %v2162_v24 = vadd.f32 %v2161_v27, %v5621_v47  ;;  %2611 = vmatprep.mubr.f32.mxu1 %v4183_v0 }
 0x418   : > { %3106 = vst [vmem:[%s5631_s29 + $0x3b8] sm:$0xff] %v2160_v21 }
 0x419   : > { %3107 = vst [vmem:[%s5631_s29 + $0x3c0] sm:$0xff] %v2162_v24  ;;  %v2165_v54 = vpop.f32.mrb[100].mxu1 }
 0x41a   : > { %v2166_v28 = vadd.f32 %v2165_v54, %v5617_v57  ;;  %v2167_v29 = vpop.f32.mrb[101].mxu1  ;;  %2612 = vmatmul.mubr.f32.gmra.mrb[206].mxu1 %v5311_v2  ;;  %v3647_v16 = vpop.f32.mrb[82].mxu0 }
 0x41b   : > { %v2168_v46 = vadd.f32 %v2167_v29, %v5621_v47  ;;  %v2924_v4 = vadd.f32 %v3647_v16, %v5624_v56  ;;  %v2918_v37 = vpop.f32.mrb[83].mxu0  ;;  %2617 = vmatprep.mubr.f32.mxu1 %v4183_v0 }
 0x41c   : > { %3113 = vst [vmem:[%s5631_s29 + $0x3f0] sm:$0xff] %v2166_v28  ;;  %v2919_v30 = vadd.f32 %v2918_v37, %v5624_v56 }
 0x41d   : > { %3114 = vst [vmem:[%s5631_s29 + $0x3f8] sm:$0xff] %v2168_v46  ;;  %3126 = vst [vmem:[%s5631_s29 + $0x458] sm:$0xff] %v2924_v4  ;;  %v2171_v58 = vpop.f32.mrb[102].mxu1 }
 0x41e   : > { %3119 = vst [vmem:[%s5631_s29 + $0x420] sm:$0xff] %v2919_v30  ;;  %v2172_v45 = vadd.f32 %v2171_v58, %v5617_v57  ;;  %v2173_v2 = vpop.f32.mrb[103].mxu1  ;;  %2618 = vmatmul.mubr.f32.gmra.mrb[208].mxu1 %v5333_v32 }
 0x41f   : > { %v2174_v48 = vadd.f32 %v2173_v2, %v5621_v47  ;;  %2623 = vmatprep.mubr.f32.mxu1 %v4183_v0 }
 0x420   : > { %3120 = vst [vmem:[%s5631_s29 + $0x428] sm:$0xff] %v2172_v45 }
 0x421   : > { %3121 = vst [vmem:[%s5631_s29 + $0x430] sm:$0xff] %v2174_v48  ;;  %v2177_v33 = vpop.f32.mrb[104].mxu1 }
 0x422   : > { %v2178_v6 = vadd.f32 %v2177_v33, %v5617_v57  ;;  %v2179_v55 = vpop.f32.mrb[105].mxu1  ;;  %2624 = vmatmul.mubr.f32.gmra.mrb[210].mxu1 %v5335_v34  ;;  %v3650_v39 = vpop.f32.mrb[84].mxu0 }
 0x423   : > { %v2180_v9 = vadd.f32 %v2179_v55, %v5621_v47  ;;  %v2934_v32 = vadd.f32 %v3650_v39, %v5624_v56  ;;  %v2928_v10 = vpop.f32.mrb[85].mxu0  ;;  %2629 = vmatprep.mubr.f32.mxu1 %v4183_v0 }
 0x424   : > { %3127 = vst [vmem:[%s5631_s29 + $0x460] sm:$0xff] %v2178_v6  ;;  %v2929_v12 = vadd.f32 %v2928_v10, %v5624_v56 }
 0x425   : > { %3128 = vst [vmem:[%s5631_s29 + $0x468] sm:$0xff] %v2180_v9  ;;  %3140 = vst [vmem:[%s5631_s29 + $0x4c8] sm:$0xff] %v2934_v32  ;;  %v2183_v13 = vpop.f32.mrb[106].mxu1 }
 0x426   : > { %3133 = vst [vmem:[%s5631_s29 + $0x490] sm:$0xff] %v2929_v12  ;;  %v2184_v40 = vadd.f32 %v2183_v13, %v5617_v57  ;;  %v2185_v34 = vpop.f32.mrb[107].mxu1  ;;  %2630 = vmatmul.mubr.f32.gmra.mrb[212].mxu1 %v5345_v3 }
 0x427   : > { %v2186_v63 = vadd.f32 %v2185_v34, %v5621_v47  ;;  %2635 = vmatprep.mubr.f32.mxu1 %v4183_v0 }
 0x428   : > { %3134 = vst [vmem:[%s5631_s29 + $0x498] sm:$0xff] %v2184_v40 }
 0x429   : > { %3135 = vst [vmem:[%s5631_s29 + $0x4a0] sm:$0xff] %v2186_v63  ;;  %v2189_v14 = vpop.f32.mrb[108].mxu1 }
 0x42a   : > { %v2190_v17 = vadd.f32 %v2189_v14, %v5617_v57  ;;  %v2191_v62 = vpop.f32.mrb[109].mxu1  ;;  %2636 = vmatmul.mubr.f32.gmra.mrb[214].mxu1 %v5347_v35  ;;  %v3653_v19 = vpop.f32.mrb[86].mxu0 }
 0x42b   : > { %v2192_v44 = vadd.f32 %v2191_v62, %v5621_v47  ;;  %v2944_v3 = vadd.f32 %v3653_v19, %v5624_v56  ;;  %v2938_v50 = vpop.f32.mrb[87].mxu0  ;;  %2641 = vmatprep.mubr.f32.mxu1 %v4183_v0 }
 0x42c   : > { %3141 = vst [vmem:[%s5631_s29 + $0x4d0] sm:$0xff] %v2190_v17  ;;  %v2939_v1 = vadd.f32 %v2938_v50, %v5624_v56 }
 0x42d   : > { %3142 = vst [vmem:[%s5631_s29 + $0x4d8] sm:$0xff] %v2192_v44  ;;  %3154 = vst [vmem:[%s5631_s29 + $0x538] sm:$0xff] %v2944_v3  ;;  %v2195_v18 = vpop.f32.mrb[110].mxu1 }
 0x42e   : > { %3147 = vst [vmem:[%s5631_s29 + $0x500] sm:$0xff] %v2939_v1  ;;  %v2196_v20 = vadd.f32 %v2195_v18, %v5617_v57  ;;  %v2197_v35 = vpop.f32.mrb[111].mxu1  ;;  %2642 = vmatmul.mubr.f32.gmra.mrb[216].mxu1 %v5357_v43  ;;  %v1966_v18 = vsub.s32 2, %v5602_v23 }
 0x42f   : > { %v2198_v21 = vadd.f32 %v2197_v35, %v5621_v47  ;;  %2647 = vmatprep.mubr.f32.mxu1 %v4183_v0 }
 0x430   : > { %3148 = vst [vmem:[%s5631_s29 + $0x508] sm:$0xff] %v2196_v20 }
 0x431   : > { %3149 = vst [vmem:[%s5631_s29 + $0x510] sm:$0xff] %v2198_v21  ;;  %v2201_v27 = vpop.f32.mrb[112].mxu1  ;;  %v1970_v21 = vsub.s32 3, %v5602_v23 }
 0x432   : > { %v2202_v24 = vadd.f32 %v2201_v27, %v5617_v57  ;;  %v2203_v54 = vpop.f32.mrb[113].mxu1  ;;  %2648 = vmatmul.mubr.f32.gmra.mrb[218].mxu1 %v5359_v61  ;;  %v3656_v28 = vpop.f32.mrb[88].mxu0 }
 0x433   : > { %v2204_v29 = vadd.f32 %v2203_v54, %v5621_v47  ;;  %v2954_v43 = vadd.f32 %v3656_v28, %v5624_v56  ;;  %v2948_v16 = vpop.f32.mrb[89].mxu0  ;;  %2653 = vmatprep.mubr.f32.mxu1 %v4183_v0  ;;  %v5888_v28 = vrot.slane %v5611_v42, %v1966_v18 }
 0x434   : > { %3155 = vst [vmem:[%s5631_s29 + $0x540] sm:$0xff] %v2202_v24  ;;  %v2949_v46 = vadd.f32 %v2948_v16, %v5624_v56 }
 0x435   : > { %3156 = vst [vmem:[%s5631_s29 + $0x548] sm:$0xff] %v2204_v29  ;;  %3168 = vst [vmem:[%s5631_s29 + $0x5a8] sm:$0xff] %v2954_v43  ;;  %v2207_v4 = vpop.f32.mrb[114].mxu1 }
 0x436   : > { %3161 = vst [vmem:[%s5631_s29 + $0x570] sm:$0xff] %v2949_v46  ;;  %v2208_v37 = vadd.f32 %v2207_v4, %v5617_v57  ;;  %v2209_v61 = vpop.f32.mrb[115].mxu1  ;;  %2654 = vmatmul.mubr.f32.gmra.mrb[220].mxu1 %v5369_v7 }
 0x437   : > { %v2210_v30 = vadd.f32 %v2209_v61, %v5621_v47  ;;  %2659 = vmatprep.mubr.f32.mxu1 %v4183_v0 }
 0x438   : > { %3162 = vst [vmem:[%s5631_s29 + $0x578] sm:$0xff] %v2208_v37 }
 0x439   : > { %3163 = vst [vmem:[%s5631_s29 + $0x580] sm:$0xff] %v2210_v30  ;;  %v2213_v58 = vpop.f32.mrb[116].mxu1 }
 0x43a   : > { %v2214_v45 = vadd.f32 %v2213_v58, %v5617_v57  ;;  %v2215_v2 = vpop.f32.mrb[117].mxu1  ;;  %2660 = vmatmul.mubr.f32.gmra.mrb[222].mxu1 %v5371_v8  ;;  %v3659_v48 = vpop.f32.mrb[90].mxu0 }
 0x43b   : > { %v2216_v33 = vadd.f32 %v2215_v2, %v5621_v47  ;;  %v2964_v7 = vadd.f32 %v3659_v48, %v5624_v56  ;;  %v2958_v6 = vpop.f32.mrb[91].mxu0  ;;  %2665 = vmatprep.mubr.f32.mxu1 %v4183_v0 }
 0x43c   : > { %3169 = vst [vmem:[%s5631_s29 + $0x5b0] sm:$0xff] %v2214_v45  ;;  %v2959_v55 = vadd.f32 %v2958_v6, %v5624_v56 }
 0x43d   : > { %3170 = vst [vmem:[%s5631_s29 + $0x5b8] sm:$0xff] %v2216_v33  ;;  %3182 = vst [vmem:[%s5631_s29 + $0x618] sm:$0xff] %v2964_v7  ;;  %v2219_v39 = vpop.f32.mrb[118].mxu1 }
 0x43e   : > { %3175 = vst [vmem:[%s5631_s29 + $0x5e0] sm:$0xff] %v2959_v55  ;;  %v2220_v9 = vadd.f32 %v2219_v39, %v5617_v57  ;;  %v2221_v8 = vpop.f32.mrb[119].mxu1  ;;  %2666 = vmatmul.mubr.f32.gmra.mrb[224].mxu1 %v5381_v60 }
 0x43f   : > { %v2222_v32 = vadd.f32 %v2221_v8, %v5621_v47  ;;  %2671 = vmatprep.mubr.f32.mxu1 %v4183_v0 }
 0x440   : > { %3176 = vst [vmem:[%s5631_s29 + $0x5e8] sm:$0xff] %v2220_v9 }
 0x441   : > { %3177 = vst [vmem:[%s5631_s29 + $0x5f0] sm:$0xff] %v2222_v32  ;;  %v2225_v10 = vpop.f32.mrb[120].mxu1 }
 0x442   : > { %v2226_v12 = vadd.f32 %v2225_v10, %v5617_v57  ;;  %v2227_v13 = vpop.f32.mrb[121].mxu1  ;;  %2672 = vmatmul.mubr.f32.gmra.mrb[226].mxu1 %v5383_v11  ;;  %v3662_v40 = vpop.f32.mrb[92].mxu0 }
 0x443   : > { %v2228_v34 = vadd.f32 %v2227_v13, %v5621_v47  ;;  %v2974_v60 = vadd.f32 %v3662_v40, %v5624_v56  ;;  %v2968_v63 = vpop.f32.mrb[93].mxu0  ;;  %2677 = vmatprep.mubr.f32.mxu1 %v4183_v0 }
 0x444   : > { %3183 = vst [vmem:[%s5631_s29 + $0x620] sm:$0xff] %v2226_v12  ;;  %v2969_v14 = vadd.f32 %v2968_v63, %v5624_v56 }
 0x445   : > { %3184 = vst [vmem:[%s5631_s29 + $0x628] sm:$0xff] %v2228_v34  ;;  %3196 = vst [vmem:[%s5631_s29 + $0x688] sm:$0xff] %v2974_v60  ;;  %v2231_v17 = vpop.f32.mrb[122].mxu1 }
 0x446   : > { %3189 = vst [vmem:[%s5631_s29 + $0x650] sm:$0xff] %v2969_v14  ;;  %v2232_v62 = vadd.f32 %v2231_v17, %v5617_v57  ;;  %v2233_v11 = vpop.f32.mrb[123].mxu1  ;;  %2678 = vmatmul.mubr.f32.gmra.mrb[228].mxu1 %v5393_v53 }
 0x447   : > { %v2234_v19 = vadd.f32 %v2233_v11, %v5621_v47  ;;  %2683 = vmatprep.mubr.f32.mxu1 %v4183_v0 }
 0x448   : > { %3190 = vst [vmem:[%s5631_s29 + $0x658] sm:$0xff] %v2232_v62 }
 0x449   : > { %3191 = vst [vmem:[%s5631_s29 + $0x660] sm:$0xff] %v2234_v19  ;;  %v2237_v44 = vpop.f32.mrb[124].mxu1 }
 0x44a   : > { %v2238_v3 = vadd.f32 %v2237_v44, %v5617_v57  ;;  %v2239_v50 = vpop.f32.mrb[125].mxu1  ;;  %2684 = vmatmul.mubr.f32.gmra.mrb[230].mxu1 %v5395_v15  ;;  %v3665_v1 = vpop.f32.mrb[94].mxu0 }
 0x44b   : > { %v2240_v53 = vadd.f32 %v2239_v50, %v5621_v47  ;;  %v2984_v20 = vadd.f32 %v3665_v1, %v5624_v56  ;;  %v2978_v35 = vpop.f32.mrb[95].mxu0  ;;  %2689 = vmatprep.mubr.f32.mxu1 %v4183_v0 }
 0x44c   : > { %3197 = vst [vmem:[%s5631_s29 + $0x690] sm:$0xff] %v2238_v3  ;;  %v2979_v27 = vadd.f32 %v2978_v35, %v5624_v56  ;;  %v5893_v56 = vrot.slane %v5611_v42, %v1970_v21 }
 0x44d   : > { %3198 = vst [vmem:[%s5631_s29 + $0x698] sm:$0xff] %v2240_v53  ;;  %3210 = vst [vmem:[%s5631_s29 + $0x6f8] sm:$0xff] %v2984_v20  ;;  %v2243_v15 = vpop.f32.mrb[126].mxu1 }
 0x44e   : > { %3203 = vst [vmem:[%s5631_s29 + $0x6c0] sm:$0xff] %v2979_v27  ;;  %v2244_v24 = vadd.f32 %v2243_v15, %v5617_v57  ;;  %v2245_v54 = vpop.f32.mrb[127].mxu1  ;;  %2690 = vmatmul.mubr.f32.gmra.mrb[232].mxu1 %v5405_v52 }
 0x44f   : > { %v2246_v29 = vadd.f32 %v2245_v54, %v5621_v47  ;;  %2695 = vmatprep.mubr.f32.mxu1 %v4183_v0 }
 0x450   : > { %3204 = vst [vmem:[%s5631_s29 + $0x6c8] sm:$0xff] %v2244_v24 }
 0x451   : > { %3205 = vst [vmem:[%s5631_s29 + $0x6d0] sm:$0xff] %v2246_v29  ;;  %v2314_v43 = vpop.f32.mrb[128].mxu1 }
 0x452   : > { %v2315_v57 = vadd.f32 %v2314_v43, %v5888_v28  ;;  %v2316_v16 = vpop.f32.mrb[129].mxu1  ;;  %2696 = vmatmul.mubr.f32.gmra.mrb[234].mxu1 %v5407_v31 }
 0x453   : > { %v2317_v52 = vadd.f32 %v2316_v16, %v5893_v56  ;;  %2701 = vmatprep.mubr.f32.mxu1 %v4183_v0 }
 0x454   : > { %2989 = vst [vmem:[%s5631_s29 + $0x10] sm:$0xff] %v2315_v57 }
 0x455   : > { %2990 = vst [vmem:[%s5631_s29 + $0x18] sm:$0xff] %v2317_v52  ;;  %v2320_v42 = vpop.f32.mrb[130].mxu1 }
 0x456   : > { %v2321_v47 = vadd.f32 %v2320_v42, %v5888_v28  ;;  %v2322_v46 = vpop.f32.mrb[131].mxu1  ;;  %2702 = vmatmul.mubr.f32.gmra.mrb[236].mxu1 %v5417_v22 }
 0x457   : > { %v2323_v4 = vadd.f32 %v2322_v46, %v5893_v56  ;;  %2707 = vmatprep.mubr.f32.mxu1 %v4183_v0 }
 0x458   : > { %2996 = vst [vmem:[%s5631_s29 + $0x48] sm:$0xff] %v2321_v47 }
 0x459   : > { %2997 = vst [vmem:[%s5631_s29 + $0x50] sm:$0xff] %v2323_v4  ;;  %v2326_v31 = vpop.f32.mrb[132].mxu1 }
 0x45a   : > { %v2327_v37 = vadd.f32 %v2326_v31, %v5888_v28  ;;  %v2328_v61 = vpop.f32.mrb[133].mxu1  ;;  %2708 = vmatmul.mubr.f32.gmra.mrb[238].mxu1 %v5419_v5 }
 0x45b   : > { %v2329_v30 = vadd.f32 %v2328_v61, %v5893_v56  ;;  %2713 = vmatprep.mubr.f32.mxu1 %v4183_v0 }
 0x45c   : > { %3003 = vst [vmem:[%s5631_s29 + $0x80] sm:$0xff] %v2327_v37 }
 0x45d   : > { %3004 = vst [vmem:[%s5631_s29 + $0x88] sm:$0xff] %v2329_v30  ;;  %v2332_v22 = vpop.f32.mrb[134].mxu1 }
 0x45e   : > { %v2333_v58 = vadd.f32 %v2332_v22, %v5888_v28  ;;  %v2334_v45 = vpop.f32.mrb[135].mxu1  ;;  %2714 = vmatmul.mubr.f32.gmra.mrb[240].mxu1 %v5429_v26 }
 0x45f   : > { %v2335_v2 = vadd.f32 %v2334_v45, %v5893_v56  ;;  %2719 = vmatprep.mubr.f32.mxu1 %v4183_v0 }
 0x460   : > { %3010 = vst [vmem:[%s5631_s29 + $0xb8] sm:$0xff] %v2333_v58 }
 0x461   : > { %3011 = vst [vmem:[%s5631_s29 + $0xc0] sm:$0xff] %v2335_v2  ;;  %v2338_v5 = vpop.f32.mrb[136].mxu1 }
 0x462   : > { %v2339_v48 = vadd.f32 %v2338_v5, %v5888_v28  ;;  %v2340_v33 = vpop.f32.mrb[137].mxu1  ;;  %2720 = vmatmul.mubr.f32.gmra.mrb[242].mxu1 %v5431_v25 }
 0x463   : > { %v2341_v7 = vadd.f32 %v2340_v33, %v5893_v56  ;;  %2725 = vmatprep.mubr.f32.mxu1 %v4183_v0 }
 0x464   : > { %3017 = vst [vmem:[%s5631_s29 + $0xf0] sm:$0xff] %v2339_v48 }
 0x465   : > { %3018 = vst [vmem:[%s5631_s29 + $0xf8] sm:$0xff] %v2341_v7  ;;  %v2344_v26 = vpop.f32.mrb[138].mxu1 }
 0x466   : > { %v2345_v6 = vadd.f32 %v2344_v26, %v5888_v28  ;;  %v2346_v55 = vpop.f32.mrb[139].mxu1  ;;  %2726 = vmatmul.mubr.f32.gmra.mrb[244].mxu1 %v5441_v38 }
 0x467   : > { %v2347_v39 = vadd.f32 %v2346_v55, %v5893_v56  ;;  %2731 = vmatprep.mubr.f32.mxu1 %v4183_v0 }
 0x468   : > { %3024 = vst [vmem:[%s5631_s29 + $0x128] sm:$0xff] %v2345_v6 }
 0x469   : > { %3025 = vst [vmem:[%s5631_s29 + $0x130] sm:$0xff] %v2347_v39  ;;  %v2350_v25 = vpop.f32.mrb[140].mxu1 }
 0x46a   : > { %v2351_v9 = vadd.f32 %v2350_v25, %v5888_v28  ;;  %v2352_v8 = vpop.f32.mrb[141].mxu1  ;;  %2732 = vmatmul.mubr.f32.gmra.mrb[246].mxu1 %v5443_v59 }
 0x46b   : > { %v2353_v32 = vadd.f32 %v2352_v8, %v5893_v56  ;;  %2737 = vmatprep.mubr.f32.mxu1 %v4183_v0 }
 0x46c   : > { %3031 = vst [vmem:[%s5631_s29 + $0x160] sm:$0xff] %v2351_v9 }
 0x46d   : > { %3032 = vst [vmem:[%s5631_s29 + $0x168] sm:$0xff] %v2353_v32  ;;  %v2356_v38 = vpop.f32.mrb[142].mxu1 }
 0x46e   : > { %v2357_v10 = vadd.f32 %v2356_v38, %v5888_v28  ;;  %v2358_v12 = vpop.f32.mrb[143].mxu1  ;;  %2738 = vmatmul.mubr.f32.gmra.mrb[248].mxu1 %v5453_v49 }
 0x46f   : > { %v2359_v13 = vadd.f32 %v2358_v12, %v5893_v56  ;;  %2743 = vmatprep.mubr.f32.mxu1 %v4183_v0 }
 0x470   : > { %3038 = vst [vmem:[%s5631_s29 + $0x198] sm:$0xff] %v2357_v10 }
 0x471   : > { %3039 = vst [vmem:[%s5631_s29 + $0x1a0] sm:$0xff] %v2359_v13  ;;  %v2362_v59 = vpop.f32.mrb[144].mxu1 }
 0x472   : > { %v2363_v40 = vadd.f32 %v2362_v59, %v5888_v28  ;;  %v2364_v34 = vpop.f32.mrb[145].mxu1  ;;  %2744 = vmatmul.mubr.f32.gmra.mrb[250].mxu1 %v5455_v41 }
 0x473   : > { %v2365_v60 = vadd.f32 %v2364_v34, %v5893_v56  ;;  %2749 = vmatprep.mubr.f32.mxu1 %v4183_v0 }
 0x474   : > { %3045 = vst [vmem:[%s5631_s29 + $0x1d0] sm:$0xff] %v2363_v40 }
 0x475   : > { %3046 = vst [vmem:[%s5631_s29 + $0x1d8] sm:$0xff] %v2365_v60  ;;  %v2368_v49 = vpop.f32.mrb[146].mxu1 }
 0x476   : > { %v2369_v63 = vadd.f32 %v2368_v49, %v5888_v28  ;;  %v2370_v14 = vpop.f32.mrb[147].mxu1  ;;  %2750 = vmatmul.mubr.f32.gmra.mrb[252].mxu1 %v5465_v51 }
 0x477   : > { %v2371_v17 = vadd.f32 %v2370_v14, %v5893_v56  ;;  %2755 = vmatprep.mubr.f32.mxu1 %v4183_v0 }
 0x478   : > { %3052 = vst [vmem:[%s5631_s29 + $0x208] sm:$0xff] %v2369_v63 }
 0x479   : > { %3053 = vst [vmem:[%s5631_s29 + $0x210] sm:$0xff] %v2371_v17  ;;  %v2374_v41 = vpop.f32.mrb[148].mxu1 }
 0x47a   : > { %v2375_v62 = vadd.f32 %v2374_v41, %v5888_v28  ;;  %v2376_v11 = vpop.f32.mrb[149].mxu1  ;;  %2756 = vmatmul.mubr.f32.gmra.mrb[254].mxu1 %v5467_v36 }
 0x47b   : > { %v2377_v19 = vadd.f32 %v2376_v11, %v5893_v56 }
 0x47c   : > { %3059 = vst [vmem:[%s5631_s29 + $0x240] sm:$0xff] %v2375_v62 }
 0x47d   : > { %3060 = vst [vmem:[%s5631_s29 + $0x248] sm:$0xff] %v2377_v19  ;;  %v2380_v51 = vpop.f32.mrb[150].mxu1 }
 0x47e   : > { %v2381_v44 = vadd.f32 %v2380_v51, %v5888_v28  ;;  %v2382_v0 = vpop.f32.mrb[151].mxu1 }
 0x47f   : > { %v2383_v3 = vadd.f32 %v2382_v0, %v5893_v56 }
 0x480   : > { %3066 = vst [vmem:[%s5631_s29 + $0x278] sm:$0xff] %v2381_v44 }
 0x481   : > { %3067 = vst [vmem:[%s5631_s29 + $0x280] sm:$0xff] %v2383_v3  ;;  %v2386_v50 = vpop.f32.mrb[152].mxu1 }
 0x482   : > { %v2387_v1 = vadd.f32 %v2386_v50, %v5888_v28  ;;  %v2388_v36 = vpop.f32.mrb[153].mxu1 }
 0x483   : > { %v2389_v18 = vadd.f32 %v2388_v36, %v5893_v56 }
 0x484   : > { %3073 = vst [vmem:[%s5631_s29 + $0x2b0] sm:$0xff] %v2387_v1 }
 0x485   : > { %3074 = vst [vmem:[%s5631_s29 + $0x2b8] sm:$0xff] %v2389_v18  ;;  %v2392_v53 = vpop.f32.mrb[154].mxu1 }
 0x486   : > { %v2393_v20 = vadd.f32 %v2392_v53, %v5888_v28  ;;  %v2394_v35 = vpop.f32.mrb[155].mxu1 }
 0x487   : > { %v2395_v21 = vadd.f32 %v2394_v35, %v5893_v56 }
 0x488   : > { %3080 = vst [vmem:[%s5631_s29 + $0x2e8] sm:$0xff] %v2393_v20 }
 0x489   : > { %3081 = vst [vmem:[%s5631_s29 + $0x2f0] sm:$0xff] %v2395_v21  ;;  %v2398_v27 = vpop.f32.mrb[156].mxu1 }
 0x48a   : > { %v2399_v15 = vadd.f32 %v2398_v27, %v5888_v28  ;;  %v2400_v24 = vpop.f32.mrb[157].mxu1 }
 0x48b   : > { %v2401_v54 = vadd.f32 %v2400_v24, %v5893_v56 }
 0x48c   : > { %3087 = vst [vmem:[%s5631_s29 + $0x320] sm:$0xff] %v2399_v15 }
 0x48d   : > { %3088 = vst [vmem:[%s5631_s29 + $0x328] sm:$0xff] %v2401_v54  ;;  %v2404_v29 = vpop.f32.mrb[158].mxu1 }
 0x48e   : > { %v2405_v43 = vadd.f32 %v2404_v29, %v5888_v28  ;;  %v2406_v57 = vpop.f32.mrb[159].mxu1 }
 0x48f   : > { %v2407_v16 = vadd.f32 %v2406_v57, %v5893_v56  ;;  %v1974_v57 = vsub.s32 4, %v5602_v23 }
 0x490   : > { %3094 = vst [vmem:[%s5631_s29 + $0x358] sm:$0xff] %v2405_v43 }
 0x491   : > { %3095 = vst [vmem:[%s5631_s29 + $0x360] sm:$0xff] %v2407_v16  ;;  %v2410_v52 = vpop.f32.mrb[160].mxu1 }
 0x492   : > { %v2411_v42 = vadd.f32 %v2410_v52, %v5888_v28  ;;  %v2412_v47 = vpop.f32.mrb[161].mxu1  ;;  %v1978_v52 = vsub.s32 5, %v5602_v23 }
 0x493   : > { %v2413_v46 = vadd.f32 %v2412_v47, %v5893_v56 }
 0x494   : > { %3101 = vst [vmem:[%s5631_s29 + $0x390] sm:$0xff] %v2411_v42 }
 0x495   : > { %3102 = vst [vmem:[%s5631_s29 + $0x398] sm:$0xff] %v2413_v46  ;;  %v2416_v4 = vpop.f32.mrb[162].mxu1 }
 0x496   : > { %v2417_v31 = vadd.f32 %v2416_v4, %v5888_v28  ;;  %v2418_v37 = vpop.f32.mrb[163].mxu1  ;;  %v4173_v4 = vld [vmem:[%s6192_s6] sm:$0xff] }
 0x497   : > { %v2419_v61 = vadd.f32 %v2418_v37, %v5893_v56 }
 0x498   : > { %3108 = vst [vmem:[%s5631_s29 + $0x3c8] sm:$0xff] %v2417_v31  ;;  %v6048_v31 = vrot.slane %v4173_v4, %v1974_v57 }
 0x499   : > { %3109 = vst [vmem:[%s5631_s29 + $0x3d0] sm:$0xff] %v2419_v61  ;;  %v2422_v30 = vpop.f32.mrb[164].mxu1  ;;  %v6051_v61 = vrot.slane %v4173_v4, %v1978_v52 }
 0x49a   : > { %v2423_v22 = vadd.f32 %v2422_v30, %v5888_v28  ;;  %v2424_v58 = vpop.f32.mrb[165].mxu1 }
 0x49b   : > { %v2425_v45 = vadd.f32 %v2424_v58, %v5893_v56 }
 0x49c   : > { %3115 = vst [vmem:[%s5631_s29 + $0x400] sm:$0xff] %v2423_v22 }
 0x49d   : > { %3116 = vst [vmem:[%s5631_s29 + $0x408] sm:$0xff] %v2425_v45  ;;  %v2428_v2 = vpop.f32.mrb[166].mxu1 }
 0x49e   : > { %v2429_v5 = vadd.f32 %v2428_v2, %v5888_v28  ;;  %v2430_v48 = vpop.f32.mrb[167].mxu1 }
 0x49f   : > { %v2431_v33 = vadd.f32 %v2430_v48, %v5893_v56 }
 0x4a0   : > { %3122 = vst [vmem:[%s5631_s29 + $0x438] sm:$0xff] %v2429_v5 }
 0x4a1   : > { %3123 = vst [vmem:[%s5631_s29 + $0x440] sm:$0xff] %v2431_v33  ;;  %v2434_v7 = vpop.f32.mrb[168].mxu1 }
 0x4a2   : > { %v2435_v26 = vadd.f32 %v2434_v7, %v5888_v28  ;;  %v2436_v6 = vpop.f32.mrb[169].mxu1 }
 0x4a3   : > { %v2437_v55 = vadd.f32 %v2436_v6, %v5893_v56 }
 0x4a4   : > { %3129 = vst [vmem:[%s5631_s29 + $0x470] sm:$0xff] %v2435_v26 }
 0x4a5   : > { %3130 = vst [vmem:[%s5631_s29 + $0x478] sm:$0xff] %v2437_v55  ;;  %v2440_v39 = vpop.f32.mrb[170].mxu1 }
 0x4a6   : > { %v2441_v25 = vadd.f32 %v2440_v39, %v5888_v28  ;;  %v2442_v9 = vpop.f32.mrb[171].mxu1 }
 0x4a7   : > { %v2443_v8 = vadd.f32 %v2442_v9, %v5893_v56 }
 0x4a8   : > { %3136 = vst [vmem:[%s5631_s29 + $0x4a8] sm:$0xff] %v2441_v25 }
 0x4a9   : > { %3137 = vst [vmem:[%s5631_s29 + $0x4b0] sm:$0xff] %v2443_v8  ;;  %v2446_v32 = vpop.f32.mrb[172].mxu1 }
 0x4aa   : > { %v2447_v38 = vadd.f32 %v2446_v32, %v5888_v28  ;;  %v2448_v10 = vpop.f32.mrb[173].mxu1 }
 0x4ab   : > { %v2449_v12 = vadd.f32 %v2448_v10, %v5893_v56 }
 0x4ac   : > { %3143 = vst [vmem:[%s5631_s29 + $0x4e0] sm:$0xff] %v2447_v38 }
 0x4ad   : > { %3144 = vst [vmem:[%s5631_s29 + $0x4e8] sm:$0xff] %v2449_v12  ;;  %v2452_v13 = vpop.f32.mrb[174].mxu1 }
 0x4ae   : > { %v2453_v59 = vadd.f32 %v2452_v13, %v5888_v28  ;;  %v2454_v40 = vpop.f32.mrb[175].mxu1 }
 0x4af   : > { %v2455_v34 = vadd.f32 %v2454_v40, %v5893_v56 }
 0x4b0   : > { %3150 = vst [vmem:[%s5631_s29 + $0x518] sm:$0xff] %v2453_v59 }
 0x4b1   : > { %3151 = vst [vmem:[%s5631_s29 + $0x520] sm:$0xff] %v2455_v34  ;;  %v2458_v60 = vpop.f32.mrb[176].mxu1 }
 0x4b2   : > { %v2459_v49 = vadd.f32 %v2458_v60, %v5888_v28  ;;  %v2460_v63 = vpop.f32.mrb[177].mxu1 }
 0x4b3   : > { %v2461_v14 = vadd.f32 %v2460_v63, %v5893_v56 }
 0x4b4   : > { %3157 = vst [vmem:[%s5631_s29 + $0x550] sm:$0xff] %v2459_v49 }
 0x4b5   : > { %3158 = vst [vmem:[%s5631_s29 + $0x558] sm:$0xff] %v2461_v14  ;;  %v2464_v17 = vpop.f32.mrb[178].mxu1 }
 0x4b6   : > { %v2465_v41 = vadd.f32 %v2464_v17, %v5888_v28  ;;  %v2466_v62 = vpop.f32.mrb[179].mxu1 }
 0x4b7   : > { %v2467_v11 = vadd.f32 %v2466_v62, %v5893_v56 }
 0x4b8   : > { %3164 = vst [vmem:[%s5631_s29 + $0x588] sm:$0xff] %v2465_v41 }
 0x4b9   : > { %3165 = vst [vmem:[%s5631_s29 + $0x590] sm:$0xff] %v2467_v11  ;;  %v2470_v19 = vpop.f32.mrb[180].mxu1 }
 0x4ba   : > { %v2471_v51 = vadd.f32 %v2470_v19, %v5888_v28  ;;  %v2472_v44 = vpop.f32.mrb[181].mxu1 }
 0x4bb   : > { %v2473_v0 = vadd.f32 %v2472_v44, %v5893_v56 }
 0x4bc   : > { %3171 = vst [vmem:[%s5631_s29 + $0x5c0] sm:$0xff] %v2471_v51 }
 0x4bd   : > { %3172 = vst [vmem:[%s5631_s29 + $0x5c8] sm:$0xff] %v2473_v0  ;;  %v2476_v3 = vpop.f32.mrb[182].mxu1 }
 0x4be   : > { %v2477_v50 = vadd.f32 %v2476_v3, %v5888_v28  ;;  %v2478_v1 = vpop.f32.mrb[183].mxu1 }
 0x4bf   : > { %v2479_v36 = vadd.f32 %v2478_v1, %v5893_v56 }
 0x4c0   : > { %3178 = vst [vmem:[%s5631_s29 + $0x5f8] sm:$0xff] %v2477_v50 }
 0x4c1   : > { %3179 = vst [vmem:[%s5631_s29 + $0x600] sm:$0xff] %v2479_v36  ;;  %v2482_v18 = vpop.f32.mrb[184].mxu1 }
 0x4c2   : > { %v2483_v53 = vadd.f32 %v2482_v18, %v5888_v28  ;;  %v2484_v20 = vpop.f32.mrb[185].mxu1 }
 0x4c3   : > { %v2485_v35 = vadd.f32 %v2484_v20, %v5893_v56 }
 0x4c4   : > { %3185 = vst [vmem:[%s5631_s29 + $0x630] sm:$0xff] %v2483_v53 }
 0x4c5   : > { %3186 = vst [vmem:[%s5631_s29 + $0x638] sm:$0xff] %v2485_v35  ;;  %v2488_v21 = vpop.f32.mrb[186].mxu1 }
 0x4c6   : > { %v2489_v27 = vadd.f32 %v2488_v21, %v5888_v28  ;;  %v2490_v15 = vpop.f32.mrb[187].mxu1 }
 0x4c7   : > { %v2491_v24 = vadd.f32 %v2490_v15, %v5893_v56 }
 0x4c8   : > { %3192 = vst [vmem:[%s5631_s29 + $0x668] sm:$0xff] %v2489_v27 }
 0x4c9   : > { %3193 = vst [vmem:[%s5631_s29 + $0x670] sm:$0xff] %v2491_v24  ;;  %v2494_v54 = vpop.f32.mrb[188].mxu1 }
 0x4ca   : > { %v2495_v29 = vadd.f32 %v2494_v54, %v5888_v28  ;;  %v2496_v43 = vpop.f32.mrb[189].mxu1 }
 0x4cb   : > { %v2497_v16 = vadd.f32 %v2496_v43, %v5893_v56 }
 0x4cc   : > { %3199 = vst [vmem:[%s5631_s29 + $0x6a0] sm:$0xff] %v2495_v29 }
 0x4cd   : > { %3200 = vst [vmem:[%s5631_s29 + $0x6a8] sm:$0xff] %v2497_v16  ;;  %v2500_v42 = vpop.f32.mrb[190].mxu1 }
 0x4ce   : > { %v2501_v47 = vadd.f32 %v2500_v42, %v5888_v28  ;;  %v2502_v46 = vpop.f32.mrb[191].mxu1 }
 0x4cf   : > { %v2503_v37 = vadd.f32 %v2502_v46, %v5893_v56 }
 0x4d0   : > { %3206 = vst [vmem:[%s5631_s29 + $0x6d8] sm:$0xff] %v2501_v47 }
 0x4d1   : > { %3207 = vst [vmem:[%s5631_s29 + $0x6e0] sm:$0xff] %v2503_v37  ;;  %v2571_v23 = vpop.f32.mrb[192].mxu1 }
 0x4d2   : > { %v2572_v30 = vadd.f32 %v2571_v23, %v6048_v31  ;;  %v2573_v28 = vpop.f32.mrb[193].mxu1 }
 0x4d3   : > { %v2574_v22 = vadd.f32 %v2573_v28, %v6051_v61 }
 0x4d4   : > { %2991 = vst [vmem:[%s5631_s29 + $0x20] sm:$0xff] %v2572_v30 }
 0x4d5   : > { %2992 = vst [vmem:[%s5631_s29 + $0x28] sm:$0xff] %v2574_v22  ;;  %v2577_v58 = vpop.f32.mrb[194].mxu1 }
 0x4d6   : > { %v2578_v45 = vadd.f32 %v2577_v58, %v6048_v31  ;;  %v2579_v56 = vpop.f32.mrb[195].mxu1 }
 0x4d7   : > { %v2580_v2 = vadd.f32 %v2579_v56, %v6051_v61 }
 0x4d8   : > { %2998 = vst [vmem:[%s5631_s29 + $0x58] sm:$0xff] %v2578_v45 }
 0x4d9   : > { %2999 = vst [vmem:[%s5631_s29 + $0x60] sm:$0xff] %v2580_v2  ;;  %v2583_v5 = vpop.f32.mrb[196].mxu1 }
 0x4da   : > { %v2584_v48 = vadd.f32 %v2583_v5, %v6048_v31  ;;  %v2585_v33 = vpop.f32.mrb[197].mxu1 }
 0x4db   : > { %v2586_v7 = vadd.f32 %v2585_v33, %v6051_v61 }
 0x4dc   : > { %3005 = vst [vmem:[%s5631_s29 + $0x90] sm:$0xff] %v2584_v48 }
 0x4dd   : > { %3006 = vst [vmem:[%s5631_s29 + $0x98] sm:$0xff] %v2586_v7  ;;  %v2589_v26 = vpop.f32.mrb[198].mxu1 }
 0x4de   : > { %v2590_v6 = vadd.f32 %v2589_v26, %v6048_v31  ;;  %v2591_v55 = vpop.f32.mrb[199].mxu1 }
 0x4df   : > { %v2592_v39 = vadd.f32 %v2591_v55, %v6051_v61 }
 0x4e0   : > { %3012 = vst [vmem:[%s5631_s29 + $0xc8] sm:$0xff] %v2590_v6 }
 0x4e1   : > { %3013 = vst [vmem:[%s5631_s29 + $0xd0] sm:$0xff] %v2592_v39  ;;  %v2595_v25 = vpop.f32.mrb[200].mxu1 }
 0x4e2   : > { %v2596_v9 = vadd.f32 %v2595_v25, %v6048_v31  ;;  %v2597_v8 = vpop.f32.mrb[201].mxu1 }
 0x4e3   : > { %v2598_v32 = vadd.f32 %v2597_v8, %v6051_v61 }
 0x4e4   : > { %3019 = vst [vmem:[%s5631_s29 + $0x100] sm:$0xff] %v2596_v9 }
 0x4e5   : > { %3020 = vst [vmem:[%s5631_s29 + $0x108] sm:$0xff] %v2598_v32  ;;  %v2601_v38 = vpop.f32.mrb[202].mxu1 }
 0x4e6   : > { %v2602_v10 = vadd.f32 %v2601_v38, %v6048_v31  ;;  %v2603_v12 = vpop.f32.mrb[203].mxu1 }
 0x4e7   : > { %v2604_v13 = vadd.f32 %v2603_v12, %v6051_v61 }
 0x4e8   : > { %3026 = vst [vmem:[%s5631_s29 + $0x138] sm:$0xff] %v2602_v10 }
 0x4e9   : > { %3027 = vst [vmem:[%s5631_s29 + $0x140] sm:$0xff] %v2604_v13  ;;  %v2607_v59 = vpop.f32.mrb[204].mxu1 }
 0x4ea   : > { %v2608_v40 = vadd.f32 %v2607_v59, %v6048_v31  ;;  %v2609_v34 = vpop.f32.mrb[205].mxu1 }
 0x4eb   : > { %v2610_v60 = vadd.f32 %v2609_v34, %v6051_v61 }
 0x4ec   : > { %3033 = vst [vmem:[%s5631_s29 + $0x170] sm:$0xff] %v2608_v40 }
 0x4ed   : > { %3034 = vst [vmem:[%s5631_s29 + $0x178] sm:$0xff] %v2610_v60  ;;  %v2613_v49 = vpop.f32.mrb[206].mxu1 }
 0x4ee   : > { %v2614_v63 = vadd.f32 %v2613_v49, %v6048_v31  ;;  %v2615_v14 = vpop.f32.mrb[207].mxu1 }
 0x4ef   : > { %v2616_v17 = vadd.f32 %v2615_v14, %v6051_v61 }
 0x4f0   : > { %3040 = vst [vmem:[%s5631_s29 + $0x1a8] sm:$0xff] %v2614_v63 }
 0x4f1   : > { %3041 = vst [vmem:[%s5631_s29 + $0x1b0] sm:$0xff] %v2616_v17  ;;  %v2619_v41 = vpop.f32.mrb[208].mxu1 }
 0x4f2   : > { %v2620_v62 = vadd.f32 %v2619_v41, %v6048_v31  ;;  %v2621_v11 = vpop.f32.mrb[209].mxu1 }
 0x4f3   : > { %v2622_v19 = vadd.f32 %v2621_v11, %v6051_v61 }
 0x4f4   : > { %3047 = vst [vmem:[%s5631_s29 + $0x1e0] sm:$0xff] %v2620_v62 }
 0x4f5   : > { %3048 = vst [vmem:[%s5631_s29 + $0x1e8] sm:$0xff] %v2622_v19  ;;  %v2625_v51 = vpop.f32.mrb[210].mxu1 }
 0x4f6   : > { %v2626_v44 = vadd.f32 %v2625_v51, %v6048_v31  ;;  %v2627_v0 = vpop.f32.mrb[211].mxu1 }
 0x4f7   : > { %v2628_v3 = vadd.f32 %v2627_v0, %v6051_v61 }
 0x4f8   : > { %3054 = vst [vmem:[%s5631_s29 + $0x218] sm:$0xff] %v2626_v44 }
 0x4f9   : > { %3055 = vst [vmem:[%s5631_s29 + $0x220] sm:$0xff] %v2628_v3  ;;  %v2631_v50 = vpop.f32.mrb[212].mxu1 }
 0x4fa   : > { %v2632_v1 = vadd.f32 %v2631_v50, %v6048_v31  ;;  %v2633_v36 = vpop.f32.mrb[213].mxu1 }
 0x4fb   : > { %v2634_v18 = vadd.f32 %v2633_v36, %v6051_v61 }
 0x4fc   : > { %3061 = vst [vmem:[%s5631_s29 + $0x250] sm:$0xff] %v2632_v1 }
 0x4fd   : > { %3062 = vst [vmem:[%s5631_s29 + $0x258] sm:$0xff] %v2634_v18  ;;  %v2637_v53 = vpop.f32.mrb[214].mxu1 }
 0x4fe   : > { %v2638_v20 = vadd.f32 %v2637_v53, %v6048_v31  ;;  %v2639_v35 = vpop.f32.mrb[215].mxu1 }
 0x4ff   : > { %v2640_v21 = vadd.f32 %v2639_v35, %v6051_v61 }
 0x500   : > { %3068 = vst [vmem:[%s5631_s29 + $0x288] sm:$0xff] %v2638_v20 }
 0x501   : > { %3069 = vst [vmem:[%s5631_s29 + $0x290] sm:$0xff] %v2640_v21  ;;  %v2643_v27 = vpop.f32.mrb[216].mxu1 }
 0x502   : > { %v2644_v15 = vadd.f32 %v2643_v27, %v6048_v31  ;;  %v2645_v24 = vpop.f32.mrb[217].mxu1 }
 0x503   : > { %v2646_v54 = vadd.f32 %v2645_v24, %v6051_v61 }
 0x504   : > { %3075 = vst [vmem:[%s5631_s29 + $0x2c0] sm:$0xff] %v2644_v15 }
 0x505   : > { %3076 = vst [vmem:[%s5631_s29 + $0x2c8] sm:$0xff] %v2646_v54  ;;  %v2649_v29 = vpop.f32.mrb[218].mxu1 }
 0x506   : > { %v2650_v43 = vadd.f32 %v2649_v29, %v6048_v31  ;;  %v2651_v57 = vpop.f32.mrb[219].mxu1 }
 0x507   : > { %v2652_v16 = vadd.f32 %v2651_v57, %v6051_v61 }
 0x508   : > { %3082 = vst [vmem:[%s5631_s29 + $0x2f8] sm:$0xff] %v2650_v43 }
 0x509   : > { %3083 = vst [vmem:[%s5631_s29 + $0x300] sm:$0xff] %v2652_v16  ;;  %v2655_v52 = vpop.f32.mrb[220].mxu1 }
 0x50a   : > { %v2656_v42 = vadd.f32 %v2655_v52, %v6048_v31  ;;  %v2657_v47 = vpop.f32.mrb[221].mxu1 }
 0x50b   : > { %v2658_v46 = vadd.f32 %v2657_v47, %v6051_v61 }
 0x50c   : > { %3089 = vst [vmem:[%s5631_s29 + $0x330] sm:$0xff] %v2656_v42 }
 0x50d   : > { %3090 = vst [vmem:[%s5631_s29 + $0x338] sm:$0xff] %v2658_v46  ;;  %v2661_v4 = vpop.f32.mrb[222].mxu1 }
 0x50e   : > { %v2662_v37 = vadd.f32 %v2661_v4, %v6048_v31  ;;  %v2663_v23 = vpop.f32.mrb[223].mxu1 }
 0x50f   : > { %v2664_v30 = vadd.f32 %v2663_v23, %v6051_v61 }
 0x510   : > { %3096 = vst [vmem:[%s5631_s29 + $0x368] sm:$0xff] %v2662_v37 }
 0x511   : > { %3097 = vst [vmem:[%s5631_s29 + $0x370] sm:$0xff] %v2664_v30  ;;  %v2667_v28 = vpop.f32.mrb[224].mxu1 }
 0x512   : > { %v2668_v22 = vadd.f32 %v2667_v28, %v6048_v31  ;;  %v2669_v58 = vpop.f32.mrb[225].mxu1 }
 0x513   : > { %v2670_v45 = vadd.f32 %v2669_v58, %v6051_v61 }
 0x514   : > { %3103 = vst [vmem:[%s5631_s29 + $0x3a0] sm:$0xff] %v2668_v22 }
 0x515   : > { %3104 = vst [vmem:[%s5631_s29 + $0x3a8] sm:$0xff] %v2670_v45  ;;  %v2673_v56 = vpop.f32.mrb[226].mxu1 }
 0x516   : > { %v2674_v2 = vadd.f32 %v2673_v56, %v6048_v31  ;;  %v2675_v5 = vpop.f32.mrb[227].mxu1 }
 0x517   : > { %v2676_v48 = vadd.f32 %v2675_v5, %v6051_v61 }
 0x518   : > { %3110 = vst [vmem:[%s5631_s29 + $0x3d8] sm:$0xff] %v2674_v2 }
 0x519   : > { %3111 = vst [vmem:[%s5631_s29 + $0x3e0] sm:$0xff] %v2676_v48  ;;  %v2679_v33 = vpop.f32.mrb[228].mxu1 }
 0x51a   : > { %v2680_v7 = vadd.f32 %v2679_v33, %v6048_v31  ;;  %v2681_v26 = vpop.f32.mrb[229].mxu1 }
 0x51b   : > { %v2682_v6 = vadd.f32 %v2681_v26, %v6051_v61 }
 0x51c   : > { %3117 = vst [vmem:[%s5631_s29 + $0x410] sm:$0xff] %v2680_v7 }
 0x51d   : > { %3118 = vst [vmem:[%s5631_s29 + $0x418] sm:$0xff] %v2682_v6  ;;  %v2685_v55 = vpop.f32.mrb[230].mxu1 }
 0x51e   : > { %v2686_v39 = vadd.f32 %v2685_v55, %v6048_v31  ;;  %v2687_v25 = vpop.f32.mrb[231].mxu1 }
 0x51f   : > { %v2688_v9 = vadd.f32 %v2687_v25, %v6051_v61 }
 0x520   : > { %3124 = vst [vmem:[%s5631_s29 + $0x448] sm:$0xff] %v2686_v39 }
 0x521   : > { %3125 = vst [vmem:[%s5631_s29 + $0x450] sm:$0xff] %v2688_v9  ;;  %v2691_v8 = vpop.f32.mrb[232].mxu1 }
 0x522   : > { %v2692_v32 = vadd.f32 %v2691_v8, %v6048_v31  ;;  %v2693_v38 = vpop.f32.mrb[233].mxu1 }
 0x523   : > { %v2694_v10 = vadd.f32 %v2693_v38, %v6051_v61 }
 0x524   : > { %3131 = vst [vmem:[%s5631_s29 + $0x480] sm:$0xff] %v2692_v32 }
 0x525   : > { %3132 = vst [vmem:[%s5631_s29 + $0x488] sm:$0xff] %v2694_v10  ;;  %v2697_v12 = vpop.f32.mrb[234].mxu1 }
 0x526   : > { %v2698_v13 = vadd.f32 %v2697_v12, %v6048_v31  ;;  %v2699_v59 = vpop.f32.mrb[235].mxu1 }
 0x527   : > { %v2700_v40 = vadd.f32 %v2699_v59, %v6051_v61 }
 0x528   : > { %3138 = vst [vmem:[%s5631_s29 + $0x4b8] sm:$0xff] %v2698_v13 }
 0x529   : > { %3139 = vst [vmem:[%s5631_s29 + $0x4c0] sm:$0xff] %v2700_v40  ;;  %v2703_v34 = vpop.f32.mrb[236].mxu1 }
 0x52a   : > { %v2704_v60 = vadd.f32 %v2703_v34, %v6048_v31  ;;  %v2705_v49 = vpop.f32.mrb[237].mxu1 }
 0x52b   : > { %v2706_v63 = vadd.f32 %v2705_v49, %v6051_v61 }
 0x52c   : > { %3145 = vst [vmem:[%s5631_s29 + $0x4f0] sm:$0xff] %v2704_v60 }
 0x52d   : > { %3146 = vst [vmem:[%s5631_s29 + $0x4f8] sm:$0xff] %v2706_v63  ;;  %v2709_v14 = vpop.f32.mrb[238].mxu1 }
 0x52e   : > { %v2710_v17 = vadd.f32 %v2709_v14, %v6048_v31  ;;  %v2711_v41 = vpop.f32.mrb[239].mxu1 }
 0x52f   : > { %v2712_v62 = vadd.f32 %v2711_v41, %v6051_v61 }
 0x530   : > { %3152 = vst [vmem:[%s5631_s29 + $0x528] sm:$0xff] %v2710_v17 }
 0x531   : > { %3153 = vst [vmem:[%s5631_s29 + $0x530] sm:$0xff] %v2712_v62  ;;  %v2715_v11 = vpop.f32.mrb[240].mxu1 }
 0x532   : > { %v2716_v19 = vadd.f32 %v2715_v11, %v6048_v31  ;;  %v2717_v51 = vpop.f32.mrb[241].mxu1 }
 0x533   : > { %v2718_v44 = vadd.f32 %v2717_v51, %v6051_v61 }
 0x534   : > { %3159 = vst [vmem:[%s5631_s29 + $0x560] sm:$0xff] %v2716_v19 }
 0x535   : > { %3160 = vst [vmem:[%s5631_s29 + $0x568] sm:$0xff] %v2718_v44  ;;  %v2721_v0 = vpop.f32.mrb[242].mxu1 }
 0x536   : > { %v2722_v3 = vadd.f32 %v2721_v0, %v6048_v31  ;;  %v2723_v50 = vpop.f32.mrb[243].mxu1 }
 0x537   : > { %v2724_v1 = vadd.f32 %v2723_v50, %v6051_v61 }
 0x538   : > { %3166 = vst [vmem:[%s5631_s29 + $0x598] sm:$0xff] %v2722_v3 }
 0x539   : > { %3167 = vst [vmem:[%s5631_s29 + $0x5a0] sm:$0xff] %v2724_v1  ;;  %v2727_v36 = vpop.f32.mrb[244].mxu1 }
 0x53a   : > { %v2728_v18 = vadd.f32 %v2727_v36, %v6048_v31  ;;  %v2729_v53 = vpop.f32.mrb[245].mxu1 }
 0x53b   : > { %v2730_v20 = vadd.f32 %v2729_v53, %v6051_v61 }
 0x53c   : > { %3173 = vst [vmem:[%s5631_s29 + $0x5d0] sm:$0xff] %v2728_v18 }
 0x53d   : > { %3174 = vst [vmem:[%s5631_s29 + $0x5d8] sm:$0xff] %v2730_v20  ;;  %v2733_v35 = vpop.f32.mrb[246].mxu1 }
 0x53e   : > { %v2734_v21 = vadd.f32 %v2733_v35, %v6048_v31  ;;  %v2735_v27 = vpop.f32.mrb[247].mxu1 }
 0x53f   : > { %v2736_v15 = vadd.f32 %v2735_v27, %v6051_v61 }
 0x540   : > { %3180 = vst [vmem:[%s5631_s29 + $0x608] sm:$0xff] %v2734_v21 }
 0x541   : > { %3181 = vst [vmem:[%s5631_s29 + $0x610] sm:$0xff] %v2736_v15  ;;  %v2739_v24 = vpop.f32.mrb[248].mxu1 }
 0x542   : > { %v2740_v54 = vadd.f32 %v2739_v24, %v6048_v31  ;;  %v2741_v29 = vpop.f32.mrb[249].mxu1 }
 0x543   : > { %v2742_v43 = vadd.f32 %v2741_v29, %v6051_v61 }
 0x544   : > { %3187 = vst [vmem:[%s5631_s29 + $0x640] sm:$0xff] %v2740_v54 }
 0x545   : > { %3188 = vst [vmem:[%s5631_s29 + $0x648] sm:$0xff] %v2742_v43  ;;  %v2745_v57 = vpop.f32.mrb[250].mxu1 }
 0x546   : > { %v2746_v16 = vadd.f32 %v2745_v57, %v6048_v31  ;;  %v2747_v52 = vpop.f32.mrb[251].mxu1 }
 0x547   : > { %v2748_v42 = vadd.f32 %v2747_v52, %v6051_v61 }
 0x548   : > { %3194 = vst [vmem:[%s5631_s29 + $0x678] sm:$0xff] %v2746_v16 }
 0x549   : > { %3195 = vst [vmem:[%s5631_s29 + $0x680] sm:$0xff] %v2748_v42  ;;  %v2751_v47 = vpop.f32.mrb[252].mxu1 }
 0x54a   : > { %v2752_v46 = vadd.f32 %v2751_v47, %v6048_v31  ;;  %v2753_v4 = vpop.f32.mrb[253].mxu1 }
 0x54b   : > { %v2754_v37 = vadd.f32 %v2753_v4, %v6051_v61 }
 0x54c   : > { %3201 = vst [vmem:[%s5631_s29 + $0x6b0] sm:$0xff] %v2752_v46 }
 0x54d   : > { %3202 = vst [vmem:[%s5631_s29 + $0x6b8] sm:$0xff] %v2754_v37  ;;  %v2757_v23 = vpop.f32.mrb[254].mxu1 }
 0x54e   : > { %v2758_v30 = vadd.f32 %v2757_v23, %v6048_v31  ;;  %v2759_v28 = vpop.f32.mrb[255].mxu1 }
 0x54f   : > { %v2760_v22 = vadd.f32 %v2759_v28, %v6051_v61 }
 0x550   : > { %3208 = vst [vmem:[%s5631_s29 + $0x6e8] sm:$0xff] %v2758_v30 }
 0x551   : > { %3209 = vst [vmem:[%s5631_s29 + $0x6f0] sm:$0xff] %v2760_v22 }
 0x552 PF: > { %s17_s24 = sadd.s32 1, %s4180_s24  }
 0x553   : > { %p14_p4 = scmp.ge.s32.totalorder %s17_s24, 4  }
 0x555   :  { %16 = sbr.rel (!%p14_p4) target bundleno = 1 (0x1), region = 78 }

</bundles_post_ra>
